<compile_context>
chip_gen: v6e
topology: v6e:2x2x1
jax: 0.10.0
libtpu: 0.0.40
codegen_flags: <defaults>
</compile_context>

<pallas_src>
import functools

import jax
import jax.numpy as jnp
from jax import lax
from jax.experimental import pallas as pl
from jax.experimental.pallas import tpu as pltpu

EPS = 1e-3  # matches nn.BatchNorm1d(eps=0.001)


def _pick_pillar_tile(n, p, target_rows):
    """Largest pillar tile TN such that TN divides N, TN % 8 == 0 (or TN == N)
    and TN * P stays near `target_rows` (VMEM-friendly on all generations)."""
    tn = max(1, target_rows // p)
    if tn >= n:
        return n
    for t in range(tn, 7, -1):
        if n % t == 0 and t % 8 == 0:
            return t
    return n  # fall back to a single tile


def _stats_kernel(x_ref, w_ref, ymax_ref, ymin_ref, psum_ref, psumsq_ref,
                  *, tn, p, c_pad):
    # x_ref: (TN*P, C_in)   w_ref: (C_in, C_pad)
    # ymax/ymin: (TN, C_pad)   psum/psumsq: (8, C_pad) (row 0 carries the value)

    # Linear (no bias) on the MXU; bf16 or f32 operands, f32 accumulation.
    y = jnp.dot(x_ref[...], w_ref[...], preferred_element_type=jnp.float32)

    # Single-pass per-channel moment partials for the global BatchNorm stats.
    s = jnp.sum(y, axis=0, keepdims=True)            # (1, C_pad)
    ss = jnp.sum(y * y, axis=0, keepdims=True)       # (1, C_pad)
    row = lax.broadcasted_iota(jnp.int32, (8, c_pad), 0)
    psum_ref[...] = jnp.where(row == 0, s, 0.0)
    psumsq_ref[...] = jnp.where(row == 0, ss, 0.0)

    # Per-pillar max/min of the pre-BN activations.  The reshape only splits
    # the sublane axis on an 8-aligned boundary (P % 8 == 0 or TN == N), so it
    # is layout-preserving (no extra VMEM copy of y).
    y3 = y.reshape(tn, p, c_pad)
    ymax_ref[...] = jnp.max(y3, axis=1)
    ymin_ref[...] = jnp.min(y3, axis=1)


def _finalize_kernel(a_ref, b_ref, ymax_ref, ymin_ref, out_ref, *, c_out, c_pad):
    a = a_ref[...]            # (1, C_pad)
    b = b_ref[...]            # (1, C_pad)
    # relu(a*y+b) is monotone in y for a>0 and antitone for a<=0, so the max
    # over points is reached at ymax (a>0) or ymin (a<=0).
    z = jnp.where(a > 0.0, a * ymax_ref[...], a * ymin_ref[...]) + b
    z = jnp.maximum(z, 0.0)
    if c_pad == c_out:
        out_ref[...] = z
    else:
        out_ref[...] = z[:, :c_out]


def pillar_vfe(voxel_feats, weight, gamma, beta, *, use_bf16=True,
               target_rows=2048):
    """voxel_feats: (N, P, C_in); weight: (C_out, C_in) (nn.Linear layout);
    gamma/beta: (C_out,) BatchNorm affine params.  Returns (N, C_out) f32."""
    n, p, c_in = voxel_feats.shape
    c_out = weight.shape[0]
    c_pad = ((c_out + 127) // 128) * 128              # lane-dense channel width

    tn = _pick_pillar_tile(n, p, target_rows)
    num_tiles = n // tn

    # Glue (metadata-only reshape / tiny parameter padding) stays in XLA.
    x2d = voxel_feats.astype(jnp.float32).reshape(n * p, c_in)
    w_t = jnp.zeros((c_in, c_pad), jnp.float32).at[:, :c_out].set(
        weight.astype(jnp.float32).T)
    if use_bf16:
        x2d = x2d.astype(jnp.bfloat16)
        w_t = w_t.astype(jnp.bfloat16)

    stats_kernel = functools.partial(_stats_kernel, tn=tn, p=p, c_pad=c_pad)
    cparams = pltpu.CompilerParams(
        dimension_semantics=("parallel",),            # shards tiles on v7x's 2 TCs
        vmem_limit_bytes=32 * 1024 * 1024,            # safe on v7x's 64 MiB VMEM
    )

    ymax, ymin, psum, psumsq = pl.pallas_call(
        stats_kernel,
        grid=(num_tiles,),
        in_specs=[
            pl.BlockSpec((tn * p, c_in), lambda i: (i, 0)),
            pl.BlockSpec((c_in, c_pad), lambda i: (0, 0)),
        ],
        out_specs=(
            pl.BlockSpec((tn, c_pad), lambda i: (i, 0)),
            pl.BlockSpec((tn, c_pad), lambda i: (i, 0)),
            pl.BlockSpec((8, c_pad), lambda i: (i, 0)),
            pl.BlockSpec((8, c_pad), lambda i: (i, 0)),
        ),
        out_shape=(
            jax.ShapeDtypeStruct((n, c_pad), jnp.float32),
            jax.ShapeDtypeStruct((n, c_pad), jnp.float32),
            jax.ShapeDtypeStruct((num_tiles * 8, c_pad), jnp.float32),
            jax.ShapeDtypeStruct((num_tiles * 8, c_pad), jnp.float32),
        ),
        compiler_params=cparams,
    )(x2d, w_t)

    # Cross-tile reduction of the per-channel moments -> BN affine (tiny; JAX).
    total = jnp.float32(n * p)
    mean = jnp.sum(psum, axis=0) / total
    var = jnp.maximum(jnp.sum(psumsq, axis=0) / total - mean * mean, 0.0)
    gamma_pad = jnp.zeros((c_pad,), jnp.float32).at[:c_out].set(
        gamma.astype(jnp.float32))
    beta_pad = jnp.zeros((c_pad,), jnp.float32).at[:c_out].set(
        beta.astype(jnp.float32))
    a = gamma_pad * lax.rsqrt(var + EPS)
    b = beta_pad - mean * a

    fin_kernel = functools.partial(_finalize_kernel, c_out=c_out, c_pad=c_pad)
    out = pl.pallas_call(
        fin_kernel,
        grid=(num_tiles,),
        in_specs=[
            pl.BlockSpec((1, c_pad), lambda i: (0, 0)),
            pl.BlockSpec((1, c_pad), lambda i: (0, 0)),
            pl.BlockSpec((tn, c_pad), lambda i: (i, 0)),
            pl.BlockSpec((tn, c_pad), lambda i: (i, 0)),
        ],
        out_specs=pl.BlockSpec((tn, c_out), lambda i: (i, 0)),
        out_shape=jax.ShapeDtypeStruct((n, c_out), jnp.float32),
        compiler_params=pltpu.CompilerParams(dimension_semantics=("parallel",)),
    )(a.reshape(1, c_pad), b.reshape(1, c_pad), ymax, ymin)

    return out


def pillar_vfe_ref(voxel_feats, weight, gamma, beta):
    """Pure-JAX (f32) reference mirroring the PyTorch forward."""
    x = jnp.einsum("npc,oc->npo", voxel_feats, weight,
                   preferred_element_type=jnp.float32)
    mean = jnp.mean(x, axis=(0, 1), keepdims=True)
    var = jnp.mean(jnp.square(x - mean), axis=(0, 1), keepdims=True)
    x = (x - mean) / jnp.sqrt(var + EPS) * gamma + beta
    x = jax.nn.relu(x)
    return jnp.max(x, axis=1)


# TODO(synk): BatchNorm1d running-mean/var buffer updates (momentum=0.01) are a
# training-state side effect and are not part of the returned features.

if __name__ == "__main__":
    # Small but multi-tile shapes: 256 pillars x 32 points, 10 input features
    # (standard PointPillars encoding), 64 output channels.
    N, P, C_IN, C_OUT = 256, 32, 10, 64

    key = jax.random.PRNGKey(0)
    k1, k2, k3, k4 = jax.random.split(key, 4)
    voxel_feats = jax.random.normal(k1, (N, P, C_IN), dtype=jnp.float32)
    weight = jax.random.normal(k2, (C_OUT, C_IN), dtype=jnp.float32) * 0.1
    gamma = 1.0 + 0.1 * jax.random.normal(k3, (C_OUT,), dtype=jnp.float32)
    beta = 0.1 * jax.random.normal(k4, (C_OUT,), dtype=jnp.float32)

    fn = jax.jit(pillar_vfe, static_argnames=("use_bf16", "target_rows"))

    # Optimized path: bf16 matmul operands, f32 accumulation + BN/ReLU/max.
    out = jax.block_until_ready(fn(voxel_feats, weight, gamma, beta))
    ref = jax.block_until_ready(pillar_vfe_ref(voxel_feats, weight, gamma, beta))
    assert out.shape == (N, C_OUT), out.shape
    assert jnp.allclose(out, ref, atol=5e-2, rtol=5e-2), float(
        jnp.max(jnp.abs(out - ref)))

    # Full-f32 path (exact two-phase BN + max/min scheme, no bf16 cast).
    out_f32 = jax.block_until_ready(
        fn(voxel_feats, weight, gamma, beta, use_bf16=False))
    assert jnp.allclose(out_f32, ref, atol=5e-2, rtol=5e-2), float(
        jnp.max(jnp.abs(out_f32 - ref)))

    print("KERNEL_OK")
</pallas_src>

<mosaic_0001>
module attributes {stable_mosaic.version = 11 : i64} {
  func.func @_finalize_kernel(%arg0: i32, %arg1: memref<1x128xf32, #tpu.memory_space<vmem>>, %arg2: memref<1x128xf32, #tpu.memory_space<vmem>>, %arg3: memref<64x128xf32, #tpu.memory_space<vmem>>, %arg4: memref<64x128xf32, #tpu.memory_space<vmem>>, %arg5: memref<64x64xf32, #tpu.memory_space<vmem>>) attributes {dimension_semantics = [#tpu.dimension_semantics<parallel>], iteration_bounds = array<i64: 4>, scalar_prefetch = 0 : i64, scratch_operands = 0 : i64, tpu.core_type = #tpu.core_type<tc>, window_params = [{pipeline_mode = #tpu.pipeline_mode<synchronous>, transform_indices = @transform_0, window_bounds = array<i64: 1, 128>}, {pipeline_mode = #tpu.pipeline_mode<synchronous>, transform_indices = @transform_1, window_bounds = array<i64: 1, 128>}, {transform_indices = @transform_2, window_bounds = array<i64: 64, 128>}, {transform_indices = @transform_3, window_bounds = array<i64: 64, 128>}, {transform_indices = @transform_4, window_bounds = array<i64: 64, 64>}]} {
    %c0 = arith.constant 0 : index
    %c0_0 = arith.constant 0 : index
    %0 = vector.load %arg1[%c0, %c0_0] : memref<1x128xf32, #tpu.memory_space<vmem>>, vector<1x128xf32>
    %c0_1 = arith.constant 0 : index
    %c0_2 = arith.constant 0 : index
    %1 = vector.load %arg2[%c0_1, %c0_2] : memref<1x128xf32, #tpu.memory_space<vmem>>, vector<1x128xf32>
    %cst = arith.constant 0.000000e+00 : f32
    %2 = vector.broadcast %cst : f32 to vector<1x128xf32>
    %3 = arith.cmpf ogt, %0, %2 : vector<1x128xf32>
    %c0_3 = arith.constant 0 : index
    %c0_4 = arith.constant 0 : index
    %4 = vector.load %arg3[%c0_3, %c0_4] : memref<64x128xf32, #tpu.memory_space<vmem>>, vector<64x128xf32>
    %5 = vector.broadcast %0 : vector<1x128xf32> to vector<64x128xf32>
    %6 = arith.mulf %5, %4 : vector<64x128xf32>
    %c0_5 = arith.constant 0 : index
    %c0_6 = arith.constant 0 : index
    %7 = vector.load %arg4[%c0_5, %c0_6] : memref<64x128xf32, #tpu.memory_space<vmem>>, vector<64x128xf32>
    %8 = vector.broadcast %0 : vector<1x128xf32> to vector<64x128xf32>
    %9 = arith.mulf %8, %7 : vector<64x128xf32>
    %10 = vector.shape_cast %3 : vector<1x128xi1> to vector<1x128xi1>
    %11 = vector.broadcast %10 : vector<1x128xi1> to vector<64x128xi1>
    %12 = arith.select %11, %6, %9 : vector<64x128xi1>, vector<64x128xf32>
    %13 = vector.broadcast %1 : vector<1x128xf32> to vector<64x128xf32>
    %14 = arith.addf %12, %13 : vector<64x128xf32>
    %cst_7 = arith.constant 0.000000e+00 : f32
    %15 = vector.broadcast %cst_7 : f32 to vector<64x128xf32>
    %16 = arith.maximumf %14, %15 : vector<64x128xf32>
    %17 = vector.extract_strided_slice %16 {offsets = [0, 0], sizes = [64, 64], strides = [1, 1]} : vector<64x128xf32> to vector<64x64xf32>
    %c0_8 = arith.constant 0 : index
    %c0_9 = arith.constant 0 : index
    %18 = vector.load %arg5[%c0_8, %c0_9] : memref<64x64xf32, #tpu.memory_space<vmem>>, vector<64x64xf32>
    tpu.vector_store %arg5[%c0_8, %c0_9], %17 {strides = array<i32>} : memref<64x64xf32, #tpu.memory_space<vmem>>, vector<64x64xf32>,
    return
  }
  func.func @transform_0(%arg0: i32) -> (i32, i32) {
    %c0_i32 = arith.constant 0 : i32
    %c0_i32_0 = arith.constant 0 : i32
    %c0_i32_1 = arith.constant 0 : i32
    return %c0_i32, %c0_i32_0 : i32, i32
  }
  func.func @transform_1(%arg0: i32) -> (i32, i32) {
    %c0_i32 = arith.constant 0 : i32
    %c0_i32_0 = arith.constant 0 : i32
    %c0_i32_1 = arith.constant 0 : i32
    return %c0_i32, %c0_i32_0 : i32, i32
  }
  func.func @transform_2(%arg0: i32) -> (i32, i32) {
    %c0_i32 = arith.constant 0 : i32
    %c0_i32_0 = arith.constant 0 : i32
    return %arg0, %c0_i32 : i32, i32
  }
  func.func @transform_3(%arg0: i32) -> (i32, i32) {
    %c0_i32 = arith.constant 0 : i32
    %c0_i32_0 = arith.constant 0 : i32
    return %arg0, %c0_i32 : i32, i32
  }
  func.func @transform_4(%arg0: i32) -> (i32, i32) {
    %c0_i32 = arith.constant 0 : i32
    %c0_i32_0 = arith.constant 0 : i32
    return %arg0, %c0_i32 : i32, i32
  }
}

module attributes {stable_mosaic.version = 11 : i64} {
  func.func @_stats_kernel(%arg0: i32, %arg1: memref<2048x10xbf16, #tpu.memory_space<vmem>>, %arg2: memref<10x128xbf16, #tpu.memory_space<vmem>>, %arg3: memref<64x128xf32, #tpu.memory_space<vmem>>, %arg4: memref<64x128xf32, #tpu.memory_space<vmem>>, %arg5: memref<8x128xf32, #tpu.memory_space<vmem>>, %arg6: memref<8x128xf32, #tpu.memory_space<vmem>>) attributes {dimension_semantics = [#tpu.dimension_semantics<parallel>], iteration_bounds = array<i64: 4>, scalar_prefetch = 0 : i64, scratch_operands = 0 : i64, tpu.core_type = #tpu.core_type<tc>, window_params = [{transform_indices = @transform_0, window_bounds = array<i64: 2048, 10>}, {pipeline_mode = #tpu.pipeline_mode<synchronous>, transform_indices = @transform_1, window_bounds = array<i64: 10, 128>}, {transform_indices = @transform_2, window_bounds = array<i64: 64, 128>}, {transform_indices = @transform_3, window_bounds = array<i64: 64, 128>}, {transform_indices = @transform_4, window_bounds = array<i64: 8, 128>}, {transform_indices = @transform_5, window_bounds = array<i64: 8, 128>}]} {
    %c0 = arith.constant 0 : index
    %c0_0 = arith.constant 0 : index
    %0 = vector.load %arg1[%c0, %c0_0] : memref<2048x10xbf16, #tpu.memory_space<vmem>>, vector<2048x10xbf16>
    %c0_1 = arith.constant 0 : index
    %c0_2 = arith.constant 0 : index
    %1 = vector.load %arg2[%c0_1, %c0_2] : memref<10x128xbf16, #tpu.memory_space<vmem>>, vector<10x128xbf16>
    %cst = arith.constant dense<0.000000e+00> : vector<2048x128xf32>
    %2 = tpu.matmul %0, %1, %cst {dimension_numbers = #tpu.dot_dimension_numbers<[1], [0], [0], [1], [0, 0, 1, 1], [], []>} : vector<2048x10xbf16>, vector<10x128xbf16>, vector<2048x128xf32> -> vector<2048x128xf32>
    %cst_3 = arith.constant dense<0.000000e+00> : vector<128xf32>
    %3 = vector.multi_reduction <add>, %2, %cst_3 [0] : vector<2048x128xf32> to vector<128xf32>
    %4 = vector.shape_cast %3 : vector<128xf32> to vector<1x128xf32>
    %5 = arith.mulf %2, %2 : vector<2048x128xf32>
    %cst_4 = arith.constant dense<0.000000e+00> : vector<128xf32>
    %6 = vector.multi_reduction <add>, %5, %cst_4 [0] : vector<2048x128xf32> to vector<128xf32>
    %7 = vector.shape_cast %6 : vector<128xf32> to vector<1x128xf32>
    %8 = tpu.iota {dimensions = array<i32: 0>} : vector<8x128xi32>
    %c0_i32 = arith.constant 0 : i32
    %9 = vector.broadcast %c0_i32 : i32 to vector<8x128xi32>
    %10 = arith.cmpi eq, %8, %9 : vector<8x128xi32>
    %cst_5 = arith.constant 0.000000e+00 : f32
    %11 = vector.shape_cast %4 : vector<1x128xf32> to vector<1x128xf32>
    %12 = vector.broadcast %11 : vector<1x128xf32> to vector<8x128xf32>
    %13 = vector.broadcast %cst_5 : f32 to vector<8x128xf32>
    %14 = arith.select %10, %12, %13 : vector<8x128xi1>, vector<8x128xf32>
    %c0_6 = arith.constant 0 : index
    %c0_7 = arith.constant 0 : index
    %15 = vector.load %arg5[%c0_6, %c0_7] : memref<8x128xf32, #tpu.memory_space<vmem>>, vector<8x128xf32>
    tpu.vector_store %arg5[%c0_6, %c0_7], %14 {strides = array<i32>} : memref<8x128xf32, #tpu.memory_space<vmem>>, vector<8x128xf32>,
    %c0_i32_8 = arith.constant 0 : i32
    %16 = vector.broadcast %c0_i32_8 : i32 to vector<8x128xi32>
    %17 = arith.cmpi eq, %8, %16 : vector<8x128xi32>
    %cst_9 = arith.constant 0.000000e+00 : f32
    %18 = vector.shape_cast %7 : vector<1x128xf32> to vector<1x128xf32>
    %19 = vector.broadcast %18 : vector<1x128xf32> to vector<8x128xf32>
    %20 = vector.broadcast %cst_9 : f32 to vector<8x128xf32>
    %21 = arith.select %17, %19, %20 : vector<8x128xi1>, vector<8x128xf32>
    %c0_10 = arith.constant 0 : index
    %c0_11 = arith.constant 0 : index
    %22 = vector.load %arg6[%c0_10, %c0_11] : memref<8x128xf32, #tpu.memory_space<vmem>>, vector<8x128xf32>
    tpu.vector_store %arg6[%c0_10, %c0_11], %21 {strides = array<i32>} : memref<8x128xf32, #tpu.memory_space<vmem>>, vector<8x128xf32>,
    %23 = vector.shape_cast %2 : vector<2048x128xf32> to vector<64x32x128xf32>
    %cst_12 = arith.constant dense<0xFF800000> : vector<64x128xf32>
    %24 = vector.multi_reduction <maximumf>, %23, %cst_12 [1] : vector<64x32x128xf32> to vector<64x128xf32>
    %c0_13 = arith.constant 0 : index
    %c0_14 = arith.constant 0 : index
    %25 = vector.load %arg3[%c0_13, %c0_14] : memref<64x128xf32, #tpu.memory_space<vmem>>, vector<64x128xf32>
    tpu.vector_store %arg3[%c0_13, %c0_14], %24 {strides = array<i32>} : memref<64x128xf32, #tpu.memory_space<vmem>>, vector<64x128xf32>,
    %cst_15 = arith.constant dense<0x7F800000> : vector<64x128xf32>
    %26 = vector.multi_reduction <minimumf>, %23, %cst_15 [1] : vector<64x32x128xf32> to vector<64x128xf32>
    %c0_16 = arith.constant 0 : index
    %c0_17 = arith.constant 0 : index
    %27 = vector.load %arg4[%c0_16, %c0_17] : memref<64x128xf32, #tpu.memory_space<vmem>>, vector<64x128xf32>
    tpu.vector_store %arg4[%c0_16, %c0_17], %26 {strides = array<i32>} : memref<64x128xf32, #tpu.memory_space<vmem>>, vector<64x128xf32>,
    return
  }
  func.func @transform_0(%arg0: i32) -> (i32, i32) {
    %c0_i32 = arith.constant 0 : i32
    %c0_i32_0 = arith.constant 0 : i32
    return %arg0, %c0_i32 : i32, i32
  }
  func.func @transform_1(%arg0: i32) -> (i32, i32) {
    %c0_i32 = arith.constant 0 : i32
    %c0_i32_0 = arith.constant 0 : i32
    %c0_i32_1 = arith.constant 0 : i32
    return %c0_i32, %c0_i32_0 : i32, i32
  }
  func.func @transform_2(%arg0: i32) -> (i32, i32) {
    %c0_i32 = arith.constant 0 : i32
    %c0_i32_0 = arith.constant 0 : i32
    return %arg0, %c0_i32 : i32, i32
  }
  func.func @transform_3(%arg0: i32) -> (i32, i32) {
    %c0_i32 = arith.constant 0 : i32
    %c0_i32_0 = arith.constant 0 : i32
    return %arg0, %c0_i32 : i32, i32
  }
  func.func @transform_4(%arg0: i32) -> (i32, i32) {
    %c0_i32 = arith.constant 0 : i32
    %c0_i32_0 = arith.constant 0 : i32
    return %arg0, %c0_i32 : i32, i32
  }
  func.func @transform_5(%arg0: i32) -> (i32, i32) {
    %c0_i32 = arith.constant 0 : i32
    %c0_i32_0 = arith.constant 0 : i32
    return %arg0, %c0_i32 : i32, i32
  }
}

</mosaic_0001>

<bundles_post_ra>
// kernel: pillar_vfe.3
= control target key start
LH: loop header
LB: loop body
LE: loop exit
PB: predicated region body
PF: predicated region fallthrough
CT: control target
= control target key end

     0   :  { %s434_s15 = smov 0   ;;  %s532_s0 = inlined_call_operand.vmem [shape: f32[1,128], index: 0, kind: input, shape index: {}]   ;;  %s533_s1 = inlined_call_operand.vmem [shape: f32[1,128], index: 1, kind: input, shape index: {}]   ;;  %s534_s2 = inlined_call_operand.vmem [shape: f32[256,128], index: 2, kind: input, shape index: {}]   ;;  %s535_s3 = inlined_call_operand.vmem [shape: f32[256,128], index: 3, kind: input, shape index: {}]   ;;  %s536_s4 = inlined_call_operand.vmem [shape: f32[256,64], index: 4, kind: output, shape index: {}]  }
   0x1 LB: > { %s377_s16 = sadd.s32 4294967295, %s406_s15   ;;  %p381_p0 = scmp.ge.s32.totalorder %s406_s15, 1  ;;  %s406_s15 = sphi %s434_s15, %s14_s15  }
   0x2   : > { %p174_p1 = scmp.lt.s32.totalorder %s406_s15, 5 }
   0x4   : > { %p175_p2 = pnand %p381_p0, %p174_p1 }
   0x5   : > { %s382_s17 = sshll.u32 (!%p175_p2), %s377_s16, 3 }
   0x6   : > { %178 = sbr.rel (%p175_p2) target bundleno = 35 (0x23), region = 36  ;;  %p206_p3 = scmp.lt.s32.totalorder (!%p175_p2), %s382_s17, 31 }
   0xb   : > { %v223_v0 = vld [vmem:[%s532_s0] sm:$0x1]  ;;  %v235_v1 = vlaneseq  ;;  %s538_s17 = smov (!%p206_p3, %s382_s17), 31  ;;  %v408_v3 = vmov 0   ;;  %vm300_vm2 = vcmask 523264  }
   0xc   : > { %vm225_vm0 = vcmp.gt.f32.partialorder %v223_v0, 0.0  ;;  %s445_s20 = sshll.u32 %s538_s17, 3  ;;  %v462_v6 = vld [vmem:[%s533_s1] ss:$0 sm:$0xff] }
   0xd   : > { %v236_v2 = vshrl.u32 %v235_v1, 7  ;;  %v264_v4 = vsel %vm225_vm0, 1, %v408_v3  ;;  %s451_s23 = scalar_lea.vmem %s534_s2, %s445_s20  ;;  %s457_s26 = scalar_lea.vmem %s535_s3, %s445_s20 }
   0xe   : > { %v226_v9 = vld [vmem:[%s451_s23] sm:$0xff]  ;;  %v227_v11 = vld [vmem:[%s451_s23 + $0x8] sm:$0xff]  ;;  %v228_v16 = vld [vmem:[%s451_s23 + $0x10] sm:$0xff]  ;;  %s491_s5 = scalar_lea.vmem %s536_s4, %s445_s20 }
   0xf   : > { %v237_v5 = vsub.s32 0, %v236_v2  ;;  %v248_v10 = vld [vmem:[%s457_s26] sm:$0xff]  ;;  %v249_v15 = vld [vmem:[%s457_s26 + $0x8] sm:$0xff]  ;;  %v250_v17 = vld [vmem:[%s457_s26 + $0x10] sm:$0xff] }
  0x10   : > { %v229_v21 = vld [vmem:[%s451_s23 + $0x18] sm:$0xff]  ;;  %v230_v23 = vld [vmem:[%s451_s23 + $0x20] sm:$0xff]  ;;  %v231_v29 = vld [vmem:[%s451_s23 + $0x28] sm:$0xff] }
  0x11   : > { %v238_v7 = vrot.slane %v223_v0, %v237_v5  ;;  %v464_v8 = vrot.slane %v264_v4, %v237_v5  ;;  %v251_v22 = vld [vmem:[%s457_s26 + $0x18] sm:$0xff]  ;;  %v252_v28 = vld [vmem:[%s457_s26 + $0x20] sm:$0xff]  ;;  %v253_v30 = vld [vmem:[%s457_s26 + $0x28] sm:$0xff] }
  0x12   : > { %v232_v35 = vld [vmem:[%s451_s23 + $0x30] sm:$0xff]  ;;  %v233_v41 = vld [vmem:[%s451_s23 + $0x38] sm:$0xff] }
  0x13   : > { %v240_v12 = vmul.f32 %v238_v7, %v226_v9  ;;  %v256_v13 = vmul.f32 %v248_v10, %v238_v7  ;;  %vm269_vm1 = vcmp.eq.s32.totalorder %v464_v8, 1  ;;  %v241_v14 = vmul.f32 %v238_v7, %v227_v11  ;;  %v254_v40 = vld [vmem:[%s457_s26 + $0x30] sm:$0xff]  ;;  %v255_v46 = vld [vmem:[%s457_s26 + $0x38] sm:$0xff] }
  0x14   : > { %v257_v18 = vmul.f32 %v249_v15, %v238_v7  ;;  %v242_v19 = vmul.f32 %v238_v7, %v228_v16  ;;  %v258_v20 = vmul.f32 %v250_v17, %v238_v7  ;;  %v243_v25 = vmul.f32 %v238_v7, %v229_v21 }
  0x15   : > { %v270_v24 = vsel %vm269_vm1, %v240_v12, %v256_v13  ;;  %v259_v26 = vmul.f32 %v251_v22, %v238_v7  ;;  %v244_v27 = vmul.f32 %v238_v7, %v230_v23  ;;  %v260_v34 = vmul.f32 %v252_v28, %v238_v7 }
  0x16   : > { %v284_v31 = vadd.f32 %v462_v6, %v270_v24  ;;  %v271_v32 = vsel %vm269_vm1, %v241_v14, %v257_v18  ;;  %v272_v33 = vsel %vm269_vm1, %v242_v19, %v258_v20  ;;  %v245_v39 = vmul.f32 %v238_v7, %v231_v29 }
  0x17   : > { %v285_v36 = vadd.f32 %v462_v6, %v271_v32  ;;  %v286_v37 = vadd.f32 %v462_v6, %v272_v33  ;;  %v273_v38 = vsel %vm269_vm1, %v243_v25, %v259_v26  ;;  %v274_v44 = vsel %vm269_vm1, %v244_v27, %v260_v34 }
  0x18   : > { %v292_v42 = vmax.f32 %v284_v31, 0.0  ;;  %v287_v43 = vadd.f32 %v462_v6, %v273_v38  ;;  %v261_v45 = vmul.f32 %v253_v30, %v238_v7  ;;  %v288_v49 = vadd.f32 %v462_v6, %v274_v44 }
  0x19   : > { %v293_v47 = vmax.f32 %v285_v36, 0.0  ;;  %v294_v48 = vmax.f32 %v286_v37, 0.0  ;;  %v246_v50 = vmul.f32 %v238_v7, %v232_v35  ;;  %v262_v53 = vmul.f32 %v254_v40, %v238_v7 }
  0x1a   : > { %301 = vst.msk [vmem:[%s491_s5] sm:$0xff] %vm300_vm2, %v292_v42  ;;  %v295_v51 = vmax.f32 %v287_v43, 0.0  ;;  %v275_v52 = vsel %vm269_vm1, %v245_v39, %v261_v45  ;;  %v247_v54 = vmul.f32 %v238_v7, %v233_v41  ;;  %v296_v55 = vmax.f32 %v288_v49, 0.0 }
  0x1b   : > { %302 = vst.msk [vmem:[%s491_s5 + $0x8] sm:$0xff] %vm300_vm2, %v293_v47  ;;  %303 = vst.msk [vmem:[%s491_s5 + $0x10] sm:$0xff] %vm300_vm2, %v294_v48  ;;  %v289_v56 = vadd.f32 %v462_v6, %v275_v52  ;;  %v263_v57 = vmul.f32 %v255_v46, %v238_v7  ;;  %v276_v58 = vsel %vm269_vm1, %v246_v50, %v262_v53 }
  0x1c   : > { %304 = vst.msk [vmem:[%s491_s5 + $0x18] sm:$0xff] %vm300_vm2, %v295_v51  ;;  %305 = vst.msk [vmem:[%s491_s5 + $0x20] sm:$0xff] %vm300_vm2, %v296_v55  ;;  %v290_v60 = vadd.f32 %v462_v6, %v276_v58 }
  0x1d   : > { %v297_v59 = vmax.f32 %v289_v56, 0.0  ;;  %v277_v61 = vsel %vm269_vm1, %v247_v54, %v263_v57 }
  0x1e   : > { %v291_v62 = vadd.f32 %v462_v6, %v277_v61  ;;  %v298_v63 = vmax.f32 %v290_v60, 0.0 }
  0x1f   : > { %306 = vst.msk [vmem:[%s491_s5 + $0x28] sm:$0xff] %vm300_vm2, %v297_v59 }
  0x20   : > { %v299_v0 = vmax.f32 %v291_v62, 0.0  ;;  %307 = vst.msk [vmem:[%s491_s5 + $0x30] sm:$0xff] %vm300_vm2, %v298_v63 }
  0x22   : > { %308 = vst.msk [vmem:[%s491_s5 + $0x38] sm:$0xff] %vm300_vm2, %v299_v0 }
  0x23 PF: > { %s14_s15 = sadd.s32 1, %s406_s15  }
  0x24   : > { %p11_p4 = scmp.ge.s32.totalorder %s14_s15, 6  }
  0x26   :  { %13 = sbr.rel (!%p11_p4) target bundleno = 1 (0x1), region = 69 }

// kernel: pillar_vfe.2
= control target key start
LH: loop header
LB: loop body
LE: loop exit
PB: predicated region body
PF: predicated region fallthrough
CT: control target
= control target key end

     0   :  { %s5818_s18 = smov 0   ;;  %s7630_s0 = inlined_call_operand.vmem [shape: bf16[8192,10], index: 0, kind: input, shape index: {}]   ;;  %s7631_s1 = inlined_call_operand.vmem [shape: bf16[10,128], index: 1, kind: input, shape index: {}]   ;;  %s7632_s2 = inlined_call_operand.vmem [shape: f32[256,128], index: 2, kind: output, shape index: {0}]   ;;  %s7633_s3 = inlined_call_operand.vmem [shape: f32[256,128], index: 3, kind: output, shape index: {1}]   ;;  %s7634_s4 = inlined_call_operand.vmem [shape: f32[32,128], index: 4, kind: output, shape index: {2}]   ;;  %s7635_s5 = inlined_call_operand.vmem [shape: f32[32,128], index: 5, kind: output, shape index: {3}]  }
   0x1 LB: > { %s5824_s19 = sadd.s32 4294967295, %s5786_s18   ;;  %p4984_p0 = scmp.ge.s32.totalorder %s5786_s18, 1  ;;  %s5786_s18 = sphi %s5818_s18, %s16_s18  }
   0x2   : > { %p195_p1 = scmp.lt.s32.totalorder %s5786_s18, 5 }
   0x4   : > { %p196_p2 = pnand %p4984_p0, %p195_p1 }
   0x6   : > { %199 = sbr.rel (%p196_p2) target bundleno = 783 (0x30f), region = 28 }
   0xb   : > { %v5651_v0 = vld [vmem:[%s7631_s1] sm:$0x1f]   ;;  %vm1551_vm0 = vcmask 1044480   ;;  %s4985_s22 = sshll.u32 %s5824_s19, 8  ;;  %vm1166_vm1 = vcmask 80896   ;;  %vm4037_vm2 = vcmask 1041409  }
   0xc   : > { %5641 = vmatprep.subr.msk.bf16.mxu0 %vm1551_vm0, %v5651_v0  ;;  %v1553_v1 = vsel %vm1551_vm0, %v5651_v0, 0  ;;  %p237_p3 = scmp.lt.s32.totalorder %s4985_s22, 1023  ;;  %5642 = vmatprep.subr.msk.bf16.mxu1 %vm1551_vm0, %v5651_v0  ;;  %vm4039_vm3 = vcmask 1042434   ;;  %vm4041_vm4 = vcmask 1043459   ;;  %vm4043_vm5 = vcmask 1044484   ;;  %s4987_s27 = sshll.u32 %s5824_s19, 3 }
   0xd   : > { %5382 = vmatpush3.bf16.msra.mxu0 %v1553_v1  ;;  %5640 = vmatpush3.bf16.msra.mxu1 %v1553_v1  ;;  %vm4045_vm6 = vcmask 1045509   ;;  %vm4047_vm7 = vcmask 1046534   ;;  %p6097_p4 = scmp.lt.s32.totalorder %s4987_s27, 31  ;;  %vm4049_vm8 = vcmask 1047559   ;;  %p254_p5 = scmp.lt.s32.totalorder %s5824_s19, 3 }
   0xe   : > { %s8059_s22 = smov (!%p237_p3, %s4985_s22), 1023 }
   0xf   : > { %s4986_s23 = sshll.u32 %s8059_s22, 2  ;;  %s8061_s27 = smov (!%p6097_p4, %s4987_s27), 31 }
  0x10   : > { %s5835_s26 = scalar_lea.vmem %s7630_s0, %s4986_s23  ;;  %s4988_s29 = sshll.u32 %s8061_s27, 3 }
  0x11   : > { %v5652_v2 = vld [vmem:[%s5835_s26] sm:$0xff]   ;;  %v5653_v3 = vld [vmem:[%s5835_s26 + $0x8] sm:$0xff]   ;;  %v5654_v4 = vld [vmem:[%s5835_s26 + $0x10] sm:$0xff]   ;;  %s6131_s7 = scalar_lea.vmem %s7632_s2, %s4988_s29  ;;  %s6138_s10 = scalar_lea.vmem %s7633_s3, %s4988_s29 }
  0x12   : > { %5383 = vmatprep.mubr.msk.bf16.mxu0 %vm1166_vm1, %v5652_v2  ;;  %v5655_v5 = vld [vmem:[%s5835_s26 + $0x18] sm:$0xff]   ;;  %v5656_v6 = vld [vmem:[%s5835_s26 + $0x20] sm:$0xff]   ;;  %v5657_v7 = vld [vmem:[%s5835_s26 + $0x28] sm:$0xff]   ;;  %s8063_s19 = smov (!%p254_p5, %s5824_s19), 3 }
  0x13   : > { %5384 = vmatmul.mubr.msk.bf16.vlgmr.msra.gmra.mxu0 %vm1166_vm1, %v5653_v3  ;;  %v5658_v8 = vld [vmem:[%s5835_s26 + $0x30] sm:$0xff]   ;;  %v5659_v9 = vld [vmem:[%s5835_s26 + $0x38] sm:$0xff]   ;;  %v5660_v10 = vld [vmem:[%s5835_s26 + $0x40] sm:$0xff]   ;;  %s4991_s11 = sshll.u32 %s8063_s19, 3 }
  0x14   : > { %5387 = vmatprep.mubr.msk.bf16.mxu0 %vm1166_vm1, %v5654_v4  ;;  %v5661_v11 = vld [vmem:[%s5835_s26 + $0x48] sm:$0xff]   ;;  %v5662_v12 = vld [vmem:[%s5835_s26 + $0x50] sm:$0xff]   ;;  %v5663_v13 = vld [vmem:[%s5835_s26 + $0x58] sm:$0xff]   ;;  %s257_s14 = scalar_lea.vmem %s7634_s4, %s4991_s11  ;;  %s261_s17 = scalar_lea.vmem %s7635_s5, %s4991_s11 }
  0x15   : > { %v5664_v14 = vld [vmem:[%s5835_s26 + $0x60] sm:$0xff]   ;;  %v5665_v15 = vld [vmem:[%s5835_s26 + $0x68] sm:$0xff]   ;;  %v5666_v16 = vld [vmem:[%s5835_s26 + $0x70] sm:$0xff]  }
  0x16   : > { %v5667_v17 = vld [vmem:[%s5835_s26 + $0x78] sm:$0xff]   ;;  %v5668_v18 = vld [vmem:[%s5835_s26 + $0x80] sm:$0xff]   ;;  %v5701_v20 = vld [vmem:[%s5835_s26 + $0x208] sm:$0xff]  }
  0x17   : > { %v5700_v19 = vld [vmem:[%s5835_s26 + $0x200] sm:$0xff]   ;;  %v5669_v21 = vld [vmem:[%s5835_s26 + $0x88] sm:$0xff]   ;;  %v5670_v22 = vld [vmem:[%s5835_s26 + $0x90] sm:$0xff]  }
  0x18   : > { %5511 = vmatprep.mubr.msk.bf16.mxu1 %vm1166_vm1, %v5700_v19  ;;  %v5671_v23 = vld [vmem:[%s5835_s26 + $0x98] sm:$0xff]   ;;  %v5704_v24 = vld [vmem:[%s5835_s26 + $0x210] sm:$0xff]   ;;  %v5672_v26 = vld [vmem:[%s5835_s26 + $0xa0] sm:$0xff]  }
  0x19   : > { %5512 = vmatmul.mubr.msk.bf16.vlgmr.msra.gmra.mxu1 %vm1166_vm1, %v5701_v20  ;;  %v5705_v25 = vld [vmem:[%s5835_s26 + $0x218] sm:$0xff]   ;;  %v5673_v27 = vld [vmem:[%s5835_s26 + $0xa8] sm:$0xff]   ;;  %v5674_v28 = vld [vmem:[%s5835_s26 + $0xb0] sm:$0xff]  }
  0x1a   : > { %5515 = vmatprep.mubr.msk.bf16.mxu1 %vm1166_vm1, %v5704_v24  ;;  %v5708_v29 = vld [vmem:[%s5835_s26 + $0x220] sm:$0xff]   ;;  %v5709_v30 = vld [vmem:[%s5835_s26 + $0x228] sm:$0xff]   ;;  %v5675_v31 = vld [vmem:[%s5835_s26 + $0xb8] sm:$0xff]  }
  0x1b   : > { %5388 = vmatmul.mubr.msk.bf16.gmra.mxu0 %vm1166_vm1, %v5655_v5  ;;  %v5676_v32 = vld [vmem:[%s5835_s26 + $0xc0] sm:$0xff]   ;;  %v5712_v33 = vld [vmem:[%s5835_s26 + $0x230] sm:$0xff]   ;;  %v5713_v34 = vld [vmem:[%s5835_s26 + $0x238] sm:$0xff]  }
  0x1c   : > { %5391 = vmatprep.mubr.msk.bf16.mxu0 %vm1166_vm1, %v5656_v6  ;;  %v5677_v35 = vld [vmem:[%s5835_s26 + $0xc8] sm:$0xff]   ;;  %v5678_v36 = vld [vmem:[%s5835_s26 + $0xd0] sm:$0xff]   ;;  %v5716_v37 = vld [vmem:[%s5835_s26 + $0x240] sm:$0xff]  }
  0x1d   : > { %v5717_v38 = vld [vmem:[%s5835_s26 + $0x248] sm:$0xff]   ;;  %v5679_v39 = vld [vmem:[%s5835_s26 + $0xd8] sm:$0xff]   ;;  %v5680_v40 = vld [vmem:[%s5835_s26 + $0xe0] sm:$0xff]  }
  0x1e   : > { %v5720_v41 = vld [vmem:[%s5835_s26 + $0x250] sm:$0xff]   ;;  %v5721_v42 = vld [vmem:[%s5835_s26 + $0x258] sm:$0xff]   ;;  %v5681_v43 = vld [vmem:[%s5835_s26 + $0xe8] sm:$0xff]  }
  0x1f   : > { %v5682_v44 = vld [vmem:[%s5835_s26 + $0xf0] sm:$0xff]   ;;  %v5724_v45 = vld [vmem:[%s5835_s26 + $0x260] sm:$0xff]   ;;  %v5725_v46 = vld [vmem:[%s5835_s26 + $0x268] sm:$0xff]  }
  0x20   : > { %v5683_v47 = vld [vmem:[%s5835_s26 + $0xf8] sm:$0xff]   ;;  %v5684_v48 = vld [vmem:[%s5835_s26 + $0x100] sm:$0xff]   ;;  %v5728_v49 = vld [vmem:[%s5835_s26 + $0x270] sm:$0xff]  }
  0x21   : > { %5516 = vmatmul.mubr.msk.bf16.gmra.mxu1 %vm1166_vm1, %v5705_v25  ;;  %v5729_v50 = vld [vmem:[%s5835_s26 + $0x278] sm:$0xff]   ;;  %v5685_v51 = vld [vmem:[%s5835_s26 + $0x108] sm:$0xff]   ;;  %v5686_v52 = vld [vmem:[%s5835_s26 + $0x110] sm:$0xff]  }
  0x22   : > { %5519 = vmatprep.mubr.msk.bf16.mxu1 %vm1166_vm1, %v5708_v29  ;;  %v5732_v53 = vld [vmem:[%s5835_s26 + $0x280] sm:$0xff]   ;;  %v5733_v54 = vld [vmem:[%s5835_s26 + $0x288] sm:$0xff]   ;;  %v5687_v55 = vld [vmem:[%s5835_s26 + $0x118] sm:$0xff]  }
  0x23   : > { %5392 = vmatmul.mubr.msk.bf16.gmra.mxu0 %vm1166_vm1, %v5657_v7  ;;  %v5688_v56 = vld [vmem:[%s5835_s26 + $0x120] sm:$0xff]   ;;  %v5734_v57 = vld [vmem:[%s5835_s26 + $0x290] sm:$0xff]   ;;  %v5735_v58 = vld [vmem:[%s5835_s26 + $0x298] sm:$0xff]  }
  0x24   : > { %5395 = vmatprep.mubr.msk.bf16.mxu0 %vm1166_vm1, %v5658_v8  ;;  %v5689_v59 = vld [vmem:[%s5835_s26 + $0x128] sm:$0xff]   ;;  %v5690_v60 = vld [vmem:[%s5835_s26 + $0x130] sm:$0xff]   ;;  %v5736_v61 = vld [vmem:[%s5835_s26 + $0x2a0] sm:$0xff]  }
  0x25   : > { %v5737_v62 = vld [vmem:[%s5835_s26 + $0x2a8] sm:$0xff]   ;;  %v5691_v63 = vld [vmem:[%s5835_s26 + $0x138] sm:$0xff]   ;;  %v5692_v0 = vld [vmem:[%s5835_s26 + $0x140] sm:$0xff]  }
  0x26   : > { %v5738_v1 = vld [vmem:[%s5835_s26 + $0x2b0] sm:$0xff]   ;;  %v5739_v2 = vld [vmem:[%s5835_s26 + $0x2b8] sm:$0xff]   ;;  %v5693_v3 = vld [vmem:[%s5835_s26 + $0x148] sm:$0xff]  }
  0x27   : > { %v5694_v4 = vld [vmem:[%s5835_s26 + $0x150] sm:$0xff]   ;;  %v5740_v5 = vld [vmem:[%s5835_s26 + $0x2c0] sm:$0xff]   ;;  %v5741_v6 = vld [vmem:[%s5835_s26 + $0x2c8] sm:$0xff]  }
  0x28   : > { %v5695_v7 = vld [vmem:[%s5835_s26 + $0x158] sm:$0xff]   ;;  %v5696_v8 = vld [vmem:[%s5835_s26 + $0x160] sm:$0xff]   ;;  %v5703_v19 = vld [vmem:[%s5835_s26 + $0x188] sm:$0xff]  }
  0x29   : > { %5520 = vmatmul.mubr.msk.bf16.gmra.mxu1 %vm1166_vm1, %v5709_v30  ;;  %v5706_v20 = vld [vmem:[%s5835_s26 + $0x190] sm:$0xff]  }
  0x2a   : > { %5523 = vmatprep.mubr.msk.bf16.mxu1 %vm1166_vm1, %v5712_v33  ;;  %v5750_v30 = vld [vmem:[%s5835_s26 + $0x310] sm:$0xff]  }
  0x2b   : > { %5396 = vmatmul.mubr.msk.bf16.gmra.mxu0 %vm1166_vm1, %v5659_v9  ;;  %v5742_v9 = vld [vmem:[%s5835_s26 + $0x2d0] sm:$0xff]  }
  0x2c   : > { %5399 = vmatprep.mubr.msk.bf16.mxu0 %vm1166_vm1, %v5660_v10  ;;  %v5743_v10 = vld [vmem:[%s5835_s26 + $0x2d8] sm:$0xff]  }
  0x31   : > { %5524 = vmatmul.mubr.msk.bf16.gmra.mxu1 %vm1166_vm1, %v5713_v34 }
  0x32   : > { %5527 = vmatprep.mubr.msk.bf16.mxu1 %vm1166_vm1, %v5716_v37 }
  0x33   : > { %5400 = vmatmul.mubr.msk.bf16.gmra.mxu0 %vm1166_vm1, %v5661_v11  ;;  %v5697_v11 = vld [vmem:[%s5835_s26 + $0x168] sm:$0xff]  }
  0x34   : > { %5403 = vmatprep.mubr.msk.bf16.mxu0 %vm1166_vm1, %v5662_v12  ;;  %v5698_v12 = vld [vmem:[%s5835_s26 + $0x170] sm:$0xff]  }
  0x39   : > { %5528 = vmatmul.mubr.msk.bf16.gmra.mxu1 %vm1166_vm1, %v5717_v38 }
  0x3a   : > { %5531 = vmatprep.mubr.msk.bf16.mxu1 %vm1166_vm1, %v5720_v41 }
  0x3b   : > { %5404 = vmatmul.mubr.msk.bf16.gmra.mxu0 %vm1166_vm1, %v5663_v13  ;;  %v5744_v13 = vld [vmem:[%s5835_s26 + $0x2e0] sm:$0xff]  }
  0x3c   : > { %5407 = vmatprep.mubr.msk.bf16.mxu0 %vm1166_vm1, %v5664_v14  ;;  %v5745_v14 = vld [vmem:[%s5835_s26 + $0x2e8] sm:$0xff]  }
  0x41   : > { %5532 = vmatmul.mubr.msk.bf16.gmra.mxu1 %vm1166_vm1, %v5721_v42 }
  0x42   : > { %5535 = vmatprep.mubr.msk.bf16.mxu1 %vm1166_vm1, %v5724_v45 }
  0x43   : > { %5408 = vmatmul.mubr.msk.bf16.gmra.mxu0 %vm1166_vm1, %v5665_v15  ;;  %v5699_v15 = vld [vmem:[%s5835_s26 + $0x178] sm:$0xff]  }
  0x44   : > { %5411 = vmatprep.mubr.msk.bf16.mxu0 %vm1166_vm1, %v5666_v16  ;;  %v5702_v16 = vld [vmem:[%s5835_s26 + $0x180] sm:$0xff]  }
  0x49   : > { %5536 = vmatmul.mubr.msk.bf16.gmra.mxu1 %vm1166_vm1, %v5725_v46 }
  0x4a   : > { %5539 = vmatprep.mubr.msk.bf16.mxu1 %vm1166_vm1, %v5728_v49 }
  0x4b   : > { %5412 = vmatmul.mubr.msk.bf16.gmra.mxu0 %vm1166_vm1, %v5667_v17  ;;  %v5746_v17 = vld [vmem:[%s5835_s26 + $0x2f0] sm:$0xff]  }
  0x4c   : > { %5415 = vmatprep.mubr.msk.bf16.mxu0 %vm1166_vm1, %v5668_v18  ;;  %v5747_v18 = vld [vmem:[%s5835_s26 + $0x2f8] sm:$0xff]  }
  0x51   : > { %5540 = vmatmul.mubr.msk.bf16.gmra.mxu1 %vm1166_vm1, %v5729_v50  ;;  %v5711_v50 = vld [vmem:[%s5835_s26 + $0x1a8] sm:$0xff]  }
  0x52   : > { %5543 = vmatprep.mubr.msk.bf16.mxu1 %vm1166_vm1, %v5732_v53 }
  0x53   : > { %5416 = vmatmul.mubr.msk.bf16.gmra.mxu0 %vm1166_vm1, %v5669_v21  ;;  %v5748_v21 = vld [vmem:[%s5835_s26 + $0x300] sm:$0xff]  }
  0x54   : > { %5419 = vmatprep.mubr.msk.bf16.mxu0 %vm1166_vm1, %v5670_v22  ;;  %v5749_v22 = vld [vmem:[%s5835_s26 + $0x308] sm:$0xff]  }
  0x59   : > { %5544 = vmatmul.mubr.msk.bf16.gmra.mxu1 %vm1166_vm1, %v5733_v54 }
  0x5a   : > { %5547 = vmatprep.mubr.msk.bf16.mxu1 %vm1166_vm1, %v5734_v57  ;;  %v5752_v57 = vld [vmem:[%s5835_s26 + $0x320] sm:$0xff]  }
  0x5b   : > { %5420 = vmatmul.mubr.msk.bf16.gmra.mxu0 %vm1166_vm1, %v5671_v23 }
  0x5c   : > { %5423 = vmatprep.mubr.msk.bf16.mxu0 %vm1166_vm1, %v5672_v26  ;;  %v5707_v26 = vld [vmem:[%s5835_s26 + $0x198] sm:$0xff]  }
  0x61   : > { %5548 = vmatmul.mubr.msk.bf16.gmra.mxu1 %vm1166_vm1, %v5735_v58 }
  0x62   : > { %5551 = vmatprep.mubr.msk.bf16.mxu1 %vm1166_vm1, %v5736_v61 }
  0x63   : > { %5424 = vmatmul.mubr.msk.bf16.gmra.mxu0 %vm1166_vm1, %v5673_v27  ;;  %v5710_v27 = vld [vmem:[%s5835_s26 + $0x1a0] sm:$0xff]  }
  0x64   : > { %5427 = vmatprep.mubr.msk.bf16.mxu0 %vm1166_vm1, %v5674_v28 }
  0x69   : > { %5552 = vmatmul.mubr.msk.bf16.gmra.mxu1 %vm1166_vm1, %v5737_v62  ;;  %v5753_v62 = vld [vmem:[%s5835_s26 + $0x328] sm:$0xff]  }
  0x6a   : > { %5555 = vmatprep.mubr.msk.bf16.mxu1 %vm1166_vm1, %v5738_v1 }
  0x6b   : > { %5428 = vmatmul.mubr.msk.bf16.gmra.mxu0 %vm1166_vm1, %v5675_v31 }
  0x6c   : > { %5431 = vmatprep.mubr.msk.bf16.mxu0 %vm1166_vm1, %v5676_v32 }
  0x71   : > { %5556 = vmatmul.mubr.msk.bf16.gmra.mxu1 %vm1166_vm1, %v5739_v2 }
  0x72   : > { %5559 = vmatprep.mubr.msk.bf16.mxu1 %vm1166_vm1, %v5740_v5 }
  0x73   : > { %5432 = vmatmul.mubr.msk.bf16.gmra.mxu0 %vm1166_vm1, %v5677_v35  ;;  %v5751_v35 = vld [vmem:[%s5835_s26 + $0x318] sm:$0xff]  }
  0x74   : > { %5435 = vmatprep.mubr.msk.bf16.mxu0 %vm1166_vm1, %v5678_v36 }
  0x79   : > { %5560 = vmatmul.mubr.msk.bf16.gmra.mxu1 %vm1166_vm1, %v5741_v6 }
  0x7a   : > { %5563 = vmatprep.mubr.msk.bf16.mxu1 %vm1166_vm1, %v5742_v9 }
  0x7b   : > { %5436 = vmatmul.mubr.msk.bf16.gmra.mxu0 %vm1166_vm1, %v5679_v39 }
  0x7c   : > { %5439 = vmatprep.mubr.msk.bf16.mxu0 %vm1166_vm1, %v5680_v40 }
  0x81   : > { %5564 = vmatmul.mubr.msk.bf16.gmra.mxu1 %vm1166_vm1, %v5743_v10 }
  0x82   : > { %5567 = vmatprep.mubr.msk.bf16.mxu1 %vm1166_vm1, %v5744_v13 }
  0x83   : > { %5440 = vmatmul.mubr.msk.bf16.gmra.mxu0 %vm1166_vm1, %v5681_v43 }
  0x84   : > { %5443 = vmatprep.mubr.msk.bf16.mxu0 %vm1166_vm1, %v5682_v44 }
  0x89   : > { %5568 = vmatmul.mubr.msk.bf16.gmra.mxu1 %vm1166_vm1, %v5745_v14 }
  0x8a   : > { %5571 = vmatprep.mubr.msk.bf16.mxu1 %vm1166_vm1, %v5746_v17  ;;  %v5715_v17 = vld [vmem:[%s5835_s26 + $0x1b8] sm:$0xff]  }
  0x8b   : > { %5444 = vmatmul.mubr.msk.bf16.gmra.mxu0 %vm1166_vm1, %v5683_v47 }
  0x8c   : > { %5447 = vmatprep.mubr.msk.bf16.mxu0 %vm1166_vm1, %v5684_v48 }
  0x91   : > { %5572 = vmatmul.mubr.msk.bf16.gmra.mxu1 %vm1166_vm1, %v5747_v18 }
  0x92   : > { %5575 = vmatprep.mubr.msk.bf16.mxu1 %vm1166_vm1, %v5748_v21 }
  0x93   : > { %5448 = vmatmul.mubr.msk.bf16.gmra.mxu0 %vm1166_vm1, %v5685_v51 }
  0x94   : > { %5451 = vmatprep.mubr.msk.bf16.mxu0 %vm1166_vm1, %v5686_v52 }
  0x99   : > { %5576 = vmatmul.mubr.msk.bf16.gmra.mxu1 %vm1166_vm1, %v5749_v22 }
  0x9a   : > { %5579 = vmatprep.mubr.msk.bf16.mxu1 %vm1166_vm1, %v5750_v30  ;;  %v5755_v30 = vld [vmem:[%s5835_s26 + $0x338] sm:$0xff]  }
  0x9b   : > { %5452 = vmatmul.mubr.msk.bf16.gmra.mxu0 %vm1166_vm1, %v5687_v55  ;;  %v5714_v55 = vld [vmem:[%s5835_s26 + $0x1b0] sm:$0xff]  }
  0x9c   : > { %5455 = vmatprep.mubr.msk.bf16.mxu0 %vm1166_vm1, %v5688_v56 }
  0xa1   : > { %5580 = vmatmul.mubr.msk.bf16.gmra.mxu1 %vm1166_vm1, %v5751_v35 }
  0xa2   : > { %5583 = vmatprep.mubr.msk.bf16.mxu1 %vm1166_vm1, %v5752_v57 }
  0xa3   : > { %5456 = vmatmul.mubr.msk.bf16.gmra.mxu0 %vm1166_vm1, %v5689_v59 }
  0xa4   : > { %5459 = vmatprep.mubr.msk.bf16.mxu0 %vm1166_vm1, %v5690_v60 }
  0xa9   : > { %5584 = vmatmul.mubr.msk.bf16.gmra.mxu1 %vm1166_vm1, %v5753_v62 }
  0xab   : > { %5460 = vmatmul.mubr.msk.bf16.gmra.mxu0 %vm1166_vm1, %v5691_v63 }
  0xac   : > { %5463 = vmatprep.mubr.msk.bf16.mxu0 %vm1166_vm1, %v5692_v0 }
  0xb3   : > { %5464 = vmatmul.mubr.msk.bf16.gmra.mxu0 %vm1166_vm1, %v5693_v3 }
  0xb4   : > { %5467 = vmatprep.mubr.msk.bf16.mxu0 %vm1166_vm1, %v5694_v4 }
  0xbb   : > { %5468 = vmatmul.mubr.msk.bf16.gmra.mxu0 %vm1166_vm1, %v5695_v7 }
  0xbc   : > { %5471 = vmatprep.mubr.msk.bf16.mxu0 %vm1166_vm1, %v5696_v8 }
  0xc3   : > { %5472 = vmatmul.mubr.msk.bf16.gmra.mxu0 %vm1166_vm1, %v5697_v11 }
  0xc4   : > { %5475 = vmatprep.mubr.msk.bf16.mxu0 %vm1166_vm1, %v5698_v12 }
  0xcb   : > { %5476 = vmatmul.mubr.msk.bf16.gmra.mxu0 %vm1166_vm1, %v5699_v15 }
  0xcc   : > { %5479 = vmatprep.mubr.msk.bf16.mxu0 %vm1166_vm1, %v5702_v16 }
  0xd3   : > { %v5385_v23 = vpop.f32.mrf.mxu0  ;;  %5480 = vmatmul.mubr.msk.bf16.gmra.mxu0 %vm1166_vm1, %v5703_v19 }
  0xd4   : > { %5483 = vmatprep.mubr.msk.bf16.mxu0 %vm1166_vm1, %v5706_v20  ;;  %v2875_v36 = vmul.f32 %v5385_v23, %v5385_v23  ;;  %v5718_v20 = vld [vmem:[%s5835_s26 + $0x1c0] sm:$0xff]  }
  0xd5   : > { %v1589_v24 = vpop.f32.mrf.mxu0 }
  0xd6   : > { %v2873_v28 = vmul.f32 %v1589_v24, %v1589_v24 }
  0xd7   : > { %v5386_v25 = vpop.f32.mrf.mxu0 }
  0xd8   : > { %v2876_v42 = vmul.f32 %v5386_v25, %v5386_v25 }
  0xd9   : > { %v1592_v29 = vpop.f32.mrf.mxu0 }
  0xda   : > { %v2612_v31 = vadd.f32 %v1592_v29, %v1589_v24  ;;  %v2874_v32 = vmul.f32 %v1592_v29, %v1592_v29  ;;  %v3397_v33 = vmax.f32 %v1589_v24, %v1592_v29  ;;  %v4116_v34 = vmin.f32 %v1589_v24, %v1592_v29 }
  0xdb   : > { %v5389_v37 = vpop.f32.mrf.mxu0  ;;  %5484 = vmatmul.mubr.msk.bf16.gmra.mxu0 %vm1166_vm1, %v5707_v26  ;;  %v5754_v26 = vld [vmem:[%s5835_s26 + $0x330] sm:$0xff]  }
  0xdc   : > { %v2613_v38 = vadd.f32 %v5385_v23, %v2612_v31  ;;  %v3129_v39 = vadd.f32 %v2874_v32, %v2873_v28  ;;  %v3398_v40 = vmax.f32 %v3397_v33, %v5385_v23  ;;  %v4117_v41 = vmin.f32 %v4116_v34, %v5385_v23  ;;  %5487 = vmatprep.mubr.msk.bf16.mxu0 %vm1166_vm1, %v5710_v27 }
  0xdd   : > { %v1605_v43 = vpop.f32.mrf.mxu0  ;;  %v2879_v5 = vmul.f32 %v5389_v37, %v5389_v37  ;;  %5587 = vmatprep.mubr.msk.bf16.mxu1 %vm1166_vm1, %v5754_v26 }
  0xde   : > { %v2614_v44 = vadd.f32 %v5386_v25, %v2613_v38  ;;  %v3130_v45 = vadd.f32 %v3129_v39, %v2875_v36  ;;  %v3399_v46 = vmax.f32 %v3398_v40, %v5386_v25  ;;  %v4118_v47 = vmin.f32 %v4117_v41, %v5386_v25  ;;  %5588 = vmatmul.mubr.msk.bf16.gmra.mxu1 %vm1166_vm1, %v5755_v30 }
  0xdf   : > { %v2877_v48 = vmul.f32 %v1605_v43, %v1605_v43  ;;  %v5390_v49 = vpop.f32.mrf.mxu0 }
  0xe0   : > { %v3131_v51 = vadd.f32 %v3130_v45, %v2876_v42  ;;  %v3400_v52 = vrot.slane %v3399_v46, 4  ;;  %v4119_v53 = vrot.slane %v4118_v47, 4  ;;  %v2615_v54 = vadd.f32 %v2614_v44, %v1605_v43 }
  0xe1   : > { %v1608_v56 = vpop.f32.mrf.mxu0  ;;  %v2880_v12 = vmul.f32 %v5390_v49, %v5390_v49 }
  0xe2   : > { %v3401_v58 = vmax.f32 %v3399_v46, %v3400_v52  ;;  %v4120_v59 = vmin.f32 %v4118_v47, %v4119_v53  ;;  %v3132_v60 = vadd.f32 %v3131_v51, %v2877_v48  ;;  %v2616_v61 = vadd.f32 %v2615_v54, %v1608_v56  ;;  %v5719_v54 = vld [vmem:[%s5835_s26 + $0x1c8] sm:$0xff]  }
  0xe3   : > { %v2878_v63 = vmul.f32 %v1608_v56, %v1608_v56  ;;  %v3406_v0 = vmax.f32 %v1605_v43, %v1608_v56  ;;  %v4125_v1 = vmin.f32 %v1605_v43, %v1608_v56  ;;  %v5393_v2 = vpop.f32.mrf.mxu0  ;;  %5488 = vmatmul.mubr.msk.bf16.gmra.mxu0 %vm1166_vm1, %v5711_v50 }
  0xe4   : > { %v3402_v3 = vrot.slane %v3401_v58, 2  ;;  %v2617_v4 = vadd.f32 %v5389_v37, %v2616_v61  ;;  %5491 = vmatprep.mubr.msk.bf16.mxu0 %vm1166_vm1, %v5714_v55  ;;  %v4121_v10 = vrot.slane %v4120_v59, 2 }
  0xe5   : > { %v3133_v6 = vadd.f32 %v3132_v60, %v2878_v63  ;;  %v3407_v7 = vmax.f32 %v3406_v0, %v5389_v37  ;;  %v4126_v8 = vmin.f32 %v4125_v1, %v5389_v37  ;;  %v1621_v9 = vpop.f32.mrf.mxu0  ;;  %v2883_v37 = vmul.f32 %v5393_v2, %v5393_v2  ;;  %v5756_v0 = vld [vmem:[%s5835_s26 + $0x340] sm:$0xff]  }
  0xe6   : > { %v2618_v11 = vadd.f32 %v5390_v49, %v2617_v4  ;;  %v3403_v18 = vmax.f32 %v3401_v58, %v3402_v3  ;;  %v2881_v24 = vmul.f32 %v1621_v9, %v1621_v9  ;;  %v4122_v27 = vmin.f32 %v4120_v59, %v4121_v10  ;;  %v5722_v58 = vld [vmem:[%s5835_s26 + $0x1d0] sm:$0xff]   ;;  %5591 = vmatprep.mubr.msk.bf16.mxu1 %vm1166_vm1, %v5756_v0 }
  0xe7   : > { %v3134_v13 = vadd.f32 %v3133_v6, %v2879_v5  ;;  %v3408_v14 = vmax.f32 %v3407_v7, %v5390_v49  ;;  %v4127_v15 = vmin.f32 %v4126_v8, %v5390_v49  ;;  %v5394_v16 = vpop.f32.mrf.mxu0  ;;  %v5757_v5 = vld [vmem:[%s5835_s26 + $0x348] sm:$0xff]  }
  0xe8   : > { %v2619_v19 = vadd.f32 %v2618_v11, %v1621_v9  ;;  %v3404_v36 = vrot.slane %v3403_v18, 1  ;;  %v4123_v45 = vrot.slane %v4122_v27, 1  ;;  %v2884_v46 = vmul.f32 %v5394_v16, %v5394_v16  ;;  %5592 = vmatmul.mubr.msk.bf16.gmra.mxu1 %vm1166_vm1, %v5757_v5  ;;  %v5727_v5 = vld [vmem:[%s5835_s26 + $0x1e8] sm:$0xff]  }
  0xe9   : > { %v3135_v21 = vadd.f32 %v3134_v13, %v2880_v12  ;;  %v3409_v22 = vrot.slane %v3408_v14, 4  ;;  %v4128_v23 = vrot.slane %v4127_v15, 4  ;;  %v1624_v25 = vpop.f32.mrf.mxu0 }
  0xea   : > { %v2620_v28 = vadd.f32 %v2619_v19, %v1624_v25  ;;  %v2882_v29 = vmul.f32 %v1624_v25, %v1624_v25  ;;  %v3415_v34 = vmax.f32 %v1621_v9, %v1624_v25  ;;  %v4134_v39 = vmin.f32 %v1621_v9, %v1624_v25 }
  0xeb   : > { %v3410_v31 = vmax.f32 %v3408_v14, %v3409_v22  ;;  %v4129_v32 = vmin.f32 %v4127_v15, %v4128_v23  ;;  %v3136_v33 = vadd.f32 %v3135_v21, %v2881_v24  ;;  %v5397_v35 = vpop.f32.mrf.mxu0  ;;  %5492 = vmatmul.mubr.msk.bf16.gmra.mxu0 %vm1166_vm1, %v5715_v17  ;;  %v3405_v55 = vmax.f32 %v3403_v18, %v3404_v36 }
  0xec   : > { %v2621_v38 = vadd.f32 %v5393_v2, %v2620_v28  ;;  %5495 = vmatprep.mubr.msk.bf16.mxu0 %vm1166_vm1, %v5718_v20  ;;  %v3416_v43 = vmax.f32 %v3415_v34, %v5393_v2  ;;  %v4135_v48 = vmin.f32 %v4134_v39, %v5393_v2  ;;  %v4124_v6 = vmin.f32 %v4122_v27, %v4123_v45  ;;  %v5726_v34 = vld [vmem:[%s5835_s26 + $0x1e0] sm:$0xff]   ;;  %v5759_v45 = vld [vmem:[%s5835_s26 + $0x358] sm:$0xff]  }
  0xed   : > { %v3411_v40 = vrot.slane %v3410_v31, 2  ;;  %v4130_v41 = vrot.slane %v4129_v32, 2  ;;  %v3137_v42 = vadd.f32 %v3136_v33, %v2882_v29  ;;  %v1637_v44 = vpop.f32.mrf.mxu0  ;;  %v2887_v17 = vmul.f32 %v5397_v35, %v5397_v35  ;;  %v5723_v29 = vld [vmem:[%s5835_s26 + $0x1d8] sm:$0xff]  }
  0xee   : > { %v2622_v47 = vadd.f32 %v5394_v16, %v2621_v38  ;;  %v3417_v52 = vmax.f32 %v3416_v43, %v5394_v16  ;;  %v4136_v56 = vmin.f32 %v4135_v48, %v5394_v16  ;;  %v2885_v62 = vmul.f32 %v1637_v44, %v1637_v44 }
  0xef   : > { %v3412_v49 = vmax.f32 %v3410_v31, %v3411_v40  ;;  %v4131_v50 = vmin.f32 %v4129_v32, %v4130_v41  ;;  %v3138_v51 = vadd.f32 %v3137_v42, %v2883_v37  ;;  %v5398_v53 = vpop.f32.mrf.mxu0  ;;  %v5758_v40 = vld [vmem:[%s5835_s26 + $0x350] sm:$0xff]  }
  0xf0   : > { %v2623_v57 = vadd.f32 %v2622_v47, %v1637_v44  ;;  %v3418_v61 = vrot.slane %v3417_v52, 4  ;;  %v4137_v1 = vrot.slane %v4136_v56, 4  ;;  %v2888_v26 = vmul.f32 %v5398_v53, %v5398_v53  ;;  %5595 = vmatprep.mubr.msk.bf16.mxu1 %vm1166_vm1, %v5758_v40 }
  0xf1   : > { %v3413_v59 = vrot.slane %v3412_v49, 1  ;;  %v3139_v60 = vadd.f32 %v3138_v51, %v2884_v46  ;;  %v1640_v63 = vpop.f32.mrf.mxu0  ;;  %v4132_v7 = vrot.slane %v4131_v50, 1  ;;  %5596 = vmatmul.mubr.msk.bf16.gmra.mxu1 %vm1166_vm1, %v5759_v45  ;;  %v5731_v45 = vld [vmem:[%s5835_s26 + $0x1f8] sm:$0xff]  }
  0xf2   : > { %v2624_v2 = vadd.f32 %v2623_v57, %v1640_v63  ;;  %v2886_v3 = vmul.f32 %v1640_v63, %v1640_v63  ;;  %v3424_v4 = vmax.f32 %v1637_v44, %v1640_v63  ;;  %v3419_v8 = vmax.f32 %v3417_v52, %v3418_v61 }
  0xf3   : > { %v3140_v9 = vadd.f32 %v3139_v60, %v2885_v62  ;;  %v6035_v10 = vpop.f32.mrf.mxu0  ;;  %5496 = vmatmul.mubr.msk.bf16.gmra.mxu0 %vm1166_vm1, %v5719_v54  ;;  %v4138_v11 = vmin.f32 %v4136_v56, %v4137_v1  ;;  %v4143_v14 = vmin.f32 %v1637_v44, %v1640_v63  ;;  %v3414_v15 = vmax.f32 %v3412_v49, %v3413_v59 }
  0xf4   : > { %v2625_v12 = vadd.f32 %v5397_v35, %v2624_v2  ;;  %v3425_v13 = vmax.f32 %v3424_v4, %v5397_v35  ;;  %5499 = vmatprep.mubr.msk.bf16.mxu0 %vm1166_vm1, %v5722_v58  ;;  %v3420_v16 = vrot.slane %v3419_v8, 2  ;;  %v4133_v24 = vmin.f32 %v4131_v50, %v4132_v7 }
  0xf5   : > { %v3141_v18 = vadd.f32 %v3140_v9, %v2886_v3  ;;  %v1653_v19 = vpop.f32.mrf.mxu0  ;;  %v4139_v20 = vrot.slane %v4138_v11, 2  ;;  %v4144_v23 = vmin.f32 %v4143_v14, %v5397_v35  ;;  %v4038_v36 = vsel %vm4037_vm2, %v3414_v15, %v3405_v55 }
  0xf6   : > { %v2626_v21 = vadd.f32 %v5398_v53, %v2625_v12  ;;  %v3426_v22 = vmax.f32 %v3425_v13, %v5398_v53  ;;  %v3421_v25 = vmax.f32 %v3419_v8, %v3420_v16  ;;  %v2889_v35 = vmul.f32 %v1653_v19, %v1653_v19 }
  0xf7   : > { %v3142_v27 = vadd.f32 %v3141_v18, %v2887_v17  ;;  %v5402_v28 = vpop.f32.mrf.mxu0  ;;  %v4140_v30 = vmin.f32 %v4138_v11, %v4139_v20  ;;  %v4145_v32 = vmin.f32 %v4144_v23, %v5398_v53  ;;  %v4756_v46 = vsel %vm4037_vm2, %v4133_v24, %v4124_v6  ;;  %v5730_v11 = vld [vmem:[%s5835_s26 + $0x1f0] sm:$0xff]   ;;  %v5760_v17 = vld [vmem:[%s5835_s26 + $0x360] sm:$0xff]  }
  0xf8   : > { %v3427_v31 = vrot.slane %v3426_v22, 4  ;;  %v2627_v33 = vadd.f32 %v2626_v21, %v1653_v19  ;;  %v3422_v37 = vrot.slane %v3421_v25, 1  ;;  %v2891_v55 = vmul.f32 %v6035_v10, %v6035_v10  ;;  %v5761_v21 = vld [vmem:[%s5835_s26 + $0x368] sm:$0xff]   ;;  %5599 = vmatprep.mubr.msk.bf16.mxu1 %vm1166_vm1, %v5760_v17 }
  0xf9   : > { %v3143_v38 = vadd.f32 %v3142_v27, %v2888_v26  ;;  %v1656_v39 = vpop.f32.mrf.mxu0  ;;  %v4141_v41 = vrot.slane %v4140_v30, 1  ;;  %v4146_v43 = vrot.slane %v4145_v32, 4  ;;  %v2892_v0 = vmul.f32 %v5402_v28, %v5402_v28  ;;  %5600 = vmatmul.mubr.msk.bf16.gmra.mxu1 %vm1166_vm1, %v5761_v21 }
  0xfa   : > { %v3428_v42 = vmax.f32 %v3426_v22, %v3427_v31  ;;  %v2628_v44 = vadd.f32 %v2627_v33, %v1656_v39  ;;  %v2890_v48 = vmul.f32 %v1656_v39, %v1656_v39  ;;  %v3433_v49 = vmax.f32 %v1653_v19, %v1656_v39 }
  0xfb   : > { %v3144_v47 = vadd.f32 %v3143_v38, %v2889_v35  ;;  %v5405_v50 = vpop.f32.mrf.mxu0  ;;  %5500 = vmatmul.mubr.msk.bf16.gmra.mxu0 %vm1166_vm1, %v5723_v29  ;;  %v3423_v51 = vmax.f32 %v3421_v25, %v3422_v37  ;;  %v4147_v53 = vmin.f32 %v4145_v32, %v4146_v43  ;;  %v4152_v58 = vmin.f32 %v1653_v19, %v1656_v39 }
  0xfc   : > { %v3429_v52 = vrot.slane %v3428_v42, 2  ;;  %v2629_v54 = vadd.f32 %v6035_v10, %v2628_v44  ;;  %5503 = vmatprep.mubr.msk.bf16.mxu0 %vm1166_vm1, %v5726_v34  ;;  %v3434_v57 = vmax.f32 %v3433_v49, %v6035_v10  ;;  %v4142_v60 = vmin.f32 %v4140_v30, %v4141_v41 }
  0xfd   : > { %v3145_v56 = vadd.f32 %v3144_v47, %v2890_v48  ;;  %v1669_v59 = vpop.f32.mrf.mxu0  ;;  %v4148_v62 = vrot.slane %v4147_v53, 2  ;;  %v4153_v3 = vmin.f32 %v4152_v58, %v6035_v10  ;;  %v4040_v6 = vsel %vm4039_vm3, %v3423_v51, %v4038_v36 }
  0xfe   : > { %v3430_v61 = vmax.f32 %v3428_v42, %v3429_v52  ;;  %v2630_v63 = vadd.f32 %v5402_v28, %v2629_v54  ;;  %v3435_v2 = vmax.f32 %v3434_v57, %v5402_v28  ;;  %v2893_v15 = vmul.f32 %v1669_v59, %v1669_v59 }
  0xff   : > { %v3146_v1 = vadd.f32 %v3145_v56, %v2891_v55  ;;  %v5406_v4 = vpop.f32.mrf.mxu0  ;;  %v4149_v8 = vmin.f32 %v4147_v53, %v4148_v62  ;;  %v4154_v14 = vmin.f32 %v4153_v3, %v5402_v28  ;;  %v4757_v18 = vsel %vm4039_vm3, %v4142_v60, %v4756_v46  ;;  %v5762_v55 = vld [vmem:[%s5835_s26 + $0x370] sm:$0xff]   ;;  %v5763_v60 = vld [vmem:[%s5835_s26 + $0x378] sm:$0xff]  }
 0x100   : > { %v3431_v7 = vrot.slane %v3430_v61, 1  ;;  %v2631_v9 = vadd.f32 %v2630_v63, %v1669_v59  ;;  %v3436_v13 = vrot.slane %v3435_v2, 4  ;;  %v2895_v28 = vmul.f32 %v5405_v50, %v5405_v50  ;;  %5603 = vmatprep.mubr.msk.bf16.mxu1 %vm1166_vm1, %v5762_v55 }
 0x101   : > { %v3147_v12 = vadd.f32 %v3146_v1, %v2892_v0  ;;  %v1672_v16 = vpop.f32.mrf.mxu0  ;;  %v4150_v19 = vrot.slane %v4149_v8, 1  ;;  %v4155_v23 = vrot.slane %v4154_v14, 4  ;;  %v2896_v38 = vmul.f32 %v5406_v4, %v5406_v4  ;;  %5604 = vmatmul.mubr.msk.bf16.gmra.mxu1 %vm1166_vm1, %v5763_v60 }
 0x102   : > { %v2632_v20 = vadd.f32 %v2631_v9, %v1672_v16  ;;  %v2894_v10 = vmul.f32 %v1672_v16, %v1672_v16  ;;  %v3437_v22 = vmax.f32 %v3435_v2, %v3436_v13  ;;  %v3442_v25 = vmax.f32 %v1669_v59, %v1672_v16 }
 0x103   : > { %v3148_v24 = vadd.f32 %v3147_v12, %v2893_v15  ;;  %v5409_v26 = vpop.f32.mrf.mxu0  ;;  %5504 = vmatmul.mubr.msk.bf16.gmra.mxu0 %vm1166_vm1, %v5727_v5  ;;  %v3432_v27 = vmax.f32 %v3430_v61, %v3431_v7  ;;  %v4161_v30 = vmin.f32 %v1669_v59, %v1672_v16  ;;  %v4156_v32 = vmin.f32 %v4154_v14, %v4155_v23 }
 0x104   : > { %v2633_v29 = vadd.f32 %v5405_v50, %v2632_v20  ;;  %5507 = vmatprep.mubr.msk.bf16.mxu0 %vm1166_vm1, %v5730_v11  ;;  %v3438_v31 = vrot.slane %v3437_v22, 2  ;;  %v3443_v34 = vmax.f32 %v3442_v25, %v5405_v50  ;;  %v4151_v37 = vmin.f32 %v4149_v8, %v4150_v19 }
 0x105   : > { %v3149_v33 = vadd.f32 %v3148_v24, %v2894_v10  ;;  %v1685_v36 = vpop.f32.mrf.mxu0  ;;  %v4162_v39 = vmin.f32 %v4161_v30, %v5405_v50  ;;  %v4157_v41 = vrot.slane %v4156_v32, 2  ;;  %v4042_v46 = vsel %vm4041_vm4, %v3432_v27, %v4040_v6 }
 0x106   : > { %v2634_v35 = vadd.f32 %v5406_v4, %v2633_v29  ;;  %v3439_v40 = vmax.f32 %v3437_v22, %v3438_v31  ;;  %v3444_v43 = vmax.f32 %v3443_v34, %v5406_v4  ;;  %v2897_v49 = vmul.f32 %v1685_v36, %v1685_v36  ;;  %v5765_v34 = vld [vmem:[%s5835_s26 + $0x388] sm:$0xff]  }
 0x107   : > { %v3150_v42 = vadd.f32 %v3149_v33, %v2895_v28  ;;  %v5410_v44 = vpop.f32.mrf.mxu0  ;;  %v4163_v47 = vmin.f32 %v4162_v39, %v5406_v4  ;;  %v4158_v52 = vmin.f32 %v4156_v32, %v4157_v41  ;;  %v4758_v62 = vsel %vm4041_vm4, %v4151_v37, %v4757_v18 }
 0x108   : > { %v2635_v48 = vadd.f32 %v2634_v35, %v1685_v36  ;;  %v3440_v51 = vrot.slane %v3439_v40, 1  ;;  %v3445_v54 = vrot.slane %v3444_v43, 4  ;;  %v2899_v8 = vmul.f32 %v5409_v26, %v5409_v26 }
 0x109   : > { %v3151_v53 = vadd.f32 %v3150_v42, %v2896_v38  ;;  %v1688_v50 = vpop.f32.mrf.mxu0  ;;  %v4164_v56 = vrot.slane %v4163_v47, 4  ;;  %v4159_v61 = vrot.slane %v4158_v52, 1  ;;  %v2900_v18 = vmul.f32 %v5410_v44, %v5410_v44 }
 0x10a   : > { %v2636_v57 = vadd.f32 %v2635_v48, %v1688_v50  ;;  %v2898_v58 = vmul.f32 %v1688_v50, %v1688_v50  ;;  %v3451_v59 = vmax.f32 %v1685_v36, %v1688_v50  ;;  %v3446_v63 = vmax.f32 %v3444_v43, %v3445_v54 }
 0x10b   : > { %v3152_v0 = vadd.f32 %v3151_v53, %v2897_v49  ;;  %v6071_v1 = vpop.f32.mrf.mxu0  ;;  %5508 = vmatmul.mubr.msk.bf16.gmra.mxu0 %vm1166_vm1, %v5731_v45  ;;  %v4165_v2 = vmin.f32 %v4163_v47, %v4164_v56  ;;  %v4170_v5 = vmin.f32 %v1685_v36, %v1688_v50  ;;  %v3441_v6 = vmax.f32 %v3439_v40, %v3440_v51 }
 0x10c   : > { %v2637_v3 = vadd.f32 %v5409_v26, %v2636_v57  ;;  %v3452_v4 = vmax.f32 %v3451_v59, %v5409_v26  ;;  %v3447_v7 = vrot.slane %v3446_v63, 2  ;;  %v4160_v16 = vmin.f32 %v4158_v52, %v4159_v61 }
 0x10d   : > { %v3153_v9 = vadd.f32 %v3152_v0, %v2898_v58  ;;  %v1701_v11 = vpop.f32.mrf.mxu0  ;;  %v4166_v12 = vrot.slane %v4165_v2, 2  ;;  %v4171_v15 = vmin.f32 %v4170_v5, %v5409_v26  ;;  %v4044_v24 = vsel %vm4043_vm5, %v3441_v6, %v4042_v46  ;;  %v5764_v26 = vld [vmem:[%s5835_s26 + $0x380] sm:$0xff]   ;;  %v5766_v6 = vld [vmem:[%s5835_s26 + $0x390] sm:$0xff]  }
 0x10e   : > { %v2638_v13 = vadd.f32 %v5410_v44, %v2637_v3  ;;  %v3453_v14 = vmax.f32 %v3452_v4, %v5410_v44  ;;  %v3448_v17 = vmax.f32 %v3446_v63, %v3447_v7  ;;  %v2901_v28 = vmul.f32 %v1701_v11, %v1701_v11  ;;  %5607 = vmatprep.mubr.msk.bf16.mxu1 %vm1166_vm1, %v5764_v26 }
 0x10f   : > { %v3154_v19 = vadd.f32 %v3153_v9, %v2899_v8  ;;  %v5414_v20 = vpop.f32.mrf.mxu0  ;;  %v4167_v10 = vmin.f32 %v4165_v2, %v4166_v12  ;;  %v4172_v22 = vmin.f32 %v4171_v15, %v5410_v44  ;;  %v4759_v36 = vsel %vm4043_vm5, %v4160_v16, %v4758_v62  ;;  %v6084_v44 = vpop.f32.mrf.mxu1  ;;  %5608 = vmatmul.mubr.msk.bf16.gmra.mxu1 %vm1166_vm1, %v5765_v34 }
 0x110   : > { %v3454_v21 = vrot.slane %v3453_v14, 4  ;;  %v2639_v23 = vadd.f32 %v2638_v13, %v1701_v11  ;;  %v3449_v25 = vrot.slane %v3448_v17, 1  ;;  %v2903_v45 = vmul.f32 %v6071_v1, %v6071_v1  ;;  %5611 = vmatprep.mubr.msk.bf16.mxu1 %vm1166_vm1, %v5766_v6 }
 0x111   : > { %v3155_v27 = vadd.f32 %v3154_v19, %v2900_v18  ;;  %v1704_v29 = vpop.f32.mrf.mxu0  ;;  %v4168_v30 = vrot.slane %v4167_v10, 1  ;;  %v4173_v32 = vrot.slane %v4172_v22, 4  ;;  %v6091_v50 = vpop.f32.mrf.mxu1  ;;  %v2904_v55 = vmul.f32 %v5414_v20, %v5414_v20 }
 0x112   : > { %v3455_v31 = vmax.f32 %v3453_v14, %v3454_v21  ;;  %v2640_v33 = vadd.f32 %v2639_v23, %v1704_v29  ;;  %v2902_v38 = vmul.f32 %v1704_v29, %v1704_v29  ;;  %v3460_v35 = vmax.f32 %v1701_v11, %v1704_v29  ;;  %v5767_v21 = vld [vmem:[%s5835_s26 + $0x398] sm:$0xff]  }
 0x113   : > { %v3156_v37 = vadd.f32 %v3155_v27, %v2901_v28  ;;  %v6080_v39 = vpop.f32.mrf.mxu0  ;;  %v3450_v40 = vmax.f32 %v3448_v17, %v3449_v25  ;;  %v4174_v42 = vmin.f32 %v4172_v22, %v4173_v32  ;;  %v4179_v48 = vmin.f32 %v1701_v11, %v1704_v29  ;;  %v6101_v0 = vpop.f32.mrf.mxu1 }
 0x114   : > { %v3456_v41 = vrot.slane %v3455_v31, 2  ;;  %v2641_v43 = vadd.f32 %v6071_v1, %v2640_v33  ;;  %v3461_v47 = vmax.f32 %v3460_v35, %v6071_v1  ;;  %v4169_v51 = vmin.f32 %v4167_v10, %v4168_v30 }
 0x115   : > { %v3157_v46 = vadd.f32 %v3156_v37, %v2902_v38  ;;  %v1717_v49 = vpop.f32.mrf.mxu0  ;;  %v4175_v53 = vrot.slane %v4174_v42, 2  ;;  %v4180_v58 = vmin.f32 %v4179_v48, %v6071_v1  ;;  %v4046_v60 = vsel %vm4045_vm6, %v3450_v40, %v4044_v24  ;;  %v6105_v12 = vpop.f32.mrf.mxu1 }
 0x116   : > { %v3457_v52 = vmax.f32 %v3455_v31, %v3456_v41  ;;  %v2642_v54 = vadd.f32 %v5414_v20, %v2641_v43  ;;  %v3462_v57 = vmax.f32 %v3461_v47, %v5414_v20  ;;  %v2905_v5 = vmul.f32 %v1717_v49, %v1717_v49 }
 0x117   : > { %v3158_v56 = vadd.f32 %v3157_v46, %v2903_v45  ;;  %v5418_v59 = vpop.f32.mrf.mxu0  ;;  %v4176_v62 = vmin.f32 %v4174_v42, %v4175_v53  ;;  %v4181_v4 = vmin.f32 %v4180_v58, %v5414_v20  ;;  %v4760_v7 = vsel %vm4045_vm6, %v4169_v51, %v4759_v36  ;;  %v6120_v31 = vpop.f32.mrf.mxu1  ;;  %5612 = vmatmul.mubr.msk.bf16.gmra.mxu1 %vm1166_vm1, %v5767_v21 }
 0x118   : > { %v3458_v61 = vrot.slane %v3457_v52, 1  ;;  %v2643_v63 = vadd.f32 %v2642_v54, %v1717_v49  ;;  %v3463_v3 = vrot.slane %v3462_v57, 4  ;;  %v2907_v19 = vmul.f32 %v6080_v39, %v6080_v39 }
 0x119   : > { %v3159_v2 = vadd.f32 %v3158_v56, %v2904_v55  ;;  %v1720_v1 = vpop.f32.mrf.mxu0  ;;  %v4177_v8 = vrot.slane %v4176_v62, 1  ;;  %v4182_v14 = vrot.slane %v4181_v4, 4  ;;  %v2908_v29 = vmul.f32 %v5418_v59, %v5418_v59 }
 0x11a   : > { %v2644_v9 = vadd.f32 %v2643_v63, %v1720_v1  ;;  %v2906_v11 = vmul.f32 %v1720_v1, %v1720_v1  ;;  %v3464_v13 = vmax.f32 %v3462_v57, %v3463_v3  ;;  %v3469_v16 = vmax.f32 %v1717_v49, %v1720_v1 }
 0x11b   : > { %v3160_v15 = vadd.f32 %v3159_v2, %v2905_v5  ;;  %v5421_v17 = vpop.f32.mrf.mxu0  ;;  %v3459_v18 = vmax.f32 %v3457_v52, %v3458_v61  ;;  %v4188_v10 = vmin.f32 %v1717_v49, %v1720_v1  ;;  %v4183_v23 = vmin.f32 %v4181_v4, %v4182_v14  ;;  %v6125_v52 = vpop.f32.mrf.mxu1 }
 0x11c   : > { %v2645_v20 = vadd.f32 %v6080_v39, %v2644_v9  ;;  %v3465_v22 = vrot.slane %v3464_v13, 2  ;;  %v3470_v25 = vmax.f32 %v3469_v16, %v6080_v39  ;;  %v4178_v28 = vmin.f32 %v4176_v62, %v4177_v8  ;;  %v5768_v9 = vld [vmem:[%s5835_s26 + $0x3a0] sm:$0xff]  }
 0x11d   : > { %v3161_v24 = vadd.f32 %v3160_v15, %v2906_v11  ;;  %v1733_v27 = vpop.f32.mrf.mxu0  ;;  %v4189_v30 = vmin.f32 %v4188_v10, %v6080_v39  ;;  %v4184_v33 = vrot.slane %v4183_v23, 2  ;;  %v4048_v38 = vsel %vm4047_vm7, %v3459_v18, %v4046_v60  ;;  %v6133_v62 = vpop.f32.mrf.mxu1  ;;  %5615 = vmatprep.mubr.msk.bf16.mxu1 %vm1166_vm1, %v5768_v9 }
 0x11e   : > { %v2646_v26 = vadd.f32 %v5418_v59, %v2645_v20  ;;  %v3466_v32 = vmax.f32 %v3464_v13, %v3465_v22  ;;  %v3471_v36 = vmax.f32 %v3470_v25, %v5418_v59  ;;  %v2909_v41 = vmul.f32 %v1733_v27, %v1733_v27  ;;  %7794 = vst [vmem:[#allocation2_spill] sm:$0xff] %v6133_v62 }
 0x11f   : > { %v3162_v34 = vadd.f32 %v3161_v24, %v2907_v19  ;;  %v5422_v37 = vpop.f32.mrf.mxu0  ;;  %v4190_v35 = vmin.f32 %v4189_v30, %v5418_v59  ;;  %v4185_v43 = vmin.f32 %v4183_v23, %v4184_v33  ;;  %v4761_v53 = vsel %vm4047_vm7, %v4178_v28, %v4760_v7  ;;  %v6145_v10 = vpop.f32.mrf.mxu1 }
 0x120   : > { %v2647_v40 = vadd.f32 %v2646_v26, %v1733_v27  ;;  %v3467_v42 = vrot.slane %v3466_v32, 1  ;;  %v3472_v46 = vrot.slane %v3471_v36, 4  ;;  %v2911_v3 = vmul.f32 %v5421_v17, %v5421_v17 }
 0x121   : > { %v3163_v45 = vadd.f32 %v3162_v34, %v2908_v29  ;;  %v1736_v39 = vpop.f32.mrf.mxu0  ;;  %v4191_v47 = vrot.slane %v4190_v35, 4  ;;  %v4186_v55 = vrot.slane %v4185_v43, 1  ;;  %v2912_v13 = vmul.f32 %v5422_v37, %v5422_v37 }
 0x122   : > { %v2648_v48 = vadd.f32 %v2647_v40, %v1736_v39  ;;  %v2910_v49 = vmul.f32 %v1736_v39, %v1736_v39  ;;  %v3478_v51 = vmax.f32 %v1733_v27, %v1736_v39  ;;  %v3468_v54 = vmax.f32 %v3466_v32, %v3467_v42 }
 0x123   : > { %v3164_v56 = vadd.f32 %v3163_v45, %v2909_v41  ;;  %v5425_v57 = vpop.f32.mrf.mxu0  ;;  %v3473_v58 = vmax.f32 %v3471_v36, %v3472_v46  ;;  %v4197_v61 = vmin.f32 %v1733_v27, %v1736_v39  ;;  %v4187_v2 = vmin.f32 %v4185_v43, %v4186_v55 }
 0x124   : > { %v2649_v59 = vadd.f32 %v5421_v17, %v2648_v48  ;;  %v3479_v60 = vmax.f32 %v3478_v51, %v5421_v17  ;;  %v4050_v63 = vsel %vm4049_vm8, %v3468_v54, %v4048_v38  ;;  %v4192_v1 = vmin.f32 %v4190_v35, %v4191_v47  ;;  %v6150_v38 = vpop.f32.mrf.mxu1 }
 0x125   : > { %v3165_v4 = vadd.f32 %v3164_v56, %v2910_v49  ;;  %v1749_v5 = vpop.f32.mrf.mxu0  ;;  %4108 = vst [vmem:[%s6131_s7] sm:$0xff] %v4050_v63  ;;  %v4198_v8 = vmin.f32 %v4197_v61, %v5421_v17  ;;  %v4762_v11 = vsel %vm4049_vm8, %v4187_v2, %v4761_v53  ;;  %v3474_v16 = vrot.slane %v3473_v58, 2  ;;  %v5769_v17 = vld [vmem:[%s5835_s26 + $0x3a8] sm:$0xff]   ;;  %7795 = vst [vmem:[#allocation3_spill] sm:$0xff] %v6150_v38 }
 0x126   : > { %v2650_v6 = vadd.f32 %v5422_v37, %v2649_v59  ;;  %v3480_v7 = vmax.f32 %v3479_v60, %v5422_v37  ;;  %4820 = vst [vmem:[%s6138_s10] sm:$0xff] %v4762_v11  ;;  %v2913_v22 = vmul.f32 %v1749_v5, %v1749_v5  ;;  %v4193_v24 = vrot.slane %v4192_v1, 2  ;;  %5616 = vmatmul.mubr.msk.bf16.gmra.mxu1 %vm1166_vm1, %v5769_v17  ;;  %v6152_v59 = vpop.f32.mrf.mxu1 }
 0x127   : > { %v3166_v14 = vadd.f32 %v3165_v4, %v2911_v3  ;;  %v5426_v15 = vpop.f32.mrf.mxu0  ;;  %v4199_v19 = vmin.f32 %v4198_v8, %v5422_v37  ;;  %v3475_v33 = vmax.f32 %v3473_v58, %v3474_v16  ;;  %v2915_v35 = vmul.f32 %v5425_v57, %v5425_v57  ;;  %7796 = vst [vmem:[#allocation4_spill] sm:$0xff] %v6152_v59 }
 0x128   : > { %v3481_v18 = vrot.slane %v3480_v7, 4  ;;  %v2651_v20 = vadd.f32 %v2650_v6, %v1749_v5  ;;  %v4194_v45 = vmin.f32 %v4192_v1, %v4193_v24  ;;  %v2916_v48 = vmul.f32 %v5426_v15, %v5426_v15 }
 0x129   : > { %v3167_v21 = vadd.f32 %v3166_v14, %v2912_v13  ;;  %v1752_v23 = vpop.f32.mrf.mxu0  ;;  %v4200_v27 = vrot.slane %v4199_v19, 4  ;;  %v3476_v55 = vrot.slane %v3475_v33, 1 }
 0x12a   : > { %v3482_v25 = vmax.f32 %v3480_v7, %v3481_v18  ;;  %v2652_v28 = vadd.f32 %v2651_v20, %v1752_v23  ;;  %v2914_v26 = vmul.f32 %v1752_v23, %v1752_v23  ;;  %v3487_v30 = vmax.f32 %v1749_v5, %v1752_v23  ;;  %v5770_v7 = vld [vmem:[%s5835_s26 + $0x3b0] sm:$0xff]   ;;  %v6155_v20 = vpop.f32.mrf.mxu1 }
 0x12b   : > { %v3168_v29 = vadd.f32 %v3167_v21, %v2913_v22  ;;  %v5429_v32 = vpop.f32.mrf.mxu0  ;;  %v4201_v36 = vmin.f32 %v4199_v19, %v4200_v27  ;;  %v4206_v42 = vmin.f32 %v1749_v5, %v1752_v23  ;;  %v4195_v4 = vrot.slane %v4194_v45, 1  ;;  %7797 = vst [vmem:[#allocation5_spill] sm:$0xff] %v6155_v20  ;;  %5619 = vmatprep.mubr.msk.bf16.mxu1 %vm1166_vm1, %v5770_v7 }
 0x12c   : > { %v3483_v34 = vrot.slane %v3482_v25, 2  ;;  %v2653_v37 = vadd.f32 %v5425_v57, %v2652_v28  ;;  %v3488_v41 = vmax.f32 %v3487_v30, %v5425_v57  ;;  %v2919_v16 = vmul.f32 %v5429_v32, %v5429_v32 }
 0x12d   : > { %v3169_v40 = vadd.f32 %v3168_v29, %v2914_v26  ;;  %v1765_v43 = vpop.f32.mrf.mxu0  ;;  %v4202_v39 = vrot.slane %v4201_v36, 2  ;;  %v4207_v53 = vmin.f32 %v4206_v42, %v5425_v57  ;;  %v3477_v24 = vmax.f32 %v3475_v33, %v3476_v55  ;;  %v6161_v42 = vpop.f32.mrf.mxu1 }
 0x12e   : > { %v3484_v46 = vmax.f32 %v3482_v25, %v3483_v34  ;;  %v2654_v47 = vadd.f32 %v5426_v15, %v2653_v37  ;;  %v3489_v51 = vmax.f32 %v3488_v41, %v5426_v15  ;;  %v2917_v2 = vmul.f32 %v1765_v43, %v1765_v43  ;;  %7798 = vst [vmem:[#allocation6_spill] sm:$0xff] %v6161_v42 }
 0x12f   : > { %v3170_v49 = vadd.f32 %v3169_v40, %v2915_v35  ;;  %v5430_v54 = vpop.f32.mrf.mxu0  ;;  %v4208_v63 = vmin.f32 %v4207_v53, %v5426_v15  ;;  %v4203_v5 = vmin.f32 %v4201_v36, %v4202_v39  ;;  %v4196_v37 = vmin.f32 %v4194_v45, %v4195_v4  ;;  %v5771_v53 = vld [vmem:[%s5835_s26 + $0x3b8] sm:$0xff]  }
 0x130   : > { %v3485_v56 = vrot.slane %v3484_v46, 1  ;;  %v2655_v58 = vadd.f32 %v2654_v47, %v1765_v43  ;;  %v3490_v61 = vrot.slane %v3489_v51, 4  ;;  %v2920_v25 = vmul.f32 %v5430_v54, %v5430_v54  ;;  %5620 = vmatmul.mubr.msk.bf16.gmra.mxu1 %vm1166_vm1, %v5771_v53 }
 0x131   : > { %v3171_v60 = vadd.f32 %v3170_v49, %v2916_v48  ;;  %v1768_v3 = vpop.f32.mrf.mxu0  ;;  %v4209_v9 = vrot.slane %v4208_v63, 4  ;;  %v4204_v29 = vrot.slane %v4203_v5, 1 }
 0x132   : > { %v2656_v1 = vadd.f32 %v2655_v58, %v1768_v3  ;;  %v2918_v6 = vmul.f32 %v1768_v3, %v1768_v3  ;;  %v3491_v8 = vmax.f32 %v3489_v51, %v3490_v61  ;;  %v3496_v57 = vmax.f32 %v1765_v43, %v1768_v3 }
 0x133   : > { %v3172_v11 = vadd.f32 %v3171_v60, %v2917_v2  ;;  %v5433_v13 = vpop.f32.mrf.mxu0  ;;  %v3486_v14 = vmax.f32 %v3484_v46, %v3485_v56  ;;  %v4215_v19 = vmin.f32 %v1765_v43, %v1768_v3  ;;  %v4210_v21 = vmin.f32 %v4208_v63, %v4209_v9  ;;  %v6164_v3 = vpop.f32.mrf.mxu1 }
 0x134   : > { %v2657_v18 = vadd.f32 %v5429_v32, %v2656_v1  ;;  %v3492_v15 = vrot.slane %v3491_v8, 2  ;;  %v3497_v23 = vmax.f32 %v3496_v57, %v5429_v32  ;;  %v4205_v55 = vmin.f32 %v4203_v5, %v4204_v29 }
 0x135   : > { %v3173_v22 = vadd.f32 %v3172_v11, %v2918_v6  ;;  %v1781_v17 = vpop.f32.mrf.mxu0  ;;  %v4216_v28 = vmin.f32 %v4215_v19, %v5429_v32  ;;  %v4211_v26 = vrot.slane %v4210_v21, 2  ;;  %v6159_v35 = vsel %vm4037_vm2, %v3486_v14, %v3477_v24  ;;  %v6167_v14 = vpop.f32.mrf.mxu1 }
 0x136   : > { %v2658_v27 = vadd.f32 %v5430_v54, %v2657_v18  ;;  %v3498_v34 = vmax.f32 %v3497_v23, %v5430_v54  ;;  %v3493_v43 = vmax.f32 %v3491_v8, %v3492_v15  ;;  %v2921_v39 = vmul.f32 %v1781_v17, %v1781_v17  ;;  %7799 = vst [vmem:[#allocation7_spill] sm:$0xff] %v6167_v14 }
 0x137   : > { %v3174_v30 = vadd.f32 %v3173_v22, %v2919_v16  ;;  %v5434_v36 = vpop.f32.mrf.mxu0  ;;  %v4217_v40 = vmin.f32 %v4216_v28, %v5430_v54  ;;  %v4212_v56 = vmin.f32 %v4210_v21, %v4211_v26  ;;  %v2923_v6 = vmul.f32 %v5433_v13, %v5433_v13 }
 0x138   : > { %v2659_v41 = vadd.f32 %v2658_v27, %v1781_v17  ;;  %v3499_v33 = vrot.slane %v3498_v34, 4  ;;  %v3494_v4 = vrot.slane %v3493_v43, 1  ;;  %v2924_v19 = vmul.f32 %v5434_v36, %v5434_v36 }
 0x139   : > { %v3175_v46 = vadd.f32 %v3174_v30, %v2920_v25  ;;  %v1784_v47 = vpop.f32.mrf.mxu0  ;;  %v4218_v32 = vrot.slane %v4217_v40, 4  ;;  %v4213_v16 = vrot.slane %v4212_v56, 1  ;;  %v6169_v25 = vpop.f32.mrf.mxu1  ;;  %v4763_v27 = vsel %vm4037_vm2, %v4205_v55, %v4196_v37  ;;  %v5772_v30 = vld [vmem:[%s5835_s26 + $0x3c0] sm:$0xff]  }
 0x13a   : > { %v2660_v48 = vadd.f32 %v2659_v41, %v1784_v47  ;;  %v2922_v49 = vmul.f32 %v1784_v47, %v1784_v47  ;;  %v3505_v51 = vmax.f32 %v1781_v17, %v1784_v47  ;;  %v3500_v45 = vmax.f32 %v3498_v34, %v3499_v33  ;;  %5623 = vmatprep.mubr.msk.bf16.mxu1 %vm1166_vm1, %v5772_v30 }
 0x13b   : > { %v3176_v58 = vadd.f32 %v3175_v46, %v2921_v39  ;;  %v5437_v60 = vpop.f32.mrf.mxu0  ;;  %v4219_v61 = vmin.f32 %v4217_v40, %v4218_v32  ;;  %v4224_v2 = vmin.f32 %v1781_v17, %v1784_v47  ;;  %v3495_v28 = vmax.f32 %v3493_v43, %v3494_v4  ;;  %v5773_v4 = vld [vmem:[%s5835_s26 + $0x3c8] sm:$0xff]  }
 0x13c   : > { %v2661_v54 = vadd.f32 %v5433_v13, %v2660_v48  ;;  %v3506_v63 = vmax.f32 %v3505_v51, %v5433_v13  ;;  %v3501_v1 = vrot.slane %v3500_v45, 2  ;;  %v4214_v33 = vmin.f32 %v4212_v56, %v4213_v16  ;;  %v6174_v51 = vpop.f32.mrf.mxu1  ;;  %5624 = vmatmul.mubr.msk.bf16.gmra.mxu1 %vm1166_vm1, %v5773_v4 }
 0x13d   : > { %v3177_v7 = vadd.f32 %v3176_v58, %v2922_v49  ;;  %v1797_v8 = vpop.f32.mrf.mxu0  ;;  %v4220_v9 = vrot.slane %v4219_v61, 2  ;;  %v4225_v57 = vmin.f32 %v4224_v2, %v5433_v13  ;;  %7800 = vst [vmem:[#allocation8_spill] sm:$0xff] %v6174_v51  ;;  %v2927_v53 = vmul.f32 %v5437_v60, %v5437_v60 }
 0x13e   : > { %v2662_v11 = vadd.f32 %v5434_v36, %v2661_v54  ;;  %v3507_v5 = vmax.f32 %v3506_v63, %v5434_v36  ;;  %v3502_v18 = vmax.f32 %v3500_v45, %v3501_v1  ;;  %v2925_v26 = vmul.f32 %v1797_v8, %v1797_v8 }
 0x13f   : > { %v3178_v15 = vadd.f32 %v3177_v7, %v2923_v6  ;;  %v5438_v21 = vpop.f32.mrf.mxu0  ;;  %v4221_v22 = vmin.f32 %v4219_v61, %v4220_v9  ;;  %v4226_v17 = vmin.f32 %v4225_v57, %v5434_v36  ;;  %v4052_v56 = vsel %vm4039_vm3, %v3495_v28, %v6159_v35 }
 0x140   : > { %v3508_v23 = vrot.slane %v3507_v5, 4  ;;  %v2663_v24 = vadd.f32 %v2662_v11, %v1797_v8  ;;  %v3503_v34 = vrot.slane %v3502_v18, 1  ;;  %v2928_v1 = vmul.f32 %v5438_v21, %v5438_v21 }
 0x141   : > { %v3179_v29 = vadd.f32 %v3178_v15, %v2924_v19  ;;  %v1800_v13 = vpop.f32.mrf.mxu0  ;;  %v4227_v41 = vrot.slane %v4226_v17, 4  ;;  %v4222_v36 = vrot.slane %v4221_v22, 1  ;;  %v6180_v15 = vpop.f32.mrf.mxu1 }
 0x142   : > { %v3509_v40 = vmax.f32 %v3507_v5, %v3508_v23  ;;  %v2664_v46 = vadd.f32 %v2663_v24, %v1800_v13  ;;  %v2926_v47 = vmul.f32 %v1800_v13, %v1800_v13  ;;  %v3514_v32 = vmax.f32 %v1797_v8, %v1800_v13 }
 0x143   : > { %v3180_v39 = vadd.f32 %v3179_v29, %v2925_v26  ;;  %v5441_v48 = vpop.f32.mrf.mxu0  ;;  %v4228_v37 = vmin.f32 %v4226_v17, %v4227_v41  ;;  %v4233_v58 = vmin.f32 %v1797_v8, %v1800_v13  ;;  %v3504_v54 = vmax.f32 %v3502_v18, %v3503_v34  ;;  %v6186_v34 = vpop.f32.mrf.mxu1 }
 0x144   : > { %v3510_v49 = vrot.slane %v3509_v40, 2  ;;  %v2665_v43 = vadd.f32 %v5437_v60, %v2664_v46  ;;  %v3515_v45 = vmax.f32 %v3514_v32, %v5437_v60  ;;  %v4764_v5 = vsel %vm4039_vm3, %v4214_v33, %v4763_v27 }
 0x145   : > { %v3181_v55 = vadd.f32 %v3180_v39, %v2926_v47  ;;  %v1813_v61 = vpop.f32.mrf.mxu0  ;;  %v4229_v63 = vrot.slane %v4228_v37, 2  ;;  %v4234_v9 = vmin.f32 %v4233_v58, %v5437_v60  ;;  %v4223_v57 = vmin.f32 %v4221_v22, %v4222_v36 }
 0x146   : > { %v2666_v2 = vadd.f32 %v5438_v21, %v2665_v43  ;;  %v3516_v7 = vmax.f32 %v3515_v45, %v5438_v21  ;;  %v3511_v16 = vmax.f32 %v3509_v40, %v3510_v49  ;;  %v2929_v23 = vmul.f32 %v1813_v61, %v1813_v61 }
 0x147   : > { %v3182_v6 = vadd.f32 %v3181_v55, %v2927_v53  ;;  %v5442_v11 = vpop.f32.mrf.mxu0  ;;  %v4235_v18 = vmin.f32 %v4234_v9, %v5438_v21  ;;  %v6184_v24 = vsel %vm4041_vm4, %v3504_v54, %v4052_v56  ;;  %v4230_v28 = vmin.f32 %v4228_v37, %v4229_v63  ;;  %v6189_v63 = vpop.f32.mrf.mxu1 }
 0x148   : > { %v2667_v19 = vadd.f32 %v2666_v2, %v1813_v61  ;;  %v3517_v35 = vrot.slane %v3516_v7, 4  ;;  %v3512_v40 = vrot.slane %v3511_v16, 1  ;;  %v2931_v41 = vmul.f32 %v5441_v48, %v5441_v48  ;;  %7801 = vst [vmem:[#allocation9_spill] sm:$0xff] %v6189_v63  ;;  %v5774_v2 = vld [vmem:[%s5835_s26 + $0x3d0] sm:$0xff]  }
 0x149   : > { %v3183_v8 = vadd.f32 %v3182_v6, %v2928_v1  ;;  %v1816_v17 = vpop.f32.mrf.mxu0  ;;  %v4236_v27 = vrot.slane %v4235_v18, 4  ;;  %v4765_v49 = vsel %vm4041_vm4, %v4223_v57, %v4764_v5  ;;  %v2932_v37 = vmul.f32 %v5442_v11, %v5442_v11  ;;  %5627 = vmatprep.mubr.msk.bf16.mxu1 %vm1166_vm1, %v5774_v2 }
 0x14a   : > { %v2668_v60 = vadd.f32 %v2667_v19, %v1816_v17  ;;  %v2930_v29 = vmul.f32 %v1816_v17, %v1816_v17  ;;  %v3518_v26 = vmax.f32 %v3516_v7, %v3517_v35  ;;  %v3523_v13 = vmax.f32 %v1813_v61, %v1816_v17 }
 0x14b   : > { %v3184_v22 = vadd.f32 %v3183_v8, %v2929_v23  ;;  %v5445_v30 = vpop.f32.mrf.mxu0  ;;  %v4242_v33 = vmin.f32 %v1813_v61, %v1816_v17  ;;  %v4237_v39 = vmin.f32 %v4235_v18, %v4236_v27  ;;  %v4231_v55 = vrot.slane %v4230_v28, 1 }
 0x14c   : > { %v2669_v46 = vadd.f32 %v5441_v48, %v2668_v60  ;;  %v3519_v21 = vrot.slane %v3518_v26, 2  ;;  %v3524_v32 = vmax.f32 %v3523_v13, %v5441_v48  ;;  %v3513_v61 = vmax.f32 %v3511_v16, %v3512_v40 }
 0x14d   : > { %v3185_v47 = vadd.f32 %v3184_v22, %v2930_v29  ;;  %v1829_v36 = vpop.f32.mrf.mxu0  ;;  %v4243_v53 = vmin.f32 %v4242_v33, %v5441_v48  ;;  %v4238_v45 = vrot.slane %v4237_v39, 2  ;;  %v4232_v23 = vmin.f32 %v4230_v28, %v4231_v55 }
 0x14e   : > { %v2670_v43 = vadd.f32 %v5442_v11, %v2669_v46  ;;  %v3525_v56 = vmax.f32 %v3524_v32, %v5442_v11  ;;  %v3520_v4 = vmax.f32 %v3518_v26, %v3519_v21  ;;  %v2933_v8 = vmul.f32 %v1829_v36, %v1829_v36 }
 0x14f   : > { %v3186_v58 = vadd.f32 %v3185_v47, %v2931_v41  ;;  %v5446_v54 = vpop.f32.mrf.mxu0  ;;  %v4244_v1 = vmin.f32 %v4243_v53, %v5442_v11  ;;  %v4239_v7 = vmin.f32 %v4237_v39, %v4238_v45  ;;  %v2935_v60 = vmul.f32 %v5445_v30, %v5445_v30  ;;  %v6195_v11 = vpop.f32.mrf.mxu1  ;;  %v5775_v39 = vld [vmem:[%s5835_s26 + $0x3d8] sm:$0xff]  }
 0x150   : > { %v2671_v6 = vadd.f32 %v2670_v43, %v1829_v36  ;;  %v3526_v19 = vrot.slane %v3525_v56, 4  ;;  %7802 = vst [vmem:[#allocation10_spill] sm:$0xff] %v6195_v11  ;;  %v3521_v40 = vrot.slane %v3520_v4, 1  ;;  %v4054_v43 = vsel %vm4043_vm5, %v3513_v61, %v6184_v24  ;;  %5628 = vmatmul.mubr.msk.bf16.gmra.mxu1 %vm1166_vm1, %v5775_v39 }
 0x151   : > { %v3187_v9 = vadd.f32 %v3186_v58, %v2932_v37  ;;  %v1832_v5 = vpop.f32.mrf.mxu0  ;;  %v4245_v48 = vrot.slane %v4244_v1, 4  ;;  %v4240_v41 = vrot.slane %v4239_v7, 1  ;;  %v2936_v55 = vmul.f32 %v5446_v54, %v5446_v54 }
 0x152   : > { %v2672_v57 = vadd.f32 %v2671_v6, %v1832_v5  ;;  %v2934_v35 = vmul.f32 %v1832_v5, %v1832_v5  ;;  %v3532_v18 = vmax.f32 %v1829_v36, %v1832_v5  ;;  %v3527_v17 = vmax.f32 %v3525_v56, %v3526_v19  ;;  %v6202_v56 = vpop.f32.mrf.mxu1 }
 0x153   : > { %v3188_v29 = vadd.f32 %v3187_v9, %v2933_v8  ;;  %v6193_v16 = vpop.f32.mrf.mxu0  ;;  %v4246_v26 = vmin.f32 %v4244_v1, %v4245_v48  ;;  %v4251_v13 = vmin.f32 %v1829_v36, %v1832_v5  ;;  %7803 = vst [vmem:[#allocation11_spill] sm:$0xff] %v6202_v56  ;;  %v4766_v9 = vsel %vm4043_vm5, %v4232_v23, %v4765_v49  ;;  %v5776_v23 = vld [vmem:[%s5835_s26 + $0x3e0] sm:$0xff]  }
 0x154   : > { %v2673_v27 = vadd.f32 %v5445_v30, %v2672_v57  ;;  %v3533_v22 = vmax.f32 %v3532_v18, %v5445_v30  ;;  %v3528_v46 = vrot.slane %v3527_v17, 2  ;;  %v3522_v19 = vmax.f32 %v3520_v4, %v3521_v40  ;;  %v6206_v24 = vpop.f32.mrf.mxu1  ;;  %5631 = vmatprep.mubr.msk.bf16.mxu1 %vm1166_vm1, %v5776_v23 }
 0x155   : > { %v3189_v33 = vadd.f32 %v3188_v29, %v2934_v35  ;;  %v1845_v21 = vpop.f32.mrf.mxu0  ;;  %v4247_v47 = vrot.slane %v4246_v26, 2  ;;  %v4252_v37 = vmin.f32 %v4251_v13, %v5445_v30  ;;  %v4241_v61 = vmin.f32 %v4239_v7, %v4240_v41 }
 0x156   : > { %v2674_v32 = vadd.f32 %v5446_v54, %v2673_v27  ;;  %v3534_v28 = vmax.f32 %v3533_v22, %v5446_v54  ;;  %v3529_v53 = vmax.f32 %v3527_v17, %v3528_v46  ;;  %v2937_v8 = vmul.f32 %v1845_v21, %v1845_v21  ;;  %v6209_v4 = vpop.f32.mrf.mxu1 }
 0x157   : > { %v3190_v45 = vadd.f32 %v3189_v33, %v2935_v60  ;;  %v6200_v58 = vpop.f32.mrf.mxu0  ;;  %v4248_v36 = vmin.f32 %v4246_v26, %v4247_v47  ;;  %v4253_v1 = vmin.f32 %v4252_v37, %v5446_v54  ;;  %7804 = vst [vmem:[#allocation12_spill] sm:$0xff] %v6209_v4  ;;  %v2939_v13 = vmul.f32 %v6193_v16, %v6193_v16 }
 0x158   : > { %v3535_v2 = vrot.slane %v3534_v28, 4  ;;  %v2675_v6 = vadd.f32 %v2674_v32, %v1845_v21  ;;  %v3530_v18 = vrot.slane %v3529_v53, 1  ;;  %v4055_v33 = vsel %vm4045_vm6, %v3522_v19, %v4054_v43  ;;  %v6222_v19 = vpop.f32.mrf.mxu1 }
 0x159   : > { %v3191_v30 = vadd.f32 %v3190_v45, %v2936_v55  ;;  %v1848_v5 = vpop.f32.mrf.mxu0  ;;  %v4254_v57 = vrot.slane %v4253_v1, 4  ;;  %v4249_v54 = vrot.slane %v4248_v36, 1  ;;  %v2940_v32 = vmul.f32 %v6200_v58, %v6200_v58  ;;  %7805 = vst [vmem:[#allocation13_spill] sm:$0xff] %v6222_v19 }
 0x15a   : > { %v3536_v48 = vmax.f32 %v3534_v28, %v3535_v2  ;;  %v2676_v35 = vadd.f32 %v2675_v6, %v1848_v5  ;;  %v2938_v60 = vmul.f32 %v1848_v5, %v1848_v5  ;;  %v3541_v29 = vmax.f32 %v1845_v21, %v1848_v5  ;;  %v6228_v23 = vpop.f32.mrf.mxu1 }
 0x15b   : > { %v3192_v17 = vadd.f32 %v3191_v30, %v2937_v8  ;;  %v5453_v26 = vpop.f32.mrf.mxu0  ;;  %v4255_v22 = vmin.f32 %v4253_v1, %v4254_v57  ;;  %v4260_v41 = vmin.f32 %v1845_v21, %v1848_v5  ;;  %v3531_v28 = vmax.f32 %v3529_v53, %v3530_v18  ;;  %7806 = vst [vmem:[#allocation14_spill] sm:$0xff] %v6228_v23 }
 0x15c   : > { %v3537_v27 = vrot.slane %v3536_v48, 2  ;;  %v2677_v49 = vadd.f32 %v6193_v16, %v2676_v35  ;;  %v3542_v40 = vmax.f32 %v3541_v29, %v6193_v16  ;;  %v4767_v21 = vsel %vm4045_vm6, %v4241_v61, %v4766_v9 }
 0x15d   : > { %v3193_v7 = vadd.f32 %v3192_v17, %v2938_v60  ;;  %v1861_v46 = vpop.f32.mrf.mxu0  ;;  %v4256_v47 = vrot.slane %v4255_v22, 2  ;;  %v4250_v1 = vmin.f32 %v4248_v36, %v4249_v54  ;;  %v4261_v30 = vmin.f32 %v4260_v41, %v6193_v16  ;;  %v5777_v60 = vld [vmem:[%s5835_s26 + $0x3e8] sm:$0xff]  }
 0x15e   : > { %v3538_v39 = vmax.f32 %v3536_v48, %v3537_v27  ;;  %v3543_v55 = vmax.f32 %v3542_v40, %v6200_v58  ;;  %v2678_v45 = vadd.f32 %v6200_v58, %v2677_v49  ;;  %v2941_v5 = vmul.f32 %v1861_v46, %v1861_v46  ;;  %5632 = vmatmul.mubr.msk.bf16.gmra.mxu1 %vm1166_vm1, %v5777_v60 }
 0x15f   : > { %v3194_v37 = vadd.f32 %v3193_v7, %v2939_v13  ;;  %v5454_v2 = vpop.f32.mrf.mxu0  ;;  %v4257_v43 = vmin.f32 %v4255_v22, %v4256_v47  ;;  %v4056_v29 = vsel %vm4047_vm7, %v3531_v28, %v4055_v33  ;;  %v4768_v13 = vsel %vm4047_vm7, %v4250_v1, %v4767_v21 }
 0x160   : > { %v3539_v6 = vrot.slane %v3538_v39, 1  ;;  %v2679_v8 = vadd.f32 %v2678_v45, %v1861_v46  ;;  %v3544_v9 = vrot.slane %v3543_v55, 4  ;;  %v2943_v7 = vmul.f32 %v5453_v26, %v5453_v26 }
 0x161   : > { %v3195_v48 = vadd.f32 %v3194_v37, %v2940_v32  ;;  %v1864_v53 = vpop.f32.mrf.mxu0  ;;  %v4258_v35 = vrot.slane %v4257_v43, 1  ;;  %v4262_v47 = vmin.f32 %v4261_v30, %v6200_v58  ;;  %v6235_v37 = vpop.f32.mrf.mxu1 }
 0x162   : > { %v3540_v57 = vmax.f32 %v3538_v39, %v3539_v6  ;;  %v2942_v18 = vmul.f32 %v1864_v53, %v1864_v53  ;;  %v3550_v17 = vmax.f32 %v1861_v46, %v1864_v53  ;;  %v2680_v61 = vadd.f32 %v2679_v8, %v1864_v53  ;;  %7807 = vst [vmem:[#allocation15_spill] sm:$0xff] %v6235_v37 }
 0x163   : > { %v3196_v36 = vadd.f32 %v3195_v48, %v2941_v5  ;;  %v5457_v54 = vpop.f32.mrf.mxu0  ;;  %v4259_v22 = vmin.f32 %v4257_v43, %v4258_v35  ;;  %v4269_v49 = vmin.f32 %v1861_v46, %v1864_v53  ;;  %v2944_v46 = vmul.f32 %v5454_v2, %v5454_v2  ;;  %v6238_v30 = vpop.f32.mrf.mxu1 }
 0x164   : > { %v4057_v27 = vsel %vm4049_vm8, %v3540_v57, %v4056_v29  ;;  %v3551_v16 = vmax.f32 %v3550_v17, %v5453_v26  ;;  %v2681_v40 = vadd.f32 %v5453_v26, %v2680_v61  ;;  %v3545_v21 = vmax.f32 %v3543_v55, %v3544_v9  ;;  %7808 = vst [vmem:[#allocation16_spill] sm:$0xff] %v6238_v30 }
 0x165   : > { %4109 = vst [vmem:[%s6131_s7 + $0x8] sm:$0xff] %v4057_v27  ;;  %v3197_v41 = vadd.f32 %v3196_v36, %v2942_v18  ;;  %v1877_v33 = vpop.f32.mrf.mxu0  ;;  %v4769_v39 = vsel %vm4049_vm8, %v4259_v22, %v4768_v13  ;;  %v4270_v28 = vmin.f32 %v4269_v49, %v5453_v26  ;;  %v4263_v57 = vrot.slane %v4262_v47, 4  ;;  %v5778_v26 = vld [vmem:[%s5835_s26 + $0x3f0] sm:$0xff]  }
 0x166   : > { %v3552_v32 = vmax.f32 %v3551_v16, %v5454_v2  ;;  %4821 = vst [vmem:[%s6138_s10 + $0x8] sm:$0xff] %v4769_v39  ;;  %v2682_v6 = vadd.f32 %v5454_v2, %v2681_v40  ;;  %v2945_v5 = vmul.f32 %v1877_v33, %v1877_v33  ;;  %v3546_v36 = vrot.slane %v3545_v21, 2  ;;  %5635 = vmatprep.mubr.msk.bf16.mxu1 %vm1166_vm1, %v5778_v26 }
 0x167   : > { %v3198_v45 = vadd.f32 %v3197_v41, %v2943_v7  ;;  %v5458_v43 = vpop.f32.mrf.mxu0  ;;  %v4271_v35 = vmin.f32 %v4270_v28, %v5454_v2  ;;  %v2947_v55 = vmul.f32 %v5457_v54, %v5457_v54  ;;  %v4264_v2 = vmin.f32 %v4262_v47, %v4263_v57  ;;  %v6242_v41 = vpop.f32.mrf.mxu1 }
 0x168   : > { %v3553_v1 = vrot.slane %v3552_v32, 4  ;;  %v2683_v8 = vadd.f32 %v2682_v6, %v1877_v33  ;;  %7809 = vst [vmem:[#allocation17_spill] sm:$0xff] %v6242_v41  ;;  %v2948_v39 = vmul.f32 %v5458_v43, %v5458_v43 }
 0x169   : > { %v3199_v48 = vadd.f32 %v3198_v45, %v2944_v46  ;;  %v1880_v53 = vpop.f32.mrf.mxu0  ;;  %v4272_v13 = vrot.slane %v4271_v35, 4 }
 0x16a   : > { %v2946_v18 = vmul.f32 %v1880_v53, %v1880_v53  ;;  %v3559_v58 = vmax.f32 %v1877_v33, %v1880_v53  ;;  %v2684_v60 = vadd.f32 %v2683_v8, %v1880_v53  ;;  %v3554_v61 = vmax.f32 %v3552_v32, %v3553_v1  ;;  %v5779_v8 = vld [vmem:[%s5835_s26 + $0x3f8] sm:$0xff]  }
 0x16b   : > { %v3200_v17 = vadd.f32 %v3199_v48, %v2945_v5  ;;  %v5461_v29 = vpop.f32.mrf.mxu0  ;;  %v4278_v22 = vmin.f32 %v1877_v33, %v1880_v53  ;;  %v3547_v32 = vmax.f32 %v3545_v21, %v3546_v36  ;;  %v4273_v47 = vmin.f32 %v4271_v35, %v4272_v13  ;;  %5636 = vmatmul.mubr.msk.bf16.gmra.mxu1 %vm1166_vm1, %v5779_v8 }
 0x16c   : > { %v3560_v27 = vmax.f32 %v3559_v58, %v5457_v54  ;;  %v2685_v9 = vadd.f32 %v5457_v54, %v2684_v60  ;;  %v3555_v6 = vrot.slane %v3554_v61, 2  ;;  %v4265_v58 = vrot.slane %v4264_v2, 2 }
 0x16d   : > { %v3201_v16 = vadd.f32 %v3200_v17, %v2946_v18  ;;  %v1893_v49 = vpop.f32.mrf.mxu0  ;;  %v4279_v40 = vmin.f32 %v4278_v22, %v5457_v54  ;;  %v6245_v54 = vpop.f32.mrf.mxu1  ;;  %v3548_v22 = vrot.slane %v3547_v32, 1 }
 0x16e   : > { %v3561_v7 = vmax.f32 %v3560_v27, %v5458_v43  ;;  %v2686_v46 = vadd.f32 %v5458_v43, %v2685_v9  ;;  %v2949_v48 = vmul.f32 %v1893_v49, %v1893_v49  ;;  %7810 = vst [vmem:[#allocation18_spill] sm:$0xff] %v6245_v54  ;;  %v2951_v9 = vmul.f32 %v5461_v29, %v5461_v29 }
 0x16f   : > { %v3202_v28 = vadd.f32 %v3201_v16, %v2947_v55  ;;  %v5462_v45 = vpop.f32.mrf.mxu0  ;;  %v4280_v1 = vmin.f32 %v4279_v40, %v5458_v43  ;;  %v3556_v43 = vmax.f32 %v3554_v61, %v3555_v6  ;;  %v6248_v13 = vpop.f32.mrf.mxu1  ;;  %v3549_v30 = vmax.f32 %v3547_v32, %v3548_v22 }
 0x170   : > { %v3562_v33 = vrot.slane %v3561_v7, 4  ;;  %v2687_v5 = vadd.f32 %v2686_v46, %v1893_v49  ;;  %7811 = vst [vmem:[#allocation19_spill] sm:$0xff] %v6248_v13  ;;  %v4274_v46 = vrot.slane %v4273_v47, 2 }
 0x171   : > { %v3203_v53 = vadd.f32 %v3202_v28, %v2948_v39  ;;  %v1896_v18 = vpop.f32.mrf.mxu0  ;;  %v4281_v26 = vrot.slane %v4280_v1, 4  ;;  %v3557_v23 = vrot.slane %v3556_v43, 1 }
 0x172   : > { %v3563_v57 = vmax.f32 %v3561_v7, %v3562_v33  ;;  %v2688_v60 = vadd.f32 %v2687_v5, %v1896_v18  ;;  %v2950_v27 = vmul.f32 %v1896_v18, %v1896_v18  ;;  %v3568_v21 = vmax.f32 %v1893_v49, %v1896_v18 }
 0x173   : > { %v3204_v17 = vadd.f32 %v3203_v53, %v2949_v48  ;;  %v5465_v36 = vpop.f32.mrf.mxu0  ;;  %v4282_v55 = vmin.f32 %v4280_v1, %v4281_v26  ;;  %v4287_v28 = vmin.f32 %v1893_v49, %v1896_v18  ;;  %v4266_v7 = vmin.f32 %v4264_v2, %v4265_v58  ;;  %v6250_v49 = vpop.f32.mrf.mxu1 }
 0x174   : > { %v2689_v16 = vadd.f32 %v5461_v29, %v2688_v60  ;;  %v3569_v39 = vmax.f32 %v3568_v21, %v5461_v29  ;;  %v2952_v33 = vmul.f32 %v5462_v45, %v5462_v45  ;;  %v3564_v8 = vrot.slane %v3563_v57, 2  ;;  %7812 = vst [vmem:[#allocation20_spill] sm:$0xff] %v6250_v49 }
 0x175   : > { %v3205_v40 = vadd.f32 %v3204_v17, %v2950_v27  ;;  %v1909_v35 = vpop.f32.mrf.mxu0  ;;  %v4288_v61 = vmin.f32 %v4287_v28, %v5461_v29  ;;  %v4283_v6 = vrot.slane %v4282_v55, 2  ;;  %v4275_v18 = vmin.f32 %v4273_v47, %v4274_v46  ;;  %v6252_v41 = vpop.f32.mrf.mxu1 }
 0x176   : > { %v3570_v5 = vmax.f32 %v3569_v39, %v5462_v45  ;;  %v2690_v53 = vadd.f32 %v5462_v45, %v2689_v16  ;;  %v2953_v26 = vmul.f32 %v1909_v35, %v1909_v35  ;;  %v4267_v21 = vrot.slane %v4266_v7, 1  ;;  %7813 = vst [vmem:[#allocation21_spill] sm:$0xff] %v6252_v41 }
 0x177   : > { %v3206_v48 = vadd.f32 %v3205_v40, %v2951_v9  ;;  %v5466_v54 = vpop.f32.mrf.mxu0  ;;  %v3565_v13 = vmax.f32 %v3563_v57, %v3564_v8  ;;  %v3558_v39 = vmax.f32 %v3556_v43, %v3557_v23  ;;  %v4289_v32 = vmin.f32 %v4288_v61, %v5462_v45 }
 0x178   : > { %v2691_v1 = vadd.f32 %v2690_v53, %v1909_v35  ;;  %v3571_v27 = vrot.slane %v3570_v5, 4  ;;  %v4284_v28 = vmin.f32 %v4282_v55, %v4283_v6  ;;  %v2955_v53 = vmul.f32 %v5465_v36, %v5465_v36 }
 0x179   : > { %v3207_v17 = vadd.f32 %v3206_v48, %v2952_v33  ;;  %v1912_v60 = vpop.f32.mrf.mxu0  ;;  %v4276_v47 = vrot.slane %v4275_v18, 1  ;;  %v3566_v56 = vrot.slane %v3565_v13, 1  ;;  %v2956_v57 = vmul.f32 %v5466_v54, %v5466_v54 }
 0x17a   : > { %v2954_v2 = vmul.f32 %v1912_v60, %v1912_v60  ;;  %v3577_v58 = vmax.f32 %v1909_v35, %v1912_v60  ;;  %v2692_v40 = vadd.f32 %v2691_v1, %v1912_v60  ;;  %v4296_v29 = vmin.f32 %v1909_v35, %v1912_v60 }
 0x17b   : > { %v3208_v9 = vadd.f32 %v3207_v17, %v2953_v26  ;;  %v5469_v16 = vpop.f32.mrf.mxu0  ;;  %v3572_v46 = vmax.f32 %v3570_v5, %v3571_v27  ;;  %v4268_v23 = vmin.f32 %v4266_v7, %v4267_v21  ;;  %v4058_v45 = vsel %vm4037_vm2, %v3558_v39, %v3549_v30 }
 0x17c   : > { %v3578_v22 = vmax.f32 %v3577_v58, %v5465_v36  ;;  %v2693_v37 = vadd.f32 %v5465_v36, %v2692_v40  ;;  %v4297_v4 = vmin.f32 %v4296_v29, %v5465_v36  ;;  %v4290_v43 = vrot.slane %v4289_v32, 4 }
 0x17d   : > { %v3209_v33 = vadd.f32 %v3208_v9, %v2954_v2  ;;  %v1925_v48 = vpop.f32.mrf.mxu0  ;;  %v4285_v35 = vrot.slane %v4284_v28, 1  ;;  %v6255_v2 = vpop.f32.mrf.mxu1  ;;  %v3573_v5 = vrot.slane %v3572_v46, 2  ;;  %v4277_v9 = vmin.f32 %v4275_v18, %v4276_v47 }
 0x17e   : > { %v3579_v49 = vmax.f32 %v3578_v22, %v5466_v54  ;;  %v2694_v1 = vadd.f32 %v5466_v54, %v2693_v37  ;;  %v2957_v6 = vmul.f32 %v1925_v48, %v1925_v48  ;;  %7814 = vst [vmem:[#allocation22_spill] sm:$0xff] %v6255_v2  ;;  %v4298_v27 = vmin.f32 %v4297_v4, %v5466_v54 }
 0x17f   : > { %v3210_v8 = vadd.f32 %v3209_v33, %v2955_v53  ;;  %v5470_v26 = vpop.f32.mrf.mxu0  ;;  %v3567_v40 = vmax.f32 %v3565_v13, %v3566_v56  ;;  %v6257_v21 = vpop.f32.mrf.mxu1  ;;  %v4291_v30 = vmin.f32 %v4289_v32, %v4290_v43  ;;  %v4286_v33 = vmin.f32 %v4284_v28, %v4285_v35 }
 0x180   : > { %v3580_v55 = vrot.slane %v3579_v49, 4  ;;  %v2695_v61 = vadd.f32 %v2694_v1, %v1925_v48  ;;  %7815 = vst [vmem:[#allocation23_spill] sm:$0xff] %v6257_v21  ;;  %v3574_v4 = vmax.f32 %v3572_v46, %v3573_v5  ;;  %v4299_v54 = vrot.slane %v4298_v27, 4 }
 0x181   : > { %v3211_v17 = vadd.f32 %v3210_v8, %v2956_v57  ;;  %v1928_v60 = vpop.f32.mrf.mxu0  ;;  %v2959_v57 = vmul.f32 %v5469_v16, %v5469_v16  ;;  %v6259_v41 = vpop.f32.mrf.mxu1  ;;  %v4770_v13 = vsel %vm4037_vm2, %v4277_v9, %v4268_v23  ;;  %v2960_v47 = vmul.f32 %v5470_v26, %v5470_v26 }
 0x182   : > { %v2958_v36 = vmul.f32 %v1928_v60, %v1928_v60  ;;  %v3586_v58 = vmax.f32 %v1925_v48, %v1928_v60  ;;  %v2696_v22 = vadd.f32 %v2695_v61, %v1928_v60  ;;  %v3581_v39 = vmax.f32 %v3579_v49, %v3580_v55  ;;  %7816 = vst [vmem:[#allocation24_spill] sm:$0xff] %v6259_v41 }
 0x183   : > { %v3212_v37 = vadd.f32 %v3211_v17, %v2957_v6  ;;  %v5473_v7 = vpop.f32.mrf.mxu0  ;;  %v4305_v53 = vmin.f32 %v1925_v48, %v1928_v60  ;;  %v6262_v49 = vpop.f32.mrf.mxu1  ;;  %v4292_v48 = vrot.slane %v4291_v30, 2  ;;  %v6265_v35 = vsel %vm4039_vm3, %v3567_v40, %v4058_v45 }
 0x184   : > { %v3587_v29 = vmax.f32 %v3586_v58, %v5469_v16  ;;  %v2697_v8 = vadd.f32 %v5469_v16, %v2696_v22  ;;  %7817 = vst [vmem:[#allocation25_spill] sm:$0xff] %v6262_v49  ;;  %v3582_v28 = vrot.slane %v3581_v39, 2  ;;  %v6270_v23 = vsel %vm4039_vm3, %v4286_v33, %v4770_v13 }
 0x185   : > { %v3213_v1 = vadd.f32 %v3212_v37, %v2958_v36  ;;  %v1941_v2 = vpop.f32.mrf.mxu0  ;;  %v4306_v56 = vmin.f32 %v4305_v53, %v5469_v16  ;;  %v6267_v16 = vpop.f32.mrf.mxu1  ;;  %v3575_v36 = vrot.slane %v3574_v4, 1  ;;  %v4300_v58 = vmin.f32 %v4298_v27, %v4299_v54 }
 0x186   : > { %v3588_v18 = vmax.f32 %v3587_v29, %v5470_v26  ;;  %v2698_v6 = vadd.f32 %v5470_v26, %v2697_v8  ;;  %v2961_v46 = vmul.f32 %v1941_v2, %v1941_v2  ;;  %7818 = vst [vmem:[#allocation26_spill] sm:$0xff] %v6267_v16  ;;  %v6274_v45 = vmin.f32 %v4291_v30, %v4292_v48 }
 0x187   : > { %v3214_v61 = vadd.f32 %v3213_v1, %v2959_v57  ;;  %v5474_v32 = vpop.f32.mrf.mxu0  ;;  %v4307_v55 = vmin.f32 %v4306_v56, %v5470_v26  ;;  %v6272_v57 = vpop.f32.mrf.mxu1  ;;  %v6276_v40 = vmax.f32 %v3581_v39, %v3582_v28  ;;  %v2963_v1 = vmul.f32 %v5473_v7, %v5473_v7 }
 0x188   : > { %v3589_v43 = vrot.slane %v3588_v18, 4  ;;  %v2699_v17 = vadd.f32 %v2698_v6, %v1941_v2  ;;  %7819 = vst [vmem:[#allocation27_spill] sm:$0xff] %v6272_v57  ;;  %v3576_v54 = vmax.f32 %v3574_v4, %v3575_v36  ;;  %v4301_v6 = vrot.slane %v4300_v58, 2 }
 0x189   : > { %v3215_v60 = vadd.f32 %v3214_v61, %v2960_v47  ;;  %v1944_v5 = vpop.f32.mrf.mxu0  ;;  %v4308_v9 = vrot.slane %v4307_v55, 4  ;;  %v6278_v27 = vpop.f32.mrf.mxu1  ;;  %v3584_v28 = vrot.slane %v6276_v40, 1 }
 0x18a   : > { %v2700_v22 = vadd.f32 %v2699_v17, %v1944_v5  ;;  %v2962_v29 = vmul.f32 %v1944_v5, %v1944_v5  ;;  %v3595_v53 = vmax.f32 %v1941_v2, %v1944_v5  ;;  %v3590_v8 = vmax.f32 %v3588_v18, %v3589_v43  ;;  %7820 = vst [vmem:[#allocation28_spill] sm:$0xff] %v6278_v27 }
 0x18b   : > { %v3216_v37 = vadd.f32 %v3215_v60, %v2961_v46  ;;  %v5477_v26 = vpop.f32.mrf.mxu0  ;;  %v4314_v13 = vmin.f32 %v1941_v2, %v1944_v5  ;;  %v4309_v17 = vmin.f32 %v4307_v55, %v4308_v9  ;;  %v2964_v46 = vmul.f32 %v5474_v32, %v5474_v32  ;;  %v6280_v39 = vpop.f32.mrf.mxu1 }
 0x18c   : > { %v2701_v56 = vadd.f32 %v5473_v7, %v2700_v22  ;;  %v3596_v33 = vmax.f32 %v3595_v53, %v5473_v7  ;;  %7821 = vst [vmem:[#allocation29_spill] sm:$0xff] %v6280_v39  ;;  %v4294_v18 = vrot.slane %v6274_v45, 1  ;;  %v3591_v43 = vrot.slane %v3590_v8, 2 }
 0x18d   : > { %v3217_v47 = vadd.f32 %v3216_v37, %v2962_v29  ;;  %v1957_v61 = vpop.f32.mrf.mxu0  ;;  %v4315_v16 = vmin.f32 %v4314_v13, %v5473_v7  ;;  %v6284_v55 = vpop.f32.mrf.mxu1  ;;  %v4302_v9 = vmin.f32 %v4300_v58, %v4301_v6  ;;  %v4310_v29 = vrot.slane %v4309_v17, 2 }
 0x18e   : > { %v3597_v41 = vmax.f32 %v3596_v33, %v5474_v32  ;;  %v2702_v30 = vadd.f32 %v5474_v32, %v2701_v56  ;;  %v2965_v2 = vmul.f32 %v1957_v61, %v1957_v61  ;;  %7822 = vst [vmem:[#allocation30_spill] sm:$0xff] %v6284_v55  ;;  %v3592_v57 = vmax.f32 %v3590_v8, %v3591_v43 }
 0x18f   : > { %v3218_v60 = vadd.f32 %v3217_v47, %v2963_v1  ;;  %v5478_v48 = vpop.f32.mrf.mxu0  ;;  %v4316_v37 = vmin.f32 %v4315_v16, %v5474_v32  ;;  %v6288_v27 = vpop.f32.mrf.mxu1  ;;  %v2967_v39 = vmul.f32 %v5477_v26, %v5477_v26 }
 0x190   : > { %v3598_v5 = vrot.slane %v3597_v41, 4  ;;  %v2703_v22 = vadd.f32 %v2702_v30, %v1957_v61  ;;  %7823 = vst [vmem:[#allocation31_spill] sm:$0xff] %v6288_v27 }
 0x191   : > { %v3219_v4 = vadd.f32 %v3218_v60, %v2964_v46  ;;  %v1960_v36 = vpop.f32.mrf.mxu0  ;;  %v4317_v56 = vrot.slane %v4316_v37, 4  ;;  %v6292_v6 = vpop.f32.mrf.mxu1 }
 0x192   : > { %v2966_v7 = vmul.f32 %v1960_v36, %v1960_v36  ;;  %v3604_v53 = vmax.f32 %v1957_v61, %v1960_v36  ;;  %v3599_v1 = vmax.f32 %v3597_v41, %v3598_v5  ;;  %v2704_v33 = vadd.f32 %v2703_v22, %v1960_v36  ;;  %7824 = vst [vmem:[#allocation32_spill] sm:$0xff] %v6292_v6 }
 0x193   : > { %v3220_v47 = vadd.f32 %v3219_v4, %v2965_v2  ;;  %v6286_v13 = vpop.f32.mrf.mxu0  ;;  %v4323_v16 = vmin.f32 %v1957_v61, %v1960_v36  ;;  %v4318_v60 = vmin.f32 %v4316_v37, %v4317_v56  ;;  %v4311_v41 = vmin.f32 %v4309_v17, %v4310_v29  ;;  %v6296_v43 = vpop.f32.mrf.mxu1 }
 0x194   : > { %v3605_v32 = vmax.f32 %v3604_v53, %v5477_v26  ;;  %v3600_v46 = vrot.slane %v3599_v1, 2  ;;  %v2705_v30 = vadd.f32 %v5477_v26, %v2704_v33  ;;  %v2968_v5 = vmul.f32 %v5478_v48, %v5478_v48  ;;  %7825 = vst [vmem:[#allocation33_spill] sm:$0xff] %v6296_v43 }
 0x195   : > { %v3221_v55 = vadd.f32 %v3220_v47, %v2966_v7  ;;  %v6290_v58 = vpop.f32.mrf.mxu0  ;;  %v4324_v22 = vmin.f32 %v4323_v16, %v5477_v26  ;;  %v4319_v21 = vrot.slane %v4318_v60, 2  ;;  %v4303_v61 = vrot.slane %v4302_v9, 1 }
 0x196   : > { %v3606_v2 = vmax.f32 %v3605_v32, %v5478_v48  ;;  %v3601_v4 = vmax.f32 %v3599_v1, %v3600_v46  ;;  %v2706_v27 = vadd.f32 %v5478_v48, %v2705_v30  ;;  %v3593_v37 = vrot.slane %v3592_v57, 1  ;;  %v6303_v1 = vpop.f32.mrf.mxu1 }
 0x197   : > { %v3222_v49 = vadd.f32 %v3221_v55, %v2967_v39  ;;  %v6294_v8 = vpop.f32.mrf.mxu0  ;;  %v4325_v7 = vmin.f32 %v4324_v22, %v5478_v48  ;;  %v4320_v53 = vmin.f32 %v4318_v60, %v4319_v21  ;;  %v2969_v17 = vmul.f32 %v6290_v58, %v6290_v58  ;;  %7826 = vst [vmem:[#allocation34_spill] sm:$0xff] %v6303_v1 }
 0x198   : > { %v3607_v36 = vrot.slane %v3606_v2, 4  ;;  %v2707_v56 = vadd.f32 %v2706_v27, %v6290_v58  ;;  %v4060_v39 = vsel %vm4041_vm4, %v3576_v54, %v6265_v35  ;;  %v4295_v55 = vmin.f32 %v6274_v45, %v4294_v18  ;;  %v6311_v46 = vpop.f32.mrf.mxu1 }
 0x199   : > { %v3223_v29 = vadd.f32 %v3222_v49, %v2968_v5  ;;  %v6301_v26 = vpop.f32.mrf.mxu0  ;;  %v4326_v33 = vrot.slane %v4325_v7, 4  ;;  %v3585_v48 = vmax.f32 %v6276_v40, %v3584_v28  ;;  %v4312_v21 = vrot.slane %v4311_v41, 1  ;;  %7827 = vst [vmem:[#allocation35_spill] sm:$0xff] %v6311_v46 }
 0x19a   : > { %v3608_v47 = vmax.f32 %v3606_v2, %v3607_v36  ;;  %v3602_v32 = vrot.slane %v3601_v4, 1  ;;  %v4304_v49 = vmin.f32 %v4302_v9, %v4303_v61  ;;  %v3685_v5 = vmax.f32 %v6091_v50, %v6105_v12  ;;  %v6320_v28 = vpop.f32.mrf.mxu1 }
 0x19b   : > { %v3224_v27 = vadd.f32 %v3223_v29, %v2969_v17  ;;  %v6309_v16 = vpop.f32.mrf.mxu0  ;;  %v4327_v30 = vmin.f32 %v4325_v7, %v4326_v33  ;;  %v3594_v35 = vmax.f32 %v3592_v57, %v3593_v37  ;;  %v4321_v54 = vrot.slane %v4320_v53, 1  ;;  %7828 = vst [vmem:[#allocation36_spill] sm:$0xff] %v6320_v28 }
 0x19c   : > { %v3609_v60 = vrot.slane %v3608_v47, 2  ;;  %v2708_v45 = vadd.f32 %v2707_v56, %v6301_v26  ;;  %v2970_v40 = vmul.f32 %v6301_v26, %v6301_v26  ;;  %v4772_v2 = vsel %vm4041_vm4, %v4295_v55, %v6270_v23  ;;  %v6329_v17 = vpop.f32.mrf.mxu1 }
 0x19d   : > { %v6318_v18 = vpop.f32.mrf.mxu0  ;;  %v4328_v22 = vrot.slane %v4327_v30, 2  ;;  %v4404_v61 = vmin.f32 %v6091_v50, %v6105_v12  ;;  %v4061_v57 = vsel %vm4043_vm5, %v3585_v48, %v4060_v39  ;;  %v4313_v37 = vmin.f32 %v4311_v41, %v4312_v21  ;;  %7829 = vst [vmem:[#allocation37_spill] sm:$0xff] %v6329_v17 }
 0x19e   : > { %v3610_v9 = vmax.f32 %v3608_v47, %v3609_v60  ;;  %v3603_v36 = vmax.f32 %v3601_v4, %v3602_v32  ;;  %v3225_v7 = vadd.f32 %v3224_v27, %v2970_v40  ;;  %v2971_v28 = vmul.f32 %v6286_v13, %v6286_v13  ;;  %v6339_v39 = vpop.f32.mrf.mxu1 }
 0x19f   : > { %v6327_v56 = vpop.f32.mrf.mxu0  ;;  %v4329_v33 = vmin.f32 %v4327_v30, %v4328_v22  ;;  %v3686_v23 = vmax.f32 %v3685_v5, %v6084_v44  ;;  %v4773_v55 = vsel %vm4043_vm5, %v4304_v49, %v4772_v2  ;;  %v4062_v47 = vsel %vm4045_vm6, %v3594_v35, %v4061_v57  ;;  %7830 = vst [vmem:[#allocation38_spill] sm:$0xff] %v6339_v39 }
 0x1a0   : > { %v3611_v29 = vrot.slane %v3610_v9, 1  ;;  %v4322_v60 = vmin.f32 %v4320_v53, %v4321_v54  ;;  %v2709_v41 = vadd.f32 %v6286_v13, %v2708_v45  ;;  %v4405_v32 = vmin.f32 %v4404_v61, %v6084_v44  ;;  %v6346_v53 = vpop.f32.mrf.mxu1 }
 0x1a1   : > { %v6337_v4 = vpop.f32.mrf.mxu0  ;;  %v4330_v21 = vrot.slane %v4329_v33, 1  ;;  %v3226_v27 = vadd.f32 %v3225_v7, %v2971_v28  ;;  %v4774_v30 = vsel %vm4045_vm6, %v4313_v37, %v4773_v55  ;;  %v4063_v5 = vsel %vm4047_vm7, %v3603_v36, %v4062_v47  ;;  %7831 = vst [vmem:[#allocation39_spill] sm:$0xff] %v6346_v53 }
 0x1a2   : > { %v3612_v48 = vmax.f32 %v3610_v9, %v3611_v29  ;;  %v2972_v45 = vmul.f32 %v6294_v8, %v6294_v8  ;;  %v3687_v40 = vmax.f32 %v3686_v23, %v6101_v0  ;;  %v4775_v2 = vsel %vm4047_vm7, %v4322_v60, %v4774_v30  ;;  %v6359_v61 = vpop.f32.mrf.mxu1 }
 0x1a3   : > { %v6344_v49 = vpop.f32.mrf.mxu0  ;;  %v4331_v54 = vmin.f32 %v4329_v33, %v4330_v21  ;;  %v3613_v28 = vmax.f32 %v6290_v58, %v6301_v26  ;;  %v2710_v9 = vadd.f32 %v6294_v8, %v2709_v41  ;;  %7832 = vst [vmem:[#allocation40_spill] sm:$0xff] %v6359_v61  ;;  %v4406_v37 = vmin.f32 %v4405_v32, %v6101_v0 }
 0x1a4   : > { %v4064_v35 = vsel %vm4049_vm8, %v3612_v48, %v4063_v5  ;;  %v4332_v36 = vmin.f32 %v6290_v58, %v6301_v26  ;;  %v3227_v7 = vadd.f32 %v3226_v27, %v2972_v45  ;;  %v2973_v33 = vmul.f32 %v6318_v18, %v6318_v18  ;;  %v6371_v55 = vpop.f32.mrf.mxu1 }
 0x1a5   : > { %4110 = vst [vmem:[%s6131_s7 + $0x10] sm:$0xff] %v4064_v35  ;;  %v6357_v22 = vpop.f32.mrf.mxu0  ;;  %v4776_v57 = vsel %vm4049_vm8, %v4331_v54, %v4775_v2  ;;  %v2711_v29 = vadd.f32 %v2710_v9, %v6318_v18  ;;  %7833 = vst [vmem:[#allocation41_spill] sm:$0xff] %v6371_v55  ;;  %v3688_v47 = vrot.slane %v3687_v40, 4  ;;  %v3614_v60 = vmax.f32 %v3613_v28, %v6286_v13 }
 0x1a6   : > { %4822 = vst [vmem:[%s6138_s10 + $0x10] sm:$0xff] %v4776_v57  ;;  %v3228_v41 = vadd.f32 %v3227_v7, %v2973_v33  ;;  %v3694_v48 = vmax.f32 %v6125_v52, %v6145_v10  ;;  %v6376_v21 = vpop.f32.mrf.mxu1  ;;  %v4407_v58 = vrot.slane %v4406_v37, 4  ;;  %v4333_v26 = vmin.f32 %v4332_v36, %v6286_v13 }
 0x1a7   : > { %v6369_v23 = vpop.f32.mrf.mxu0  ;;  %7834 = vst [vmem:[#allocation42_spill] sm:$0xff] %v6376_v21  ;;  %v4413_v32 = vmin.f32 %v6125_v52, %v6145_v10  ;;  %v2712_v27 = vadd.f32 %v2711_v29, %v6337_v4  ;;  %v2974_v35 = vmul.f32 %v6337_v4, %v6337_v4  ;;  %v3689_v45 = vmax.f32 %v3687_v40, %v3688_v47 }
 0x1a8   : > { %v3695_v5 = vmax.f32 %v3694_v48, %v6120_v31  ;;  %v6387_v54 = vpop.f32.mrf.mxu1  ;;  %v3615_v2 = vmax.f32 %v3614_v60, %v6294_v8  ;;  %v2975_v13 = vmul.f32 %v6309_v16, %v6309_v16  ;;  %v4408_v36 = vmin.f32 %v4406_v37, %v4407_v58 }
 0x1a9   : > { %v6382_v30 = vpop.f32.mrf.mxu0  ;;  %7835 = vst [vmem:[#allocation43_spill] sm:$0xff] %v6387_v54  ;;  %v2713_v28 = vadd.f32 %v6309_v16, %v2712_v27  ;;  %v3229_v9 = vadd.f32 %v3228_v41, %v2974_v35  ;;  %v4334_v7 = vmin.f32 %v4333_v26, %v6294_v8  ;;  %v4414_v29 = vmin.f32 %v4413_v32, %v6120_v31 }
 0x1aa   : > { %v6393_v57 = vpop.f32.mrf.mxu1  ;;  %v3696_v48 = vmax.f32 %v3695_v5, %v6133_v62  ;;  %v3622_v47 = vmax.f32 %v6318_v18, %v6337_v4  ;;  %v4341_v60 = vmin.f32 %v6318_v18, %v6337_v4  ;;  %v2976_v37 = vmul.f32 %v6327_v56, %v6327_v56 }
 0x1ab   : > { %7836 = vst [vmem:[#allocation44_spill] sm:$0xff] %v6393_v57  ;;  %v6397_v33 = vpop.f32.mrf.mxu0  ;;  %v3230_v40 = vadd.f32 %v3229_v9, %v2975_v13  ;;  %v3690_v41 = vrot.slane %v3689_v45, 2  ;;  %v3616_v8 = vrot.slane %v3615_v2, 4  ;;  %v2714_v58 = vadd.f32 %v6327_v56, %v2713_v28 }
 0x1ac   : > { %v6404_v27 = vpop.f32.mrf.mxu1  ;;  %v4409_v32 = vrot.slane %v4408_v36, 2  ;;  %v4335_v5 = vrot.slane %v4334_v7, 4  ;;  %v4415_v35 = vmin.f32 %v4414_v29, %v6133_v62  ;;  %v3697_v57 = vrot.slane %v3696_v48, 4 }
 0x1ad   : > { %7837 = vst [vmem:[#allocation45_spill] sm:$0xff] %v6404_v27  ;;  %v3231_v13 = vadd.f32 %v3230_v40, %v2976_v37  ;;  %v6412_v9 = vpop.f32.mrf.mxu0  ;;  %v3623_v18 = vmax.f32 %v3622_v47, %v6309_v16  ;;  %v4342_v4 = vmin.f32 %v4341_v60, %v6309_v16  ;;  %v2977_v21 = vmul.f32 %v6357_v22, %v6357_v22 }
 0x1ae   : > { %v6409_v26 = vpop.f32.mrf.mxu1  ;;  %v6422_v28 = vmul.f32 %v6084_v44, %v6084_v44  ;;  %v6426_v29 = vmul.f32 %v6091_v50, %v6091_v50  ;;  %v6430_v40 = vmul.f32 %v6101_v0, %v6101_v0  ;;  %v2715_v47 = vadd.f32 %v2714_v58, %v6357_v22 }
 0x1af   : > { %7838 = vst [vmem:[#allocation46_spill] sm:$0xff] %v6409_v26  ;;  %v3691_v16 = vmax.f32 %v3689_v45, %v3690_v41  ;;  %v3617_v60 = vmax.f32 %v3615_v2, %v3616_v8  ;;  %v3232_v37 = vadd.f32 %v3231_v13, %v2977_v21  ;;  %v3703_v26 = vmax.f32 %v6152_v59, %v6161_v42  ;;  %v6441_v55 = vpop.f32.mrf.mxu0 }
 0x1b0   : > { %v6418_v54 = vpop.f32.mrf.mxu1  ;;  %v6439_v27 = vmul.f32 %v6105_v12, %v6105_v12  ;;  %v4410_v61 = vmin.f32 %v4408_v36, %v4409_v32  ;;  %v4336_v39 = vmin.f32 %v4334_v7, %v4335_v5  ;;  %v4416_v53 = vrot.slane %v4415_v35, 4 }
 0x1b1   : > { %7839 = vst [vmem:[#allocation47_spill] sm:$0xff] %v6418_v54  ;;  %v3698_v1 = vmax.f32 %v3696_v48, %v3697_v57  ;;  %v3624_v58 = vmax.f32 %v3623_v18, %v6327_v56  ;;  %v4343_v45 = vmin.f32 %v4342_v4, %v6327_v56  ;;  %v2978_v21 = vmul.f32 %v6382_v30, %v6382_v30 }
 0x1b2   : > { %v6435_v54 = vpop.f32.mrf.mxu1  ;;  %v6451_v41 = vmul.f32 %v6120_v31, %v6120_v31  ;;  %v6455_v36 = vmul.f32 %v6125_v52, %v6125_v52  ;;  %v4422_v57 = vmin.f32 %v6152_v59, %v6161_v42  ;;  %v2716_v7 = vadd.f32 %v2715_v47, %v6382_v30 }
 0x1b3   : > { %7840 = vst [vmem:[#allocation48_spill] sm:$0xff] %v6435_v54  ;;  %v3692_v48 = vrot.slane %v3691_v16, 1  ;;  %v3618_v56 = vrot.slane %v3617_v60, 2  ;;  %v3704_v8 = vmax.f32 %v3703_v26, %v6150_v38  ;;  %v3233_v32 = vadd.f32 %v3232_v37, %v2978_v21 }
 0x1b4   : > { %v6447_v2 = vpop.f32.mrf.mxu1  ;;  %7842 = vst [vmem:[#allocation50_spill] sm:$0xff] %v6451_v41  ;;  %v4337_v13 = vrot.slane %v4336_v39, 2  ;;  %v4417_v18 = vmin.f32 %v4415_v35, %v4416_v53  ;;  %v2979_v4 = vmul.f32 %v6344_v49, %v6344_v49  ;;  %v3631_v54 = vmax.f32 %v6357_v22, %v6382_v30 }
 0x1b5   : > { %7841 = vst [vmem:[#allocation49_spill] sm:$0xff] %v6447_v2  ;;  %v6467_v2 = vpop.f32.mrf.mxu0  ;;  %v4411_v46 = vrot.slane %v4410_v61, 1  ;;  %v3699_v17 = vrot.slane %v3698_v1, 2  ;;  %v3625_v47 = vrot.slane %v3624_v58, 4  ;;  %v4344_v6 = vrot.slane %v4343_v45, 4 }
 0x1b6   : > { %v6461_v5 = vpop.f32.mrf.mxu1  ;;  %v6473_v26 = vmul.f32 %v6133_v62, %v6133_v62  ;;  %v4423_v53 = vmin.f32 %v4422_v57, %v6150_v38  ;;  %v2717_v35 = vadd.f32 %v6344_v49, %v2716_v7  ;;  %v3234_v37 = vadd.f32 %v3233_v32, %v2979_v4 }
 0x1b7   : > { %7843 = vst [vmem:[#allocation51_spill] sm:$0xff] %v6461_v5  ;;  %v3619_v21 = vmax.f32 %v3617_v60, %v3618_v56  ;;  %v6479_v5 = vmul.f32 %v6145_v10, %v6145_v10  ;;  %v3705_v42 = vmax.f32 %v3704_v8, %v6155_v20  ;;  %v3632_v59 = vmax.f32 %v3631_v54, %v6344_v49  ;;  %v6489_v7 = vpop.f32.mrf.mxu0 }
 0x1b8   : > { %v6469_v43 = vpop.f32.mrf.mxu1  ;;  %7845 = vst [vmem:[#allocation53_spill] sm:$0xff] %v6473_v26  ;;  %v4338_v62 = vmin.f32 %v4336_v39, %v4337_v13  ;;  %v4418_v26 = vrot.slane %v4417_v18, 2  ;;  %v2980_v57 = vmul.f32 %v6369_v23, %v6369_v23  ;;  %v6491_v60 = vmin.f32 %v4410_v61, %v4411_v46 }
 0x1b9   : > { %7844 = vst [vmem:[#allocation52_spill] sm:$0xff] %v6469_v43  ;;  %7846 = vst [vmem:[#allocation54_spill] sm:$0xff] %v6479_v5  ;;  %v6485_v43 = vmax.f32 %v3691_v16, %v3692_v48  ;;  %v3700_v56 = vmax.f32 %v3698_v1, %v3699_v17  ;;  %v3626_v32 = vmax.f32 %v3624_v58, %v3625_v47  ;;  %v3620_v8 = vrot.slane %v3619_v21, 1  ;;  %v6507_v58 = vpop.f32.mrf.mxu0 }
 0x1ba   : > { %v6483_v41 = vpop.f32.mrf.mxu1  ;;  %v4345_v4 = vmin.f32 %v4343_v45, %v4344_v6  ;;  %v4424_v54 = vmin.f32 %v4423_v53, %v6155_v20  ;;  %v4350_v16 = vmin.f32 %v6357_v22, %v6382_v30  ;;  %v2718_v39 = vadd.f32 %v6369_v23, %v2717_v35 }
 0x1bb   : > { %7847 = vst [vmem:[#allocation55_spill] sm:$0xff] %v6483_v41  ;;  %v3235_v48 = vadd.f32 %v3234_v37, %v2980_v57  ;;  %v3706_v13 = vrot.slane %v3705_v42, 4  ;;  %v3633_v41 = vmax.f32 %v3632_v59, %v6369_v23  ;;  %v2981_v46 = vmul.f32 %v6412_v9, %v6412_v9 }
 0x1bc   : > { %v6493_v5 = vpop.f32.mrf.mxu1  ;;  %v4339_v1 = vrot.slane %v4338_v62, 1  ;;  %v4419_v17 = vmin.f32 %v4417_v18, %v4418_v26  ;;  %v6504_v6 = vmul.f32 %v6150_v38, %v6150_v38  ;;  %v2719_v61 = vadd.f32 %v2718_v39, %v6412_v9 }
 0x1bd   : > { %7848 = vst [vmem:[#allocation56_spill] sm:$0xff] %v6493_v5  ;;  %v3701_v22 = vrot.slane %v3700_v56, 1  ;;  %v3627_v30 = vrot.slane %v3626_v32, 2  ;;  %v4346_v45 = vrot.slane %v4345_v4, 2  ;;  %v3236_v47 = vadd.f32 %v3235_v48, %v2981_v46 }
 0x1be   : > { %7849 = vst [vmem:[#allocation57_spill] sm:$0xff] %v6504_v6  ;;  %v6509_v53 = vpop.f32.mrf.mxu1  ;;  %v4425_v59 = vrot.slane %v4424_v54, 4  ;;  %v4351_v35 = vmin.f32 %v4350_v16, %v6344_v49  ;;  %v3712_v18 = vmax.f32 %v6167_v14, %v6174_v51  ;;  %v4431_v26 = vmin.f32 %v6167_v14, %v6174_v51  ;;  %v6523_v16 = vpop.f32.mrf.mxu0 }
 0x1bf   : > { %7850 = vst [vmem:[#allocation58_spill] sm:$0xff] %v6509_v53  ;;  %v3707_v37 = vmax.f32 %v3705_v42, %v3706_v13  ;;  %v3634_v57 = vrot.slane %v3633_v41, 4  ;;  %v2720_v39 = vadd.f32 %v2719_v61, %v6467_v2  ;;  %v2982_v5 = vmul.f32 %v6467_v2, %v6467_v2 }
 0x1c0   : > { %v6519_v6 = vpop.f32.mrf.mxu1  ;;  %v3621_v48 = vmax.f32 %v3619_v21, %v3620_v8  ;;  %v4420_v46 = vrot.slane %v4419_v17, 1  ;;  %v3713_v53 = vmax.f32 %v3712_v18, %v6164_v3  ;;  %v4432_v49 = vmin.f32 %v4431_v26, %v6164_v3 }
 0x1c1   : > { %7851 = vst [vmem:[#allocation59_spill] sm:$0xff] %v6519_v6  ;;  %v3702_v38 = vmax.f32 %v3700_v56, %v3701_v22  ;;  %v3628_v20 = vmax.f32 %v3626_v32, %v3627_v30  ;;  %v4347_v51 = vmin.f32 %v4345_v4, %v4346_v45  ;;  %v3237_v42 = vadd.f32 %v3236_v47, %v2982_v5 }
 0x1c2   : > { %v4426_v13 = vmin.f32 %v4424_v54, %v4425_v59  ;;  %v4352_v61 = vmin.f32 %v4351_v35, %v6369_v23  ;;  %v2983_v14 = vmul.f32 %v6397_v33, %v6397_v33  ;;  %v3640_v21 = vmax.f32 %v6412_v9, %v6467_v2  ;;  %v6533_v56 = vpop.f32.mrf.mxu1  ;;  %v6538_v54 = vpop.f32.mrf.mxu0 }
 0x1c3   : > { %v3708_v8 = vrot.slane %v3707_v37, 2  ;;  %v3635_v6 = vmax.f32 %v3633_v41, %v3634_v57  ;;  %v2721_v18 = vadd.f32 %v6397_v33, %v2720_v39  ;;  %v4359_v26 = vmin.f32 %v6412_v9, %v6467_v2  ;;  %7852 = vst [vmem:[#allocation60_spill] sm:$0xff] %v6533_v56 }
 0x1c4   : > { %v3714_v5 = vmax.f32 %v3713_v53, %v6169_v25  ;;  %v4433_v32 = vmin.f32 %v4432_v49, %v6169_v25  ;;  %v3238_v23 = vadd.f32 %v3237_v42, %v2983_v14  ;;  %v3641_v4 = vmax.f32 %v3640_v21, %v6397_v33  ;;  %v6553_v49 = vpop.f32.mrf.mxu0 }
 0x1c5   : > { %v6540_v22 = vmin.f32 %v4338_v62, %v4339_v1  ;;  %v4421_v30 = vmin.f32 %v4419_v17, %v4420_v46  ;;  %v3629_v41 = vrot.slane %v3628_v20, 1  ;;  %v4348_v45 = vrot.slane %v4347_v51, 1  ;;  %v6550_v62 = vpop.f32.mrf.mxu1 }
 0x1c6   : > { %v4427_v47 = vrot.slane %v4426_v13, 2  ;;  %v4353_v59 = vrot.slane %v4352_v61, 4  ;;  %v2984_v9 = vmul.f32 %v6441_v55, %v6441_v55  ;;  %v4360_v2 = vmin.f32 %v4359_v26, %v6397_v33  ;;  %7853 = vst [vmem:[#allocation61_spill] sm:$0xff] %v6550_v62 }
 0x1c7   : > { %v6547_v53 = vsel %vm4037_vm2, %v3702_v38, %v6485_v43  ;;  %v3709_v14 = vmax.f32 %v3707_v37, %v3708_v8  ;;  %v3636_v35 = vrot.slane %v3635_v6, 2  ;;  %v2722_v57 = vadd.f32 %v6441_v55, %v2721_v18  ;;  %v6565_v56 = vpop.f32.mrf.mxu1 }
 0x1c8   : > { %v3715_v1 = vrot.slane %v3714_v5, 4  ;;  %v4434_v17 = vrot.slane %v4433_v32, 4  ;;  %v3642_v39 = vmax.f32 %v3641_v4, %v6441_v55  ;;  %v3239_v46 = vadd.f32 %v3238_v23, %v2984_v9  ;;  %7854 = vst [vmem:[#allocation62_spill] sm:$0xff] %v6565_v56 }
 0x1c9   : > { %v6557_v33 = vsel %vm4037_vm2, %v4421_v30, %v6491_v60  ;;  %v3630_v42 = vmax.f32 %v3628_v20, %v3629_v41  ;;  %v2723_v38 = vadd.f32 %v2722_v57, %v6507_v58  ;;  %v2985_v43 = vmul.f32 %v6507_v58, %v6507_v58  ;;  %v6569_v57 = vpop.f32.mrf.mxu0 }
 0x1ca   : > { %v4349_v37 = vmin.f32 %v4347_v51, %v4348_v45  ;;  %v4428_v21 = vmin.f32 %v4426_v13, %v4427_v47  ;;  %v4354_v8 = vmin.f32 %v4352_v61, %v4353_v59  ;;  %v4361_v18 = vmin.f32 %v4360_v2, %v6441_v55 }
 0x1cb   : > { %v3710_v26 = vrot.slane %v3709_v14, 1  ;;  %v3637_v4 = vmax.f32 %v3635_v6, %v3636_v35  ;;  %v3240_v23 = vadd.f32 %v3239_v46, %v2985_v43  ;;  %v3721_v9 = vmax.f32 %v6186_v34, %v6195_v11 }
 0x1cc   : > { %v3716_v60 = vmax.f32 %v3714_v5, %v3715_v1  ;;  %v4435_v20 = vmin.f32 %v4433_v32, %v4434_v17  ;;  %v3643_v30 = vrot.slane %v3642_v39, 4  ;;  %v4440_v41 = vmin.f32 %v6186_v34, %v6195_v11  ;;  %v6578_v1 = vpop.f32.mrf.mxu1 }
 0x1cd   : > { %v4065_v51 = vsel %vm4037_vm2, %v3630_v42, %v3621_v48  ;;  %v3722_v55 = vmax.f32 %v3721_v9, %v6180_v15  ;;  %v2724_v6 = vadd.f32 %v2723_v38, %v6538_v54  ;;  %v2986_v13 = vmul.f32 %v6538_v54, %v6538_v54  ;;  %7855 = vst [vmem:[#allocation63_spill] sm:$0xff] %v6578_v1  ;;  %v6581_v38 = vpop.f32.mrf.mxu0 }
 0x1ce   : > { %v4429_v61 = vrot.slane %v4428_v21, 1  ;;  %v4355_v45 = vrot.slane %v4354_v8, 2  ;;  %v4362_v47 = vrot.slane %v4361_v18, 4  ;;  %v4441_v5 = vmin.f32 %v4440_v41, %v6180_v15  ;;  %v6591_v1 = vpop.f32.mrf.mxu1 }
 0x1cf   : > { %v3711_v32 = vmax.f32 %v3709_v14, %v3710_v26  ;;  %v3638_v59 = vrot.slane %v3637_v4, 1  ;;  %v3723_v2 = vmax.f32 %v3722_v55, %v6189_v63  ;;  %v3241_v35 = vadd.f32 %v3240_v23, %v2986_v13  ;;  %7856 = vst [vmem:[#allocation64_spill] sm:$0xff] %v6591_v1 }
 0x1d0   : > { %v3717_v48 = vrot.slane %v3716_v60, 2  ;;  %v4436_v17 = vrot.slane %v4435_v20, 2  ;;  %v3644_v46 = vmax.f32 %v3642_v39, %v3643_v30  ;;  %v4442_v42 = vmin.f32 %v4441_v5, %v6189_v63 }
 0x1d1   : > { %v2987_v43 = vmul.f32 %v6489_v7, %v6489_v7  ;;  %v3724_v9 = vrot.slane %v3723_v2, 4  ;;  %v2725_v41 = vadd.f32 %v6489_v7, %v2724_v6  ;;  %v3649_v14 = vmax.f32 %v6507_v58, %v6538_v54 }
 0x1d2   : > { %v4430_v26 = vmin.f32 %v4428_v21, %v4429_v61  ;;  %v4356_v23 = vmin.f32 %v4354_v8, %v4355_v45  ;;  %v4363_v55 = vmin.f32 %v4361_v18, %v4362_v47  ;;  %v4368_v13 = vmin.f32 %v6507_v58, %v6538_v54  ;;  %v2056_v21 = vpop.f32.mrf.mxu0 }
 0x1d3   : > { %v3639_v39 = vmax.f32 %v3637_v4, %v3638_v59  ;;  %v4443_v30 = vrot.slane %v4442_v42, 4  ;;  %v3242_v5 = vadd.f32 %v3241_v35, %v2987_v43  ;;  %v3650_v56 = vmax.f32 %v3649_v14, %v6489_v7 }
 0x1d4   : > { %v6595_v62 = vsel %vm4037_vm2, %v4349_v37, %v6540_v22  ;;  %v3718_v6 = vmax.f32 %v3716_v60, %v3717_v48  ;;  %v4437_v11 = vmin.f32 %v4435_v20, %v4436_v17  ;;  %v3645_v63 = vrot.slane %v3644_v46, 2 }
 0x1d5   : > { %v2988_v8 = vmul.f32 %v6523_v16, %v6523_v16  ;;  %v3725_v18 = vmax.f32 %v3723_v2, %v3724_v9  ;;  %v4369_v58 = vmin.f32 %v4368_v13, %v6489_v7  ;;  %v2726_v54 = vadd.f32 %v6523_v16, %v2725_v41  ;;  %v6613_v7 = vpop.f32.mrf.mxu1  ;;  %v7858_v41 = vld [vmem:[#allocation11_spill] sm:$0xff] }
 0x1d6   : > { %v6603_v4 = vsel %vm4039_vm3, %v3711_v32, %v6547_v53  ;;  %v4357_v61 = vrot.slane %v4356_v23, 1  ;;  %v4364_v45 = vrot.slane %v4363_v55, 2  ;;  %v3651_v22 = vmax.f32 %v3650_v56, %v6523_v16  ;;  %7857 = vst [vmem:[#allocation65_spill] sm:$0xff] %v6613_v7  ;;  %v6616_v32 = vpop.f32.mrf.mxu0 }
 0x1d7   : > { %v6608_v37 = vsel %vm4039_vm3, %v4430_v26, %v6557_v33  ;;  %v6611_v60 = vsel %vm4039_vm3, %v3639_v39, %v4065_v51  ;;  %v4444_v20 = vmin.f32 %v4442_v42, %v4443_v30  ;;  %v3243_v47 = vadd.f32 %v3242_v5, %v2988_v8  ;;  %v6626_v13 = vpop.f32.mrf.mxu1 }
 0x1d8   : > { %v3719_v59 = vrot.slane %v3718_v6, 1  ;;  %v4438_v2 = vrot.slane %v4437_v11, 1  ;;  %v3646_v35 = vmax.f32 %v3644_v46, %v3645_v63  ;;  %v2727_v53 = vadd.f32 %v2726_v54, %v6569_v57  ;;  %7859 = vst [vmem:[#allocation11_spill] sm:$0xff] %v6626_v13  ;;  %v6629_v8 = vpop.f32.mrf.mxu0  ;;  %v7860_v54 = vld [vmem:[#allocation12_spill] sm:$0xff] }
 0x1d9   : > { %v3726_v48 = vrot.slane %v3725_v18, 2  ;;  %v4370_v56 = vmin.f32 %v4369_v58, %v6523_v16  ;;  %v2989_v33 = vmul.f32 %v6569_v57, %v6569_v57  ;;  %v3730_v51 = vmax.f32 %v6206_v24, %v6222_v19 }
 0x1da   : > { %v4358_v17 = vmin.f32 %v4356_v23, %v4357_v61  ;;  %v4365_v42 = vmin.f32 %v4363_v55, %v4364_v45  ;;  %v3652_v43 = vrot.slane %v3651_v22, 4  ;;  %v4449_v9 = vmin.f32 %v6206_v24, %v6222_v19 }
 0x1db   : > { %v4445_v63 = vrot.slane %v4444_v20, 2  ;;  %v3244_v46 = vadd.f32 %v3243_v47, %v2989_v33  ;;  %v3731_v14 = vmax.f32 %v3730_v51, %v7858_v41  ;;  %v2990_v26 = vmul.f32 %v2056_v21, %v2056_v21 }
 0x1dc   : > { %v3720_v16 = vmax.f32 %v3718_v6, %v3719_v59  ;;  %v4439_v39 = vmin.f32 %v4437_v11, %v4438_v2  ;;  %v4450_v30 = vmin.f32 %v4449_v9, %v7858_v41  ;;  %v2728_v5 = vadd.f32 %v2727_v53, %v2056_v21  ;;  %v6635_v59 = vpop.f32.mrf.mxu1 }
 0x1dd   : > { %v3647_v23 = vrot.slane %v3646_v35, 1  ;;  %v3727_v55 = vmax.f32 %v3725_v18, %v3726_v48  ;;  %v4371_v58 = vrot.slane %v4370_v56, 4  ;;  %v3732_v61 = vmax.f32 %v3731_v14, %v7860_v54  ;;  %7861 = vst [vmem:[#allocation12_spill] sm:$0xff] %v6635_v59 }
 0x1de   : > { %v4366_v45 = vrot.slane %v4365_v42, 1  ;;  %v3653_v1 = vmax.f32 %v3651_v22, %v3652_v43  ;;  %v4451_v47 = vmin.f32 %v4450_v30, %v7860_v54  ;;  %v3658_v33 = vmax.f32 %v6569_v57, %v2056_v21  ;;  %v6641_v22 = vpop.f32.mrf.mxu0  ;;  %v6645_v19 = vpop.f32.mrf.mxu1 }
 0x1df   : > { %v4446_v51 = vmin.f32 %v4444_v20, %v4445_v63  ;;  %v3733_v13 = vrot.slane %v3732_v61, 4  ;;  %v3245_v6 = vadd.f32 %v3244_v46, %v2990_v26  ;;  %v4377_v11 = vmin.f32 %v6569_v57, %v2056_v21  ;;  %7862 = vst [vmem:[#allocation66_spill] sm:$0xff] %v6645_v19 }
 0x1e0   : > { %v2991_v2 = vmul.f32 %v6553_v49, %v6553_v49  ;;  %v4452_v18 = vrot.slane %v4451_v47, 4  ;;  %v2729_v53 = vadd.f32 %v6553_v49, %v2728_v5  ;;  %v3659_v48 = vmax.f32 %v3658_v33, %v6553_v49 }
 0x1e1   : > { %v3728_v43 = vrot.slane %v3727_v55, 1  ;;  %v4372_v9 = vmin.f32 %v4370_v56, %v4371_v58  ;;  %v3734_v14 = vmax.f32 %v3732_v61, %v3733_v13  ;;  %v4378_v20 = vmin.f32 %v4377_v11, %v6553_v49 }
 0x1e2   : > { %v3648_v63 = vmax.f32 %v3646_v35, %v3647_v23  ;;  %v3654_v46 = vrot.slane %v3653_v1, 2  ;;  %v4453_v57 = vmin.f32 %v4451_v47, %v4452_v18  ;;  %v3660_v21 = vmax.f32 %v3659_v48, %v6581_v38  ;;  %v2072_v35 = vpop.f32.mrf.mxu0  ;;  %v7865_v18 = vld [vmem:[#allocation15_spill] sm:$0xff] }
 0x1e3   : > { %v4367_v26 = vmin.f32 %v4365_v42, %v4366_v45  ;;  %v4447_v30 = vrot.slane %v4446_v51, 1  ;;  %v3735_v59 = vrot.slane %v3734_v14, 2  ;;  %v3246_v7 = vadd.f32 %v3245_v6, %v2991_v2  ;;  %v6664_v6 = vpop.f32.mrf.mxu1  ;;  %v7864_v2 = vld [vmem:[#allocation17_spill] sm:$0xff] }
 0x1e4   : > { %v4778_v5 = vsel %vm4039_vm3, %v4358_v17, %v6595_v62  ;;  %v4074_v56 = vsel %vm4041_vm4, %v3720_v16, %v6603_v4  ;;  %v4379_v13 = vmin.f32 %v4378_v20, %v6581_v38  ;;  %v2730_v49 = vadd.f32 %v6581_v38, %v2729_v53  ;;  %7863 = vst [vmem:[#allocation67_spill] sm:$0xff] %v6664_v6 }
 0x1e5   : > { %v3729_v23 = vmax.f32 %v3727_v55, %v3728_v43  ;;  %v4373_v58 = vrot.slane %v4372_v9, 2  ;;  %v2992_v42 = vmul.f32 %v6581_v38, %v6581_v38  ;;  %v4454_v61 = vrot.slane %v4453_v57, 2  ;;  %v7866_v43 = vld [vmem:[#allocation14_spill] sm:$0xff] }
 0x1e6   : > { %v6657_v45 = vsel %vm4041_vm4, %v3648_v63, %v6611_v60  ;;  %v4786_v62 = vsel %vm4041_vm4, %v4439_v39, %v6608_v37  ;;  %v3655_v17 = vmax.f32 %v3653_v1, %v3654_v46  ;;  %v3661_v4 = vrot.slane %v3660_v21, 4  ;;  %v6671_v37 = vpop.f32.mrf.mxu0 }
 0x1e7   : > { %v6662_v16 = vsel %vm4041_vm4, %v4367_v26, %v4778_v5  ;;  %v4448_v47 = vmin.f32 %v4446_v51, %v4447_v30  ;;  %v3736_v33 = vmax.f32 %v3734_v14, %v3735_v59  ;;  %v3247_v55 = vadd.f32 %v3246_v7, %v2992_v42  ;;  %v6679_v5 = vpop.f32.mrf.mxu1 }
 0x1e8   : > { %v4380_v11 = vrot.slane %v4379_v13, 4  ;;  %v2731_v38 = vadd.f32 %v2730_v49, %v6629_v8  ;;  %v3739_v60 = vmax.f32 %v7865_v18, %v7864_v2  ;;  %v4458_v53 = vmin.f32 %v7865_v18, %v7864_v2  ;;  %7867 = vst [vmem:[#allocation15_spill] sm:$0xff] %v6679_v5 }
 0x1e9   : > { %v4075_v1 = vsel %vm4043_vm5, %v3729_v23, %v4074_v56  ;;  %v4374_v39 = vmin.f32 %v4372_v9, %v4373_v58  ;;  %v4455_v48 = vmin.f32 %v4453_v57, %v4454_v61  ;;  %v2993_v7 = vmul.f32 %v6629_v8, %v6629_v8  ;;  %v7868_v56 = vld [vmem:[#allocation16_spill] sm:$0xff]  ;;  %v6683_v58 = vpop.f32.mrf.mxu0 }
 0x1ea   : > { %v3656_v51 = vrot.slane %v3655_v17, 1  ;;  %v3662_v59 = vmax.f32 %v3660_v21, %v3661_v4  ;;  %v3740_v14 = vmax.f32 %v3739_v60, %v7866_v43  ;;  %v4459_v20 = vmin.f32 %v4458_v53, %v7866_v43 }
 0x1eb   : > { %v4787_v63 = vsel %vm4043_vm5, %v4448_v47, %v4786_v62  ;;  %v3737_v46 = vrot.slane %v3736_v33, 1  ;;  %v3248_v26 = vadd.f32 %v3247_v55, %v2993_v7  ;;  %v2994_v30 = vmul.f32 %v2072_v35, %v2072_v35  ;;  %v6694_v6 = vpop.f32.mrf.mxu0 }
 0x1ec   : > { %v4381_v49 = vmin.f32 %v4379_v13, %v4380_v11  ;;  %v3741_v9 = vmax.f32 %v3740_v14, %v7868_v56  ;;  %v4460_v57 = vmin.f32 %v4459_v20, %v7868_v56  ;;  %v2732_v23 = vadd.f32 %v2731_v38, %v2072_v35  ;;  %v6691_v38 = vpop.f32.mrf.mxu1 }
 0x1ed   : > { %v4375_v21 = vrot.slane %v4374_v39, 1  ;;  %v4456_v42 = vrot.slane %v4455_v48, 1  ;;  %v3667_v61 = vmax.f32 %v6629_v8, %v2072_v35  ;;  %v4386_v4 = vmin.f32 %v6629_v8, %v2072_v35  ;;  %7869 = vst [vmem:[#allocation14_spill] sm:$0xff] %v6691_v38 }
 0x1ee   : > { %v6687_v62 = vmax.f32 %v3655_v17, %v3656_v51  ;;  %v3663_v47 = vrot.slane %v3662_v59, 2  ;;  %v3742_v55 = vrot.slane %v3741_v9, 4  ;;  %v4461_v60 = vrot.slane %v4460_v57, 4 }
 0x1ef   : > { %v3738_v53 = vmax.f32 %v3736_v33, %v3737_v46  ;;  %v3249_v13 = vadd.f32 %v3248_v26, %v2994_v30  ;;  %v3668_v11 = vmax.f32 %v3667_v61, %v6616_v32  ;;  %v4387_v7 = vmin.f32 %v4386_v4, %v6616_v32  ;;  %v7870_v61 = vld [vmem:[#allocation21_spill] sm:$0xff]  ;;  %v6708_v4 = vpop.f32.mrf.mxu1 }
 0x1f0   : > { %v4382_v14 = vrot.slane %v4381_v49, 2  ;;  %v3743_v20 = vmax.f32 %v3741_v9, %v3742_v55  ;;  %v4462_v5 = vmin.f32 %v4460_v57, %v4461_v60  ;;  %v2733_v19 = vadd.f32 %v6616_v32, %v2732_v23  ;;  %7872 = vst [vmem:[#allocation68_spill] sm:$0xff] %v6708_v4 }
 0x1f1   : > { %v4457_v8 = vmin.f32 %v4455_v48, %v4456_v42  ;;  %v2995_v35 = vmul.f32 %v6616_v32, %v6616_v32  ;;  %v3669_v17 = vmax.f32 %v3668_v11, %v6641_v22  ;;  %v4388_v33 = vmin.f32 %v4387_v7, %v6641_v22  ;;  %v7871_v48 = vld [vmem:[#allocation19_spill] sm:$0xff]  ;;  %v7873_v11 = vld [vmem:[#allocation18_spill] sm:$0xff] }
 0x1f2   : > { %v6700_v51 = vmin.f32 %v4374_v39, %v4375_v21  ;;  %v2996_v46 = vmul.f32 %v6641_v22, %v6641_v22  ;;  %v3744_v26 = vrot.slane %v3743_v20, 2  ;;  %v4463_v30 = vrot.slane %v4462_v5, 2  ;;  %v2088_v21 = vpop.f32.mrf.mxu0 }
 0x1f3   : > { %v6704_v9 = vmax.f32 %v3662_v59, %v3663_v47  ;;  %v3250_v57 = vadd.f32 %v3249_v13, %v2995_v35  ;;  %v3670_v23 = vrot.slane %v3669_v17, 4  ;;  %v3748_v42 = vmax.f32 %v7871_v48, %v7870_v61 }
 0x1f4   : > { %v4076_v32 = vsel %vm4045_vm6, %v3738_v53, %v4075_v1  ;;  %v6711_v55 = vmin.f32 %v4381_v49, %v4382_v14  ;;  %v4467_v39 = vmin.f32 %v7871_v48, %v7870_v61  ;;  %v2734_v60 = vadd.f32 %v6641_v22, %v2733_v19  ;;  %v7874_v14 = vld [vmem:[#allocation20_spill] sm:$0xff]  ;;  %v6723_v19 = vpop.f32.mrf.mxu1 }
 0x1f5   : > { %v4788_v59 = vsel %vm4045_vm6, %v4457_v8, %v4787_v63  ;;  %v3745_v47 = vmax.f32 %v3743_v20, %v3744_v26  ;;  %v4389_v13 = vrot.slane %v4388_v33, 4  ;;  %v3749_v7 = vmax.f32 %v3748_v42, %v7873_v11  ;;  %7875 = vst [vmem:[#allocation69_spill] sm:$0xff] %v6723_v19 }
 0x1f6   : > { %v4464_v35 = vmin.f32 %v4462_v5, %v4463_v30  ;;  %v2997_v4 = vmul.f32 %v6683_v58, %v6683_v58  ;;  %v4468_v1 = vmin.f32 %v4467_v39, %v7873_v11  ;;  %v2735_v49 = vadd.f32 %v2734_v60, %v6683_v58  ;;  %v6733_v19 = vpop.f32.mrf.mxu1 }
 0x1f7   : > { %v3671_v53 = vmax.f32 %v3669_v17, %v3670_v23  ;;  %v3750_v38 = vmax.f32 %v3749_v7, %v7874_v14  ;;  %v2998_v61 = vmul.f32 %v2088_v21, %v2088_v21  ;;  %v3251_v48 = vadd.f32 %v3250_v57, %v2996_v46  ;;  %7876 = vst [vmem:[#allocation70_spill] sm:$0xff] %v6733_v19 }
 0x1f8   : > { %v3665_v22 = vrot.slane %v6704_v9, 1  ;;  %v4469_v5 = vmin.f32 %v4468_v1, %v7874_v14  ;;  %v2736_v20 = vadd.f32 %v2735_v49, %v2088_v21  ;;  %v3746_v8 = vrot.slane %v3745_v47, 1 }
 0x1f9   : > { %v4390_v26 = vmin.f32 %v4388_v33, %v4389_v13  ;;  %v3751_v30 = vrot.slane %v3750_v38, 4  ;;  %v3252_v42 = vadd.f32 %v3251_v48, %v2997_v4  ;;  %v2999_v17 = vmul.f32 %v6671_v37, %v6671_v37 }
 0x1fa   : > { %v3000_v23 = vmul.f32 %v6694_v6, %v6694_v6  ;;  %v4470_v46 = vrot.slane %v4469_v5, 4  ;;  %v2737_v57 = vadd.f32 %v6671_v37, %v2736_v20  ;;  %v4465_v39 = vrot.slane %v4464_v35, 1 }
 0x1fb   : > { %v3672_v60 = vrot.slane %v3671_v53, 2  ;;  %v3752_v7 = vmax.f32 %v3750_v38, %v3751_v30  ;;  %v3253_v63 = vadd.f32 %v3252_v42, %v2998_v61  ;;  %v3676_v48 = vmax.f32 %v6683_v58, %v2088_v21 }
 0x1fc   : > { %v4471_v1 = vmin.f32 %v4469_v5, %v4470_v46  ;;  %v2738_v33 = vadd.f32 %v6694_v6, %v2737_v57  ;;  %v4395_v4 = vmin.f32 %v6683_v58, %v2088_v21  ;;  %v3747_v13 = vmax.f32 %v3745_v47, %v3746_v8  ;;  %v6741_v46 = vpop.f32.mrf.mxu1 }
 0x1fd   : > { %v4391_v49 = vrot.slane %v4390_v26, 2  ;;  %v3753_v14 = vrot.slane %v3752_v7, 2  ;;  %v3254_v11 = vadd.f32 %v3253_v63, %v2999_v17  ;;  %v3677_v56 = vmax.f32 %v3676_v48, %v6671_v37  ;;  %7877 = vst [vmem:[#allocation71_spill] sm:$0xff] %v6741_v46 }
 0x1fe   : > { %v4472_v2 = vrot.slane %v4471_v1, 2  ;;  %v2739_v20 = vadd.f32 %v2738_v33, %v6091_v50  ;;  %v4396_v38 = vmin.f32 %v4395_v4, %v6671_v37  ;;  %v4466_v61 = vmin.f32 %v4464_v35, %v4465_v39  ;;  %v7880_v4 = vld [vmem:[#allocation25_spill] sm:$0xff] }
 0x1ff   : > { %v3673_v30 = vmax.f32 %v3671_v53, %v3672_v60  ;;  %v3754_v5 = vmax.f32 %v3752_v7, %v3753_v14  ;;  %v3255_v42 = vadd.f32 %v3254_v11, %v3000_v23  ;;  %v3678_v21 = vmax.f32 %v3677_v56, %v6694_v6 }
 0x200   : > { %v4473_v57 = vmin.f32 %v4471_v1, %v4472_v2  ;;  %v2740_v58 = vadd.f32 %v2739_v20, %v6105_v12  ;;  %v4397_v47 = vmin.f32 %v4396_v38, %v6694_v6  ;;  %v4077_v63 = vsel %vm4047_vm7, %v3747_v13, %v4076_v32  ;;  %v6752_v6 = vpop.f32.mrf.mxu1 }
 0x201   : > { %v4392_v50 = vmin.f32 %v4390_v26, %v4391_v49  ;;  %v3755_v8 = vrot.slane %v3754_v5, 1  ;;  %v3256_v17 = vadd.f32 %v3255_v42, %v6426_v29  ;;  %v3679_v11 = vrot.slane %v3678_v21, 4  ;;  %7878 = vst [vmem:[#allocation72_spill] sm:$0xff] %v6752_v6 }
 0x202   : > { %v4474_v37 = vrot.slane %v4473_v57, 1  ;;  %v2741_v35 = vadd.f32 %v6084_v44, %v2740_v58  ;;  %v4398_v53 = vrot.slane %v4397_v47, 4  ;;  %v3666_v2 = vmax.f32 %v6704_v9, %v3665_v22  ;;  %v6770_v49 = vpop.f32.mrf.mxu1 }
 0x203   : > { %v4789_v12 = vsel %vm4047_vm7, %v4466_v61, %v4788_v59  ;;  %v3756_v14 = vmax.f32 %v3754_v5, %v3755_v8  ;;  %v3257_v56 = vadd.f32 %v3256_v17, %v6439_v27  ;;  %v3680_v29 = vmax.f32 %v3678_v21, %v3679_v11  ;;  %7882 = vst [vmem:[#allocation25_spill] sm:$0xff] %v6770_v49  ;;  %v7889_v11 = vld [vmem:[#allocation50_spill] sm:$0xff] }
 0x204   : > { %v4475_v32 = vmin.f32 %v4473_v57, %v4474_v37  ;;  %v2742_v26 = vadd.f32 %v6101_v0, %v2741_v35  ;;  %v4399_v23 = vmin.f32 %v4397_v47, %v4398_v53  ;;  %v3674_v39 = vrot.slane %v3673_v30, 1  ;;  %v6786_v8 = vpop.f32.mrf.mxu1 }
 0x205   : > { %v4393_v44 = vrot.slane %v4392_v50, 1  ;;  %v4078_v60 = vsel %vm4049_vm8, %v3756_v14, %v4077_v63  ;;  %v3258_v7 = vadd.f32 %v3257_v56, %v6422_v28  ;;  %v3681_v27 = vrot.slane %v3680_v29, 2  ;;  %v7881_v28 = vld [vmem:[#allocation23_spill] sm:$0xff]  ;;  %v7885_v63 = vld [vmem:[#allocation29_spill] sm:$0xff]  ;;  %v7890_v56 = vld [vmem:[#allocation4_spill] sm:$0xff] }
 0x206   : > { %4112 = vst [vmem:[%s6131_s7 + $0x20] sm:$0xff] %v4078_v60  ;;  %v4790_v9 = vsel %vm4049_vm8, %v4475_v32, %v4789_v12  ;;  %v2743_v59 = vadd.f32 %v2742_v26, %v6125_v52  ;;  %v4400_v22 = vrot.slane %v4399_v23, 2  ;;  %v4068_v1 = vsel %vm4043_vm5, %v6687_v62, %v6657_v45  ;;  %7887 = vst [vmem:[#allocation23_spill] sm:$0xff] %v6786_v8  ;;  %v7892_v60 = vld [vmem:[#allocation5_spill] sm:$0xff] }
 0x207   : > { %v7879_v0 = vrot.slane %v6711_v55, 1  ;;  %4824 = vst [vmem:[%s6138_s10 + $0x20] sm:$0xff] %v4790_v9  ;;  %v3259_v48 = vadd.f32 %v3258_v7, %v6430_v40  ;;  %v3757_v13 = vmax.f32 %v7881_v28, %v7880_v4  ;;  %v4780_v52 = vsel %vm4043_vm5, %v6700_v51, %v6662_v16  ;;  %v7883_v16 = vld [vmem:[#allocation54_spill] sm:$0xff]  ;;  %v7893_v9 = vld [vmem:[#allocation53_spill] sm:$0xff] }
 0x208   : > { %v2744_v20 = vadd.f32 %v2743_v59, %v6145_v10  ;;  %v3682_v38 = vmax.f32 %v3680_v29, %v3681_v27  ;;  %v4401_v45 = vmin.f32 %v4399_v23, %v4400_v22  ;;  %v3675_v62 = vmax.f32 %v3673_v30, %v3674_v39  ;;  %v7884_v10 = vld [vmem:[#allocation22_spill] sm:$0xff]  ;;  %v7886_v30 = vld [vmem:[#allocation27_spill] sm:$0xff]  ;;  %v6807_v22 = vpop.f32.mrf.mxu1 }
 0x209   : > { %v4385_v33 = vmin.f32 %v6711_v55, %v7879_v0  ;;  %v4394_v61 = vmin.f32 %v4392_v50, %v4393_v44  ;;  %v3260_v55 = vadd.f32 %v3259_v48, %v6455_v36  ;;  %v4476_v40 = vmin.f32 %v7881_v28, %v7880_v4  ;;  %v7888_v36 = vld [vmem:[#allocation2_spill] sm:$0xff]  ;;  %7894 = vst [vmem:[#allocation54_spill] sm:$0xff] %v6807_v22  ;;  %v7912_v22 = vld [vmem:[#allocation37_spill] sm:$0xff] }
 0x20a   : > { %v4069_v5 = vsel %vm4045_vm6, %v3666_v2, %v4068_v1  ;;  %v2745_v42 = vadd.f32 %v6120_v31, %v2744_v20  ;;  %v3683_v57 = vrot.slane %v3682_v38, 1  ;;  %v4402_v58 = vrot.slane %v4401_v45, 1  ;;  %v7891_v23 = vld [vmem:[#allocation26_spill] sm:$0xff]  ;;  %v7897_v20 = vld [vmem:[#allocation7_spill] sm:$0xff] }
 0x20b   : > { %v4781_v21 = vsel %vm4045_vm6, %v4385_v33, %v4780_v52  ;;  %v3261_v51 = vadd.f32 %v3260_v55, %v7883_v16  ;;  %v3758_v47 = vmax.f32 %v3757_v13, %v7884_v10  ;;  %v3766_v50 = vmax.f32 %v7886_v30, %v7885_v63  ;;  %v7895_v1 = vld [vmem:[#allocation6_spill] sm:$0xff]  ;;  %v7896_v13 = vld [vmem:[#allocation24_spill] sm:$0xff] }
 0x20c   : > { %v2746_v17 = vadd.f32 %v7888_v36, %v2745_v42  ;;  %v3684_v37 = vmax.f32 %v3682_v38, %v3683_v57  ;;  %v4403_v35 = vmin.f32 %v4401_v45, %v4402_v58  ;;  %v4485_v31 = vmin.f32 %v7886_v30, %v7885_v63  ;;  %v7898_v55 = vld [vmem:[#allocation8_spill] sm:$0xff]  ;;  %v7899_v42 = vld [vmem:[#allocation3_spill] sm:$0xff] }
 0x20d   : > { %v3262_v53 = vadd.f32 %v3261_v51, %v7889_v11  ;;  %v4070_v2 = vsel %vm4047_vm7, %v3675_v62, %v4069_v5  ;;  %v4782_v12 = vsel %vm4047_vm7, %v4394_v61, %v4781_v21  ;;  %v4477_v14 = vmin.f32 %v4476_v40, %v7884_v10  ;;  %v7900_v58 = vld [vmem:[#allocation28_spill] sm:$0xff]  ;;  %v7901_v51 = vld [vmem:[#allocation9_spill] sm:$0xff]  ;;  %v7904_v11 = vld [vmem:[#allocation31_spill] sm:$0xff] }
 0x20e   : > { %v2747_v32 = vadd.f32 %v2746_v17, %v7890_v56  ;;  %v4071_v26 = vsel %vm4049_vm8, %v3684_v37, %v4070_v2  ;;  %v4783_v29 = vsel %vm4049_vm8, %v4403_v35, %v4782_v12  ;;  %v3767_v39 = vmax.f32 %v3766_v50, %v7891_v23  ;;  %v6835_v17 = vpop.f32.mrf.mxu1  ;;  %v7905_v12 = vld [vmem:[#allocation10_spill] sm:$0xff] }
 0x20f   : > { %v3009_v44 = vmul.f32 %v7890_v56, %v7890_v56  ;;  %v3012_v7 = vmul.f32 %v7892_v60, %v7892_v60  ;;  %v3263_v59 = vadd.f32 %v3262_v53, %v7893_v9  ;;  %4111 = vst [vmem:[%s6131_s7 + $0x18] sm:$0xff] %v4071_v26  ;;  %4823 = vst [vmem:[%s6138_s10 + $0x18] sm:$0xff] %v4783_v29 }
 0x210   : > { %v4486_v27 = vmin.f32 %v4485_v31, %v7891_v23  ;;  %v3010_v0 = vmul.f32 %v7895_v1, %v7895_v1  ;;  %v3015_v33 = vmul.f32 %v6164_v3, %v6164_v3  ;;  %v2748_v48 = vadd.f32 %v2747_v32, %v7895_v1  ;;  %7902 = vst [vmem:[#allocation22_spill] sm:$0xff] %v6835_v17  ;;  %v7903_v31 = vld [vmem:[#allocation33_spill] sm:$0xff]  ;;  %v7911_v17 = vld [vmem:[#allocation16_spill] sm:$0xff] }
 0x211   : > { %v3759_v52 = vmax.f32 %v3758_v47, %v7896_v13  ;;  %v3013_v38 = vmul.f32 %v7897_v20, %v7897_v20  ;;  %v3016_v45 = vmul.f32 %v6169_v25, %v6169_v25  ;;  %v3264_v62 = vadd.f32 %v3263_v59, %v3009_v44  ;;  %v7906_v32 = vld [vmem:[#allocation57_spill] sm:$0xff] }
 0x212   : > { %v4478_v61 = vmin.f32 %v4477_v14, %v7896_v13  ;;  %v3014_v40 = vmul.f32 %v7898_v55, %v7898_v55  ;;  %v6824_v5 = vmul.f32 %v6180_v15, %v6180_v15  ;;  %v2749_v57 = vadd.f32 %v7899_v42, %v2748_v48  ;;  %v7909_v42 = vld [vmem:[#allocation13_spill] sm:$0xff] }
 0x213   : > { %v3768_v21 = vmax.f32 %v3767_v39, %v7900_v58  ;;  %v3017_v16 = vmul.f32 %v6186_v34, %v6186_v34  ;;  %v6832_v47 = vmul.f32 %v7901_v51, %v7901_v51  ;;  %v3265_v50 = vadd.f32 %v3264_v62, %v3010_v0  ;;  %v6860_v62 = vpop.f32.mrf.mxu1 }
 0x214   : > { %v4487_v36 = vmin.f32 %v4486_v27, %v7900_v58  ;;  %v2750_v37 = vadd.f32 %v7892_v60, %v2749_v57  ;;  %v3760_v35 = vrot.slane %v3759_v52, 4  ;;  %v3775_v53 = vmax.f32 %v7904_v11, %v7903_v31  ;;  %v7907_v60 = vld [vmem:[#allocation30_spill] sm:$0xff]  ;;  %7908 = vst [vmem:[#allocation27_spill] sm:$0xff] %v6860_v62  ;;  %v7913_v62 = vld [vmem:[#allocation35_spill] sm:$0xff] }
 0x215   : > { %v4494_v2 = vmin.f32 %v7904_v11, %v7903_v31  ;;  %v3018_v14 = vmul.f32 %v7905_v12, %v7905_v12  ;;  %v6846_v56 = vmul.f32 %v7858_v41, %v7858_v41  ;;  %v3266_v26 = vadd.f32 %v3265_v50, %v7906_v32  ;;  %v6886_v46 = vpop.f32.mrf.mxu1  ;;  %v7918_v31 = vld [vmem:[#allocation36_spill] sm:$0xff] }
 0x216   : > { %v4479_v29 = vrot.slane %v4478_v61, 4  ;;  %v2751_v39 = vadd.f32 %v2750_v37, %v7897_v20  ;;  %v3769_v44 = vrot.slane %v3768_v21, 4  ;;  %v3776_v9 = vmax.f32 %v3775_v53, %v7907_v60  ;;  %v7910_v37 = vld [vmem:[#allocation32_spill] sm:$0xff]  ;;  %7914 = vst [vmem:[#allocation2_spill] sm:$0xff] %v6886_v46 }
 0x217   : > { %v4495_v59 = vmin.f32 %v4494_v2, %v7907_v60  ;;  %v6854_v27 = vmul.f32 %v6206_v24, %v6206_v24  ;;  %v6858_v1 = vmul.f32 %v7860_v54, %v7860_v54  ;;  %v3267_v0 = vadd.f32 %v3266_v26, %v3012_v7  ;;  %v7921_v11 = vld [vmem:[#allocation20_spill] sm:$0xff] }
 0x218   : > { %v4488_v48 = vrot.slane %v4487_v36, 4  ;;  %v6864_v20 = vmul.f32 %v7909_v42, %v7909_v42  ;;  %v2752_v57 = vadd.f32 %v2751_v39, %v7898_v55  ;;  %v3761_v50 = vmax.f32 %v3759_v52, %v3760_v35 }
 0x219   : > { %v3777_v53 = vmax.f32 %v3776_v9, %v7910_v37  ;;  %v6870_v2 = vmul.f32 %v7866_v43, %v7866_v43  ;;  %v6874_v32 = vmul.f32 %v7865_v18, %v7865_v18  ;;  %v3268_v7 = vadd.f32 %v3267_v0, %v3013_v38  ;;  %v7915_v38 = vld [vmem:[#allocation17_spill] sm:$0xff] }
 0x21a   : > { %v4496_v26 = vmin.f32 %v4495_v59, %v7910_v37  ;;  %v6879_v8 = vmul.f32 %v7911_v17, %v7911_v17  ;;  %v2753_v55 = vadd.f32 %v6164_v3, %v2752_v57  ;;  %v4480_v52 = vmin.f32 %v4478_v61, %v4479_v29 }
 0x21b   : > { %v3770_v35 = vmax.f32 %v3768_v21, %v3769_v44  ;;  %v3269_v39 = vadd.f32 %v3268_v7, %v3014_v40  ;;  %v4489_v9 = vmin.f32 %v4487_v36, %v4488_v48  ;;  %v3784_v6 = vmax.f32 %v7913_v62, %v7912_v22  ;;  %v7916_v40 = vld [vmem:[#allocation34_spill] sm:$0xff] }
 0x21c   : > { %v4503_v19 = vmin.f32 %v7913_v62, %v7912_v22  ;;  %v6890_v59 = vmul.f32 %v7915_v38, %v7915_v38  ;;  %v2754_v0 = vadd.f32 %v6169_v25, %v2753_v55  ;;  %v3762_v49 = vrot.slane %v3761_v50, 2  ;;  %v7917_v44 = vld [vmem:[#allocation18_spill] sm:$0xff] }
 0x21d   : > { %v3778_v3 = vrot.slane %v3777_v53, 4  ;;  %v3270_v61 = vadd.f32 %v3269_v39, %v3015_v33  ;;  %v4497_v21 = vrot.slane %v4496_v26, 4  ;;  %v3785_v36 = vmax.f32 %v3784_v6, %v7916_v40  ;;  %v6902_v33 = vpop.f32.mrf.mxu1  ;;  %v7920_v39 = vld [vmem:[#allocation19_spill] sm:$0xff] }
 0x21e   : > { %v4504_v29 = vmin.f32 %v4503_v19, %v7916_v40  ;;  %v6897_v48 = vmul.f32 %v7917_v44, %v7917_v44  ;;  %v2755_v57 = vadd.f32 %v2754_v0, %v6186_v34  ;;  %v4481_v7 = vrot.slane %v4480_v52, 2  ;;  %7919 = vst [vmem:[#allocation50_spill] sm:$0xff] %v6902_v33 }
 0x21f   : > { %v3771_v46 = vrot.slane %v3770_v35, 2  ;;  %v3271_v22 = vadd.f32 %v3270_v61, %v3016_v45  ;;  %v4490_v62 = vrot.slane %v4489_v9, 2  ;;  %v3786_v25 = vmax.f32 %v3785_v36, %v7918_v31  ;;  %v7922_v36 = vld [vmem:[#allocation21_spill] sm:$0xff] }
 0x220   : > { %v4505_v55 = vmin.f32 %v4504_v29, %v7918_v31  ;;  %v6906_v6 = vmul.f32 %v7920_v39, %v7920_v39  ;;  %v2756_v19 = vadd.f32 %v2755_v57, %v7905_v12  ;;  %v3763_v40 = vmax.f32 %v3761_v50, %v3762_v49  ;;  %v7923_v49 = vld [vmem:[#allocation41_spill] sm:$0xff]  ;;  %v7924_v50 = vld [vmem:[#allocation39_spill] sm:$0xff] }
 0x221   : > { %v3779_v37 = vmax.f32 %v3777_v53, %v3778_v3  ;;  %v6911_v34 = vmul.f32 %v7921_v11, %v7921_v11  ;;  %v3272_v45 = vadd.f32 %v3271_v22, %v3017_v16  ;;  %v4498_v0 = vmin.f32 %v4496_v26, %v4497_v21  ;;  %v6920_v3 = vpop.f32.mrf.mxu1 }
 0x222   : > { %v3787_v61 = vrot.slane %v3786_v25, 4  ;;  %v6915_v29 = vmul.f32 %v7922_v36, %v7922_v36  ;;  %v2757_v33 = vadd.f32 %v6180_v15, %v2756_v19  ;;  %v4482_v31 = vmin.f32 %v4480_v52, %v4481_v7  ;;  %7925 = vst [vmem:[#allocation4_spill] sm:$0xff] %v6920_v3 }
 0x223   : > { %v3772_v60 = vmax.f32 %v3770_v35, %v3771_v46  ;;  %v3273_v58 = vadd.f32 %v3272_v45, %v3018_v14  ;;  %v4491_v63 = vmin.f32 %v4489_v9, %v4490_v62  ;;  %v4506_v12 = vrot.slane %v4505_v55, 4  ;;  %v7926_v46 = vld [vmem:[#allocation38_spill] sm:$0xff]  ;;  %v7927_v45 = vld [vmem:[#allocation40_spill] sm:$0xff]  ;;  %v6931_v23 = vpop.f32.mrf.mxu1 }
 0x224   : > { %v3793_v53 = vmax.f32 %v7924_v50, %v7923_v49  ;;  %v2758_v22 = vadd.f32 %v7901_v51, %v2757_v33  ;;  %v3764_v16 = vrot.slane %v3763_v40, 1  ;;  %v3780_v26 = vrot.slane %v3779_v37, 2  ;;  %7928 = vst [vmem:[#allocation5_spill] sm:$0xff] %v6931_v23 }
 0x225   : > { %v4512_v21 = vmin.f32 %v7924_v50, %v7923_v49  ;;  %v3274_v57 = vadd.f32 %v3273_v58, %v6824_v5  ;;  %v4499_v15 = vrot.slane %v4498_v0, 2  ;;  %v3788_v52 = vmax.f32 %v3786_v25, %v3787_v61  ;;  %v6946_v49 = vpop.f32.mrf.mxu1 }
 0x226   : > { %v3794_v14 = vmax.f32 %v3793_v53, %v7926_v46  ;;  %v2759_v62 = vadd.f32 %v2758_v22, %v6206_v24  ;;  %v4483_v35 = vrot.slane %v4482_v31, 1  ;;  %v3773_v9 = vrot.slane %v3772_v60, 1  ;;  %7929 = vst [vmem:[#allocation53_spill] sm:$0xff] %v6946_v49 }
 0x227   : > { %v4513_v7 = vmin.f32 %v4512_v21, %v7926_v46  ;;  %v3275_v19 = vadd.f32 %v3274_v57, %v6832_v47  ;;  %v4492_v51 = vrot.slane %v4491_v63, 1  ;;  %v4507_v33 = vmin.f32 %v4505_v55, %v4506_v12 }
 0x228   : > { %v3795_v3 = vmax.f32 %v3794_v14, %v7927_v45  ;;  %v2760_v5 = vadd.f32 %v2759_v62, %v7909_v42  ;;  %v6936_v58 = vmul.f32 %v7881_v28, %v7881_v28  ;;  %v6940_v24 = vmul.f32 %v7880_v4, %v7880_v4 }
 0x229   : > { %v4514_v25 = vmin.f32 %v4513_v7, %v7927_v45  ;;  %v3276_v47 = vadd.f32 %v3275_v19, %v6854_v27  ;;  %v3781_v61 = vmax.f32 %v3779_v37, %v3780_v26  ;;  %v4500_v55 = vmin.f32 %v4498_v0, %v4499_v15  ;;  %v7930_v45 = vld [vmem:[#allocation45_spill] sm:$0xff]  ;;  %v7931_v27 = vld [vmem:[#allocation43_spill] sm:$0xff] }
 0x22a   : > { %v3789_v12 = vrot.slane %v3788_v52, 2  ;;  %v2761_v53 = vadd.f32 %v7858_v41, %v2760_v5  ;;  %v3765_v22 = vmax.f32 %v3763_v40, %v3764_v16  ;;  %v4484_v21 = vmin.f32 %v4482_v31, %v4483_v35 }
 0x22b   : > { %v3796_v42 = vrot.slane %v3795_v3, 4  ;;  %v3277_v57 = vadd.f32 %v3276_v47, %v6864_v20  ;;  %v3774_v14 = vmax.f32 %v3772_v60, %v3773_v9  ;;  %v4493_v62 = vmin.f32 %v4491_v63, %v4492_v51  ;;  %v7932_v20 = vld [vmem:[#allocation42_spill] sm:$0xff]  ;;  %v6960_v51 = vpop.f32.mrf.mxu1 }
 0x22c   : > { %v4508_v23 = vrot.slane %v4507_v33, 2  ;;  %v2762_v50 = vadd.f32 %v7860_v54, %v2761_v53  ;;  %v4515_v7 = vrot.slane %v4514_v25, 4  ;;  %v3802_v37 = vmax.f32 %v7931_v27, %v7930_v45 }
 0x22d   : > { %v4521_v0 = vmin.f32 %v7931_v27, %v7930_v45  ;;  %v3278_v41 = vadd.f32 %v3277_v57, %v6846_v56  ;;  %v3782_v31 = vrot.slane %v3781_v61, 1  ;;  %v4501_v40 = vrot.slane %v4500_v55, 1  ;;  %v7934_v57 = vld [vmem:[#allocation49_spill] sm:$0xff] }
 0x22e   : > { %v3790_v16 = vmax.f32 %v3788_v52, %v3789_v12  ;;  %v2763_v60 = vadd.f32 %v2762_v50, %v7865_v18  ;;  %v3797_v63 = vmax.f32 %v3795_v3, %v3796_v42  ;;  %v3803_v26 = vmax.f32 %v3802_v37, %v7932_v20  ;;  %v7933_v52 = vld [vmem:[#allocation44_spill] sm:$0xff] }
 0x22f   : > { %v4522_v15 = vmin.f32 %v4521_v0, %v7932_v20  ;;  %v3279_v54 = vadd.f32 %v3278_v41, %v6858_v1  ;;  %v4079_v35 = vsel %vm4037_vm2, %v3774_v14, %v3765_v22  ;;  %v4791_v9 = vsel %vm4037_vm2, %v4493_v62, %v4484_v21  ;;  %v6972_v62 = vpop.f32.mrf.mxu1  ;;  %v7937_v0 = vld [vmem:[#allocation46_spill] sm:$0xff] }
 0x230   : > { %v4509_v19 = vmin.f32 %v4507_v33, %v4508_v23  ;;  %v2764_v56 = vadd.f32 %v2763_v60, %v7915_v38  ;;  %v4516_v5 = vmin.f32 %v4514_v25, %v4515_v7  ;;  %v3804_v47 = vmax.f32 %v3803_v26, %v7933_v52  ;;  %v7935_v38 = vld [vmem:[#allocation47_spill] sm:$0xff]  ;;  %7936 = vst [vmem:[#allocation6_spill] sm:$0xff] %v6972_v62 }
 0x231   : > { %v4523_v18 = vmin.f32 %v4522_v15, %v7933_v52  ;;  %v3280_v50 = vadd.f32 %v3279_v54, %v6874_v32  ;;  %v3783_v3 = vmax.f32 %v3781_v61, %v3782_v31  ;;  %v4502_v12 = vmin.f32 %v4500_v55, %v4501_v40 }
 0x232   : > { %v3791_v53 = vrot.slane %v3790_v16, 1  ;;  %v2765_v1 = vadd.f32 %v7866_v43, %v2764_v56  ;;  %v3798_v22 = vrot.slane %v3797_v63, 2  ;;  %v3805_v42 = vrot.slane %v3804_v47, 4 }
 0x233   : > { %v4524_v21 = vrot.slane %v4523_v18, 4  ;;  %v3281_v23 = vadd.f32 %v3280_v50, %v6890_v59  ;;  %v4510_v33 = vrot.slane %v4509_v19, 1  ;;  %v3811_v25 = vmax.f32 %v7935_v38, %v7934_v57 }
 0x234   : > { %v4530_v14 = vmin.f32 %v7935_v38, %v7934_v57  ;;  %v2766_v32 = vadd.f32 %v7911_v17, %v2765_v1  ;;  %v4517_v61 = vrot.slane %v4516_v5, 2  ;;  %v3806_v55 = vmax.f32 %v3804_v47, %v3805_v42  ;;  %v7938_v17 = vld [vmem:[#allocation48_spill] sm:$0xff] }
 0x235   : > { %v4525_v7 = vmin.f32 %v4523_v18, %v4524_v21  ;;  %v3282_v43 = vadd.f32 %v3281_v23, %v6870_v2  ;;  %v3792_v37 = vmax.f32 %v3790_v16, %v3791_v53  ;;  %v3812_v41 = vmax.f32 %v3811_v25, %v7937_v0  ;;  %v6983_v18 = vpop.f32.mrf.mxu1 }
 0x236   : > { %v4531_v59 = vmin.f32 %v4530_v14, %v7937_v0  ;;  %v2767_v31 = vadd.f32 %v2766_v32, %v7920_v39  ;;  %v3799_v40 = vmax.f32 %v3797_v63, %v3798_v22  ;;  %v3807_v60 = vrot.slane %v3806_v55, 2  ;;  %v7940_v14 = vld [vmem:[#allocation52_spill] sm:$0xff] }
 0x237   : > { %v4526_v26 = vrot.slane %v4525_v7, 2  ;;  %v3283_v15 = vadd.f32 %v3282_v43, %v6879_v8  ;;  %v4080_v54 = vsel %vm4039_vm3, %v3783_v3, %v4079_v35  ;;  %v3813_v56 = vmax.f32 %v3812_v41, %v7938_v17 }
 0x238   : > { %v4532_v47 = vmin.f32 %v4531_v59, %v7938_v17  ;;  %v2768_v2 = vadd.f32 %v2767_v31, %v7922_v36  ;;  %v4792_v16 = vsel %vm4039_vm3, %v4502_v12, %v4791_v9  ;;  %v4518_v50 = vmin.f32 %v4516_v5, %v4517_v61  ;;  %v7939_v36 = vld [vmem:[#allocation56_spill] sm:$0xff]  ;;  %v6993_v5 = vpop.f32.mrf.mxu1 }
 0x239   : > { %v3808_v53 = vmax.f32 %v3806_v55, %v3807_v60  ;;  %v3284_v39 = vadd.f32 %v3283_v15, %v6906_v6  ;;  %v4511_v63 = vmin.f32 %v4509_v19, %v4510_v33  ;;  %v3814_v1 = vrot.slane %v3813_v56, 4  ;;  %7941 = vst [vmem:[#allocation24_spill] sm:$0xff] %v6993_v5  ;;  %v7942_v55 = vld [vmem:[#allocation51_spill] sm:$0xff] }
 0x23a   : > { %v4533_v22 = vrot.slane %v4532_v47, 4  ;;  %v2769_v8 = vadd.f32 %v7917_v44, %v2768_v2  ;;  %v4081_v35 = vsel %vm4041_vm4, %v3792_v37, %v4080_v54  ;;  %v3800_v3 = vrot.slane %v3799_v40, 1  ;;  %v7943_v60 = vld [vmem:[#allocation55_spill] sm:$0xff]  ;;  %v7004_v15 = vpop.f32.mrf.mxu1 }
 0x23b   : > { %v4527_v42 = vmin.f32 %v4525_v7, %v4526_v26  ;;  %v3285_v21 = vadd.f32 %v3284_v39, %v6915_v29  ;;  %v3815_v23 = vmax.f32 %v3813_v56, %v3814_v1  ;;  %v3820_v9 = vmax.f32 %v7940_v14, %v7939_v36  ;;  %7944 = vst [vmem:[#allocation7_spill] sm:$0xff] %v7004_v15 }
 0x23c   : > { %v4534_v25 = vmin.f32 %v4532_v47, %v4533_v22  ;;  %v2770_v6 = vadd.f32 %v7921_v11, %v2769_v8  ;;  %v4519_v19 = vrot.slane %v4518_v50, 1  ;;  %v3809_v12 = vrot.slane %v3808_v53, 1 }
 0x23d   : > { %v4539_v44 = vmin.f32 %v7940_v14, %v7939_v36  ;;  %v3286_v33 = vadd.f32 %v3285_v21, %v6897_v48  ;;  %v3816_v32 = vrot.slane %v3815_v23, 2  ;;  %v3821_v29 = vmax.f32 %v3820_v9, %v7942_v55 }
 0x23e   : > { %v4535_v61 = vrot.slane %v4534_v25, 2  ;;  %v2771_v7 = vadd.f32 %v2770_v6, %v7881_v28  ;;  %v3801_v43 = vmax.f32 %v3799_v40, %v3800_v3  ;;  %v4528_v37 = vrot.slane %v4527_v42, 1 }
 0x23f   : > { %v4540_v41 = vmin.f32 %v4539_v44, %v7942_v55  ;;  %v3287_v59 = vadd.f32 %v3286_v33, %v6911_v34  ;;  %v3817_v11 = vmax.f32 %v3815_v23, %v3816_v32  ;;  %v3822_v26 = vmax.f32 %v3821_v29, %v7943_v60 }
 0x240   : > { %v4536_v31 = vmin.f32 %v4534_v25, %v4535_v61  ;;  %v2772_v48 = vadd.f32 %v2771_v7, %v7880_v4  ;;  %v4793_v54 = vsel %vm4041_vm4, %v4511_v63, %v4792_v16  ;;  %v4520_v56 = vmin.f32 %v4518_v50, %v4519_v19  ;;  %v7015_v63 = vpop.f32.mrf.mxu1  ;;  %v7946_v19 = vld [vmem:[#allocation61_spill] sm:$0xff]  ;;  %v7949_v7 = vld [vmem:[#allocation26_spill] sm:$0xff] }
 0x241   : > { %v4541_v47 = vmin.f32 %v4540_v41, %v7943_v60  ;;  %v3288_v28 = vadd.f32 %v3287_v59, %v6936_v58  ;;  %v3810_v40 = vmax.f32 %v3808_v53, %v3809_v12  ;;  %v3818_v2 = vrot.slane %v3817_v11, 1  ;;  %7945 = vst [vmem:[#allocation8_spill] sm:$0xff] %v7015_v63  ;;  %v7947_v12 = vld [vmem:[#allocation59_spill] sm:$0xff] }
 0x242   : > { %v3823_v39 = vrot.slane %v3822_v26, 4  ;;  %v2773_v34 = vadd.f32 %v7884_v10, %v2772_v48  ;;  %v4082_v1 = vsel %vm4043_vm5, %v3801_v43, %v4081_v35  ;;  %v4537_v22 = vrot.slane %v4536_v31, 1  ;;  %v7028_v29 = vpop.f32.mrf.mxu1 }
 0x243   : > { %v4542_v8 = vrot.slane %v4541_v47, 4  ;;  %v3035_v3 = vmul.f32 %v7884_v10, %v7884_v10  ;;  %v3289_v4 = vadd.f32 %v3288_v28, %v6940_v24  ;;  %v4529_v16 = vmin.f32 %v4527_v42, %v4528_v37  ;;  %7948 = vst [vmem:[#allocation3_spill] sm:$0xff] %v7028_v29  ;;  %v7950_v37 = vld [vmem:[#allocation29_spill] sm:$0xff]  ;;  %v7951_v28 = vld [vmem:[#allocation58_spill] sm:$0xff] }
 0x244   : > { %v3824_v50 = vmax.f32 %v3822_v26, %v3823_v39  ;;  %v3036_v58 = vmul.f32 %v7896_v13, %v7896_v13  ;;  %v2774_v53 = vadd.f32 %v7896_v13, %v2773_v34  ;;  %v4794_v21 = vsel %vm4043_vm5, %v4520_v56, %v4793_v54  ;;  %v7952_v34 = vld [vmem:[#allocation65_spill] sm:$0xff] }
 0x245   : > { %v4543_v23 = vmin.f32 %v4541_v47, %v4542_v8  ;;  %v3290_v35 = vadd.f32 %v3289_v4, %v3035_v3  ;;  %v4083_v25 = vsel %vm4045_vm6, %v3810_v40, %v4082_v1  ;;  %v3819_v9 = vmax.f32 %v3817_v11, %v3818_v2  ;;  %v7953_v1 = vld [vmem:[#allocation63_spill] sm:$0xff]  ;;  %v7045_v3 = vpop.f32.mrf.mxu1  ;;  %v7955_v4 = vld [vmem:[#allocation28_spill] sm:$0xff] }
 0x246   : > { %v3825_v6 = vrot.slane %v3824_v50, 2  ;;  %v2775_v10 = vadd.f32 %v2774_v53, %v7886_v30  ;;  %v4538_v24 = vmin.f32 %v4536_v31, %v4537_v22  ;;  %v3829_v44 = vmax.f32 %v7947_v12, %v7946_v19  ;;  %7954 = vst [vmem:[#allocation9_spill] sm:$0xff] %v7045_v3  ;;  %v7974_v3 = vld [vmem:[#allocation11_spill] sm:$0xff] }
 0x247   : > { %v4544_v42 = vrot.slane %v4543_v23, 2  ;;  %v3291_v33 = vadd.f32 %v3290_v35, %v3036_v58  ;;  %v3037_v32 = vmul.f32 %v7886_v30, %v7886_v30  ;;  %v4795_v13 = vsel %vm4045_vm6, %v4529_v16, %v4794_v21  ;;  %v7956_v35 = vld [vmem:[#allocation62_spill] sm:$0xff] }
 0x248   : > { %v3826_v61 = vmax.f32 %v3824_v50, %v3825_v6  ;;  %v3039_v43 = vmul.f32 %v7949_v7, %v7949_v7  ;;  %v2776_v41 = vadd.f32 %v2775_v10, %v7950_v37  ;;  %v3038_v59 = vmul.f32 %v7950_v37, %v7950_v37  ;;  %v7958_v10 = vld [vmem:[#allocation31_spill] sm:$0xff]  ;;  %v7065_v37 = vpop.f32.mrf.mxu1 }
 0x249   : > { %v4545_v11 = vmin.f32 %v4543_v23, %v4544_v42  ;;  %v3292_v31 = vadd.f32 %v3291_v33, %v3037_v32  ;;  %v4084_v26 = vsel %vm4047_vm7, %v3819_v9, %v4083_v25  ;;  %v4548_v30 = vmin.f32 %v7947_v12, %v7946_v19  ;;  %v7957_v9 = vld [vmem:[#allocation30_spill] sm:$0xff]  ;;  %7961 = vst [vmem:[#allocation10_spill] sm:$0xff] %v7065_v37 }
 0x24a   : > { %v3827_v48 = vrot.slane %v3826_v61, 1  ;;  %v2777_v54 = vadd.f32 %v7949_v7, %v2776_v41  ;;  %v4796_v56 = vsel %vm4047_vm7, %v4538_v24, %v4795_v13  ;;  %v3830_v40 = vmax.f32 %v3829_v44, %v7951_v28  ;;  %v7959_v13 = vld [vmem:[#allocation32_spill] sm:$0xff]  ;;  %v7962_v41 = vld [vmem:[#allocation33_spill] sm:$0xff] }
 0x24b   : > { %v4546_v47 = vrot.slane %v4545_v11, 1  ;;  %v3293_v2 = vadd.f32 %v3292_v31, %v3038_v59  ;;  %v3838_v22 = vmax.f32 %v7953_v1, %v7952_v34  ;;  %v4557_v8 = vmin.f32 %v7953_v1, %v7952_v34  ;;  %v7960_v7 = vld [vmem:[#allocation60_spill] sm:$0xff]  ;;  %v7963_v31 = vld [vmem:[#allocation34_spill] sm:$0xff] }
 0x24c   : > { %v3828_v39 = vmax.f32 %v3826_v61, %v3827_v48  ;;  %v3040_v16 = vmul.f32 %v7955_v4, %v7955_v4  ;;  %v2778_v50 = vadd.f32 %v7955_v4, %v2777_v54  ;;  %v4549_v23 = vmin.f32 %v4548_v30, %v7951_v28  ;;  %v7964_v48 = vld [vmem:[#allocation35_spill] sm:$0xff] }
 0x24d   : > { %v4547_v58 = vmin.f32 %v4545_v11, %v4546_v47  ;;  %v3294_v53 = vadd.f32 %v3293_v2, %v3039_v43  ;;  %v3839_v25 = vmax.f32 %v3838_v22, %v7956_v35  ;;  %v3043_v6 = vmul.f32 %v7957_v9, %v7957_v9 }
 0x24e   : > { %v4085_v21 = vsel %vm4049_vm8, %v3828_v39, %v4084_v26  ;;  %v2779_v24 = vadd.f32 %v2778_v50, %v7958_v10  ;;  %v4558_v44 = vmin.f32 %v4557_v8, %v7956_v35  ;;  %v3041_v32 = vmul.f32 %v7958_v10, %v7958_v10  ;;  %v7967_v8 = vld [vmem:[#allocation37_spill] sm:$0xff] }
 0x24f   : > { %4113 = vst [vmem:[%s6131_s7 + $0x28] sm:$0xff] %v4085_v21  ;;  %v4797_v42 = vsel %vm4049_vm8, %v4547_v58, %v4796_v56  ;;  %v3295_v33 = vadd.f32 %v3294_v53, %v3040_v16  ;;  %v3044_v61 = vmul.f32 %v7959_v13, %v7959_v13  ;;  %v3831_v43 = vmax.f32 %v3830_v40, %v7960_v7  ;;  %v7965_v56 = vld [vmem:[#allocation36_spill] sm:$0xff]  ;;  %v7968_v53 = vld [vmem:[#allocation39_spill] sm:$0xff] }
 0x250   : > { %4825 = vst [vmem:[%s6138_s10 + $0x28] sm:$0xff] %v4797_v42  ;;  %v2780_v59 = vadd.f32 %v2779_v24, %v7962_v41  ;;  %v3042_v11 = vmul.f32 %v7962_v41, %v7962_v41  ;;  %v3047_v26 = vmul.f32 %v7963_v31, %v7963_v31  ;;  %v3045_v30 = vmul.f32 %v7964_v48, %v7964_v48  ;;  %v7966_v40 = vld [vmem:[#allocation64_spill] sm:$0xff]  ;;  %v7969_v24 = vld [vmem:[#allocation67_spill] sm:$0xff]  ;;  %v7973_v41 = vld [vmem:[#allocation41_spill] sm:$0xff] }
 0x251   : > { %v3296_v54 = vadd.f32 %v3295_v33, %v3041_v32  ;;  %v3048_v47 = vmul.f32 %v7965_v56, %v7965_v56  ;;  %v4550_v2 = vmin.f32 %v4549_v23, %v7960_v7  ;;  %v3840_v39 = vmax.f32 %v3839_v25, %v7966_v40  ;;  %v7970_v23 = vld [vmem:[#allocation12_spill] sm:$0xff]  ;;  %v7090_v25 = vpop.f32.mrf.mxu1 }
 0x252   : > { %v2781_v22 = vadd.f32 %v7957_v9, %v2780_v59  ;;  %v3046_v4 = vmul.f32 %v7967_v8, %v7967_v8  ;;  %v7083_v16 = vmul.f32 %v7926_v46, %v7926_v46  ;;  %v4559_v50 = vmin.f32 %v4558_v44, %v7966_v40  ;;  %7971 = vst [vmem:[#allocation57_spill] sm:$0xff] %v7090_v25  ;;  %v7972_v33 = vld [vmem:[#allocation40_spill] sm:$0xff] }
 0x253   : > { %v3297_v58 = vadd.f32 %v3296_v54, %v3042_v11  ;;  %v3049_v21 = vmul.f32 %v7968_v53, %v7968_v53  ;;  %v3832_v10 = vrot.slane %v3831_v43, 4  ;;  %v3847_v42 = vmax.f32 %v7970_v23, %v7969_v24 }
 0x254   : > { %v2782_v9 = vadd.f32 %v7959_v13, %v2781_v22  ;;  %v7095_v32 = vmul.f32 %v7972_v33, %v7972_v33  ;;  %v3050_v59 = vmul.f32 %v7973_v41, %v7973_v41  ;;  %v4566_v44 = vmin.f32 %v7970_v23, %v7969_v24  ;;  %v7113_v23 = vpop.f32.mrf.mxu1 }
 0x255   : > { %v3298_v11 = vadd.f32 %v3297_v58, %v3043_v6  ;;  %v4551_v54 = vrot.slane %v4550_v2, 4  ;;  %v3841_v63 = vrot.slane %v3840_v39, 4  ;;  %v3848_v5 = vmax.f32 %v3847_v42, %v7974_v3  ;;  %v7975_v6 = vld [vmem:[#allocation66_spill] sm:$0xff]  ;;  %7976 = vst [vmem:[#allocation13_spill] sm:$0xff] %v7113_v23 }
 0x256   : > { %v2783_v40 = vadd.f32 %v2782_v9, %v7964_v48  ;;  %v7105_v13 = vmul.f32 %v7932_v20, %v7932_v20  ;;  %v4560_v22 = vrot.slane %v4559_v50, 4  ;;  %v4567_v25 = vmin.f32 %v4566_v44, %v7974_v3  ;;  %v7978_v3 = vld [vmem:[#allocation14_spill] sm:$0xff] }
 0x257   : > { %v3299_v37 = vadd.f32 %v3298_v11, %v3044_v61  ;;  %v7110_v15 = vmul.f32 %v7931_v27, %v7931_v27  ;;  %v3833_v24 = vmax.f32 %v3831_v43, %v3832_v10  ;;  %v3849_v58 = vmax.f32 %v3848_v5, %v7975_v6 }
 0x258   : > { %v2784_v42 = vadd.f32 %v2783_v40, %v7967_v8  ;;  %v7118_v48 = vmul.f32 %v7933_v52, %v7933_v52  ;;  %v7122_v9 = vmul.f32 %v7930_v45, %v7930_v45  ;;  %v4568_v61 = vmin.f32 %v4567_v25, %v7975_v6  ;;  %v7977_v8 = vld [vmem:[#allocation69_spill] sm:$0xff]  ;;  %v7138_v6 = vpop.f32.mrf.mxu1 }
 0x259   : > { %v3300_v44 = vadd.f32 %v3299_v37, %v3045_v30  ;;  %v7127_v43 = vmul.f32 %v7937_v0, %v7937_v0  ;;  %v4552_v5 = vmin.f32 %v4550_v2, %v4551_v54  ;;  %v3842_v10 = vmax.f32 %v3840_v39, %v3841_v63  ;;  %7979 = vst [vmem:[#allocation16_spill] sm:$0xff] %v7138_v6 }
 0x25a   : > { %v2785_v11 = vadd.f32 %v7963_v31, %v2784_v42  ;;  %v4561_v40 = vmin.f32 %v4559_v50, %v4560_v22  ;;  %v3856_v23 = vmax.f32 %v7978_v3, %v7977_v8  ;;  %v4575_v29 = vmin.f32 %v7978_v3, %v7977_v8  ;;  %v7980_v31 = vld [vmem:[#allocation15_spill] sm:$0xff] }
 0x25b   : > { %v3301_v34 = vadd.f32 %v3300_v44, %v3046_v4  ;;  %v7136_v25 = vmul.f32 %v7935_v38, %v7935_v38  ;;  %v3834_v37 = vrot.slane %v3833_v24, 2  ;;  %v3850_v30 = vrot.slane %v3849_v58, 4 }
 0x25c   : > { %v2786_v63 = vadd.f32 %v7965_v56, %v2785_v11  ;;  %v4569_v2 = vrot.slane %v4568_v61, 4  ;;  %v3857_v39 = vmax.f32 %v3856_v23, %v7980_v31  ;;  %v4576_v50 = vmin.f32 %v4575_v29, %v7980_v31  ;;  %v7981_v56 = vld [vmem:[#allocation68_spill] sm:$0xff]  ;;  %v7161_v23 = vpop.f32.mrf.mxu1 }
 0x25d   : > { %v3302_v54 = vadd.f32 %v3301_v34, %v3047_v26  ;;  %v7145_v22 = vmul.f32 %v7938_v17, %v7938_v17  ;;  %v7149_v4 = vmul.f32 %v7934_v57, %v7934_v57  ;;  %v4553_v42 = vrot.slane %v4552_v5, 2  ;;  %7982 = vst [vmem:[#allocation17_spill] sm:$0xff] %v7161_v23 }
 0x25e   : > { %v2787_v44 = vadd.f32 %v2786_v63, %v7968_v53  ;;  %v3843_v6 = vrot.slane %v3842_v10, 2  ;;  %v4562_v8 = vrot.slane %v4561_v40, 2  ;;  %v3858_v11 = vmax.f32 %v3857_v39, %v7981_v56 }
 0x25f   : > { %v3303_v3 = vadd.f32 %v3302_v54, %v3048_v47  ;;  %v7155_v29 = vmul.f32 %v7942_v55, %v7942_v55  ;;  %v7159_v34 = vmul.f32 %v7940_v14, %v7940_v14  ;;  %v3851_v26 = vmax.f32 %v3849_v58, %v3850_v30 }
 0x260   : > { %v2788_v31 = vadd.f32 %v2787_v44, %v7973_v41  ;;  %v3835_v35 = vmax.f32 %v3833_v24, %v3834_v37  ;;  %v4570_v53 = vmin.f32 %v4568_v61, %v4569_v2  ;;  %v4577_v63 = vmin.f32 %v4576_v50, %v7981_v56  ;;  %v7983_v61 = vld [vmem:[#allocation25_spill] sm:$0xff]  ;;  %v7984_v37 = vld [vmem:[#allocation71_spill] sm:$0xff] }
 0x261   : > { %v3304_v1 = vadd.f32 %v3303_v3, %v3049_v21  ;;  %v7167_v47 = vmul.f32 %v7943_v60, %v7943_v60  ;;  %v7171_v39 = vmul.f32 %v7939_v36, %v7939_v36  ;;  %v3859_v54 = vrot.slane %v3858_v11, 4  ;;  %v7178_v21 = vpop.f32.mrf.mxu1 }
 0x262   : > { %v2789_v58 = vadd.f32 %v7926_v46, %v2788_v31  ;;  %v4554_v30 = vmin.f32 %v4552_v5, %v4553_v42  ;;  %v3844_v23 = vmax.f32 %v3842_v10, %v3843_v6  ;;  %v4563_v7 = vmin.f32 %v4561_v40, %v4562_v8  ;;  %7985 = vst [vmem:[#allocation18_spill] sm:$0xff] %v7178_v21  ;;  %v7986_v6 = vld [vmem:[#allocation70_spill] sm:$0xff] }
 0x263   : > { %v3305_v41 = vadd.f32 %v3304_v1, %v3050_v59  ;;  %v3852_v24 = vrot.slane %v3851_v26, 2  ;;  %v3865_v2 = vmax.f32 %v7984_v37, %v7983_v61  ;;  %v4584_v3 = vmin.f32 %v7984_v37, %v7983_v61  ;;  %v7987_v61 = vld [vmem:[#allocation72_spill] sm:$0xff]  ;;  %v7188_v37 = vpop.f32.mrf.mxu1 }
 0x264   : > { %v2790_v50 = vadd.f32 %v7972_v33, %v2789_v58  ;;  %v3836_v44 = vrot.slane %v3835_v35, 1  ;;  %v4571_v56 = vrot.slane %v4570_v53, 2  ;;  %v4578_v19 = vrot.slane %v4577_v63, 4  ;;  %7988 = vst [vmem:[#allocation19_spill] sm:$0xff] %v7188_v37 }
 0x265   : > { %v3306_v46 = vadd.f32 %v3305_v41, %v7083_v16  ;;  %v3860_v5 = vmax.f32 %v3858_v11, %v3859_v54  ;;  %v3866_v10 = vmax.f32 %v3865_v2, %v7986_v6  ;;  %v4585_v1 = vmin.f32 %v4584_v3, %v7986_v6  ;;  %v7200_v37 = vpop.f32.mrf.mxu1 }
 0x266   : > { %v2791_v59 = vadd.f32 %v2790_v50, %v7931_v27  ;;  %v4555_v40 = vrot.slane %v4554_v30, 1  ;;  %v3845_v8 = vrot.slane %v3844_v23, 1  ;;  %v4564_v31 = vrot.slane %v4563_v7, 1 }
 0x267   : > { %v3307_v42 = vadd.f32 %v3306_v46, %v7095_v32  ;;  %v3853_v21 = vmax.f32 %v3851_v26, %v3852_v24  ;;  %v3867_v33 = vmax.f32 %v3866_v10, %v7987_v61  ;;  %v4586_v58 = vmin.f32 %v4585_v1, %v7987_v61  ;;  %v7990_v61 = vld [vmem:[#allocation54_spill] sm:$0xff] }
 0x268   : > { %v2792_v16 = vadd.f32 %v2791_v59, %v7930_v45  ;;  %v7193_v11 = vmul.f32 %v7951_v28, %v7951_v28  ;;  %v4572_v54 = vmin.f32 %v4570_v53, %v4571_v56  ;;  %v4579_v27 = vmin.f32 %v4577_v63, %v4578_v19  ;;  %v7989_v59 = vld [vmem:[#allocation27_spill] sm:$0xff] }
 0x269   : > { %v3308_v41 = vadd.f32 %v3307_v42, %v7110_v15  ;;  %v3837_v2 = vmax.f32 %v3835_v35, %v3836_v44  ;;  %v3861_v3 = vrot.slane %v3860_v5, 2  ;;  %v3868_v32 = vrot.slane %v3867_v33, 4  ;;  %v7991_v53 = vld [vmem:[#allocation23_spill] sm:$0xff]  ;;  %v7992_v42 = vld [vmem:[#allocation22_spill] sm:$0xff] }
 0x26a   : > { %v2793_v26 = vadd.f32 %v7932_v20, %v2792_v16  ;;  %v4556_v24 = vmin.f32 %v4554_v30, %v4555_v40  ;;  %v3846_v50 = vmax.f32 %v3844_v23, %v3845_v8  ;;  %v4565_v46 = vmin.f32 %v4563_v7, %v4564_v31 }
 0x26b   : > { %v3309_v10 = vadd.f32 %v3308_v41, %v7122_v9  ;;  %v3854_v1 = vrot.slane %v3853_v21, 1  ;;  %v4587_v45 = vrot.slane %v4586_v58, 4  ;;  %v3874_v6 = vmax.f32 %v7990_v61, %v7989_v59  ;;  %v7213_v41 = vpop.f32.mrf.mxu1 }
 0x26c   : > { %v2794_v19 = vadd.f32 %v7933_v52, %v2793_v26  ;;  %v4573_v15 = vrot.slane %v4572_v54, 1  ;;  %v4580_v35 = vrot.slane %v4579_v27, 2  ;;  %v4593_v56 = vmin.f32 %v7990_v61, %v7989_v59 }
 0x26d   : > { %v3310_v20 = vadd.f32 %v3309_v10, %v7105_v13  ;;  %v3862_v23 = vmax.f32 %v3860_v5, %v3861_v3  ;;  %v3869_v7 = vmax.f32 %v3867_v33, %v3868_v32  ;;  %v3875_v9 = vmax.f32 %v3874_v6, %v7991_v53  ;;  %v7225_v10 = vpop.f32.mrf.mxu1 }
 0x26e   : > { %v2795_v63 = vadd.f32 %v2794_v19, %v7935_v38  ;;  %v4086_v30 = vsel %vm4037_vm2, %v3846_v50, %v3837_v2  ;;  %v4798_v44 = vsel %vm4037_vm2, %v4565_v46, %v4556_v24  ;;  %v4594_v40 = vmin.f32 %v4593_v56, %v7991_v53 }
 0x26f   : > { %v3311_v52 = vadd.f32 %v3310_v20, %v7118_v48  ;;  %v3855_v8 = vmax.f32 %v3853_v21, %v3854_v1  ;;  %v4588_v31 = vmin.f32 %v4586_v58, %v4587_v45  ;;  %v3876_v16 = vmax.f32 %v3875_v9, %v7992_v42  ;;  %v7993_v21 = vld [vmem:[#allocation5_spill] sm:$0xff]  ;;  %v7994_v58 = vld [vmem:[#allocation50_spill] sm:$0xff] }
 0x270   : > { %v2796_v13 = vadd.f32 %v2795_v63, %v7934_v57  ;;  %v4574_v5 = vmin.f32 %v4572_v54, %v4573_v15  ;;  %v4581_v6 = vmin.f32 %v4579_v27, %v4580_v35  ;;  %v4595_v38 = vmin.f32 %v4594_v40, %v7992_v42  ;;  %v7995_v45 = vld [vmem:[#allocation2_spill] sm:$0xff]  ;;  %v7996_v63 = vld [vmem:[#allocation4_spill] sm:$0xff] }
 0x271   : > { %v3312_v33 = vadd.f32 %v3311_v52, %v7136_v25  ;;  %v3863_v2 = vrot.slane %v3862_v23, 1  ;;  %v3870_v3 = vrot.slane %v3869_v7, 2  ;;  %v3877_v32 = vrot.slane %v3876_v16, 4 }
 0x272   : > { %v2797_v26 = vadd.f32 %v7937_v0, %v2796_v13  ;;  %v4596_v48 = vrot.slane %v4595_v38, 4  ;;  %v3883_v24 = vmax.f32 %v7994_v58, %v7993_v21  ;;  %v4602_v50 = vmin.f32 %v7994_v58, %v7993_v21  ;;  %v7238_v13 = vpop.f32.mrf.mxu1 }
 0x273   : > { %v3313_v57 = vadd.f32 %v3312_v33, %v7149_v4  ;;  %v4087_v54 = vsel %vm4039_vm3, %v3855_v8, %v4086_v30  ;;  %v4589_v27 = vrot.slane %v4588_v31, 2  ;;  %v3878_v46 = vmax.f32 %v3876_v16, %v3877_v32 }
 0x274   : > { %v2798_v25 = vadd.f32 %v7938_v17, %v2797_v26  ;;  %v4597_v1 = vmin.f32 %v4595_v38, %v4596_v48  ;;  %v3884_v0 = vmax.f32 %v3883_v24, %v7995_v45  ;;  %v4603_v19 = vmin.f32 %v4602_v50, %v7995_v45  ;;  %v7249_v24 = vpop.f32.mrf.mxu1 }
 0x275   : > { %v3314_v15 = vadd.f32 %v3313_v57, %v7127_v43  ;;  %v3864_v35 = vmax.f32 %v3862_v23, %v3863_v2  ;;  %v4582_v56 = vrot.slane %v4581_v6, 1  ;;  %v3871_v20 = vmax.f32 %v3869_v7, %v3870_v3 }
 0x276   : > { %v2799_v4 = vadd.f32 %v2798_v25, %v7940_v14  ;;  %v3879_v9 = vrot.slane %v3878_v46, 2  ;;  %v3885_v30 = vmax.f32 %v3884_v0, %v7996_v63  ;;  %v4604_v40 = vmin.f32 %v4603_v19, %v7996_v63 }
 0x277   : > { %v3315_v52 = vadd.f32 %v3314_v15, %v7145_v22  ;;  %v3065_v17 = vmul.f32 %v7947_v12, %v7947_v12  ;;  %v4799_v8 = vsel %vm4039_vm3, %v4574_v5, %v4798_v44  ;;  %v4598_v16 = vrot.slane %v4597_v1, 2 }
 0x278   : > { %v2800_v43 = vadd.f32 %v2799_v4, %v7939_v36  ;;  %v4590_v23 = vmin.f32 %v4588_v31, %v4589_v27  ;;  %v3886_v7 = vrot.slane %v3885_v30, 4  ;;  %v4605_v14 = vrot.slane %v4604_v40, 4 }
 0x279   : > { %v3316_v38 = vadd.f32 %v3315_v52, %v7159_v34  ;;  %v4088_v33 = vsel %vm4041_vm4, %v3864_v35, %v4087_v54  ;;  %v4583_v2 = vmin.f32 %v4581_v6, %v4582_v56  ;;  %v3872_v3 = vrot.slane %v3871_v20, 1  ;;  %v7259_v56 = vpop.f32.mrf.mxu1 }
 0x27a   : > { %v2801_v22 = vadd.f32 %v7942_v55, %v2800_v43  ;;  %v3880_v32 = vmax.f32 %v3878_v46, %v3879_v9  ;;  %v3887_v26 = vmax.f32 %v3885_v30, %v3886_v7  ;;  %v4606_v48 = vmin.f32 %v4604_v40, %v4605_v14  ;;  %7997 = vst [vmem:[#allocation20_spill] sm:$0xff] %v7259_v56 }
 0x27b   : > { %v3317_v44 = vadd.f32 %v3316_v38, %v7171_v39  ;;  %v4599_v5 = vmin.f32 %v4597_v1, %v4598_v16  ;;  %v3892_v36 = vmax.f32 %v6960_v51, %v6983_v18  ;;  %v4611_v31 = vmin.f32 %v6960_v51, %v6983_v18 }
 0x27c   : > { %v2802_v34 = vadd.f32 %v7943_v60, %v2801_v22  ;;  %v4591_v6 = vrot.slane %v4590_v23, 1  ;;  %v3888_v50 = vrot.slane %v3887_v26, 2  ;;  %v4607_v57 = vrot.slane %v4606_v48, 2 }
 0x27d   : > { %v3318_v55 = vadd.f32 %v3317_v44, %v7155_v29  ;;  %v3873_v54 = vmax.f32 %v3871_v20, %v3872_v3  ;;  %v3893_v27 = vmax.f32 %v3892_v36, %v6946_v49  ;;  %v4612_v39 = vmin.f32 %v4611_v31, %v6946_v49  ;;  %v7998_v29 = vld [vmem:[#allocation61_spill] sm:$0xff]  ;;  %v7999_v44 = vld [vmem:[#allocation60_spill] sm:$0xff] }
 0x27e   : > { %v2803_v46 = vadd.f32 %v2802_v34, %v7947_v12  ;;  %v3881_v25 = vrot.slane %v3880_v32, 1  ;;  %v3889_v1 = vmax.f32 %v3887_v26, %v3888_v50  ;;  %v4608_v0 = vmin.f32 %v4606_v48, %v4607_v57  ;;  %v7267_v48 = vpop.f32.mrf.mxu1 }
 0x27f   : > { %v3319_v19 = vadd.f32 %v3318_v55, %v7167_v47  ;;  %v4600_v15 = vrot.slane %v4599_v5, 1  ;;  %v3894_v60 = vmax.f32 %v3893_v27, %v6972_v62  ;;  %v4613_v35 = vmin.f32 %v4612_v39, %v6972_v62  ;;  %v8002_v39 = vld [vmem:[#allocation62_spill] sm:$0xff] }
 0x280   : > { %v2804_v20 = vadd.f32 %v2803_v46, %v7998_v29  ;;  %v3066_v4 = vmul.f32 %v7998_v29, %v7998_v29  ;;  %v4800_v9 = vsel %vm4041_vm4, %v4583_v2, %v4799_v8  ;;  %v4592_v12 = vmin.f32 %v4590_v23, %v4591_v6  ;;  %v8000_v2 = vld [vmem:[#allocation63_spill] sm:$0xff]  ;;  %v7279_v27 = vpop.f32.mrf.mxu1  ;;  %v8003_v46 = vld [vmem:[#allocation65_spill] sm:$0xff] }
 0x281   : > { %v3320_v30 = vadd.f32 %v3319_v19, %v3065_v17  ;;  %v4089_v40 = vsel %vm4043_vm5, %v3873_v54, %v4088_v33  ;;  %v3895_v52 = vrot.slane %v3894_v60, 4  ;;  %v4614_v47 = vrot.slane %v4613_v35, 4  ;;  %8001 = vst [vmem:[#allocation21_spill] sm:$0xff] %v7279_v27 }
 0x282   : > { %v2805_v16 = vadd.f32 %v7951_v28, %v2804_v20  ;;  %v3882_v43 = vmax.f32 %v3880_v32, %v3881_v25  ;;  %v3890_v7 = vrot.slane %v3889_v1, 1  ;;  %v4609_v14 = vrot.slane %v4608_v0, 1 }
 0x283   : > { %v3321_v38 = vadd.f32 %v3320_v30, %v3066_v4  ;;  %v4601_v3 = vmin.f32 %v4599_v5, %v4600_v15  ;;  %v3896_v22 = vmax.f32 %v3894_v60, %v3895_v52  ;;  %v4615_v26 = vmin.f32 %v4613_v35, %v4614_v47  ;;  %v8004_v15 = vld [vmem:[#allocation3_spill] sm:$0xff]  ;;  %v8006_v30 = vld [vmem:[#allocation13_spill] sm:$0xff] }
 0x284   : > { %v3068_v8 = vmul.f32 %v7999_v44, %v7999_v44  ;;  %v2806_v17 = vadd.f32 %v7999_v44, %v2805_v16  ;;  %v4801_v23 = vsel %vm4043_vm5, %v4592_v12, %v4800_v9  ;;  %v3069_v28 = vmul.f32 %v8000_v2, %v8000_v2  ;;  %v8005_v60 = vld [vmem:[#allocation7_spill] sm:$0xff] }
 0x285   : > { %v3322_v33 = vadd.f32 %v3321_v38, %v7193_v11  ;;  %v3897_v32 = vrot.slane %v3896_v22, 2  ;;  %v4616_v36 = vrot.slane %v4615_v26, 2  ;;  %v4090_v31 = vsel %vm4045_vm6, %v3882_v43, %v4089_v40  ;;  %v8007_v40 = vld [vmem:[#allocation10_spill] sm:$0xff]  ;;  %v8009_v38 = vld [vmem:[#allocation64_spill] sm:$0xff] }
 0x286   : > { %v2807_v5 = vadd.f32 %v2806_v17, %v8000_v2  ;;  %v3891_v34 = vmax.f32 %v3889_v1, %v3890_v7  ;;  %v4610_v6 = vmin.f32 %v4608_v0, %v4609_v14  ;;  %v4802_v57 = vsel %vm4045_vm6, %v4601_v3, %v4801_v23  ;;  %v7297_v14 = vpop.f32.mrf.mxu1  ;;  %v8011_v2 = vld [vmem:[#allocation12_spill] sm:$0xff] }
 0x287   : > { %v3323_v50 = vadd.f32 %v3322_v33, %v3068_v8  ;;  %v3898_v55 = vmax.f32 %v3896_v22, %v3897_v32  ;;  %v4617_v54 = vmin.f32 %v4615_v26, %v4616_v36  ;;  %v3071_v11 = vmul.f32 %v8002_v39, %v8002_v39  ;;  %8008 = vst [vmem:[#allocation38_spill] sm:$0xff] %v7297_v14  ;;  %v8010_v26 = vld [vmem:[#allocation24_spill] sm:$0xff]  ;;  %v8012_v32 = vld [vmem:[#allocation9_spill] sm:$0xff] }
 0x288   : > { %v2808_v25 = vadd.f32 %v2807_v5, %v8003_v46  ;;  %v3070_v19 = vmul.f32 %v8003_v46, %v8003_v46  ;;  %v3901_v35 = vmax.f32 %v8005_v60, %v8004_v15  ;;  %v4620_v20 = vmin.f32 %v8005_v60, %v8004_v15 }
 0x289   : > { %v3324_v1 = vadd.f32 %v3323_v50, %v3069_v28  ;;  %v3899_v0 = vrot.slane %v3898_v55, 1  ;;  %v4618_v29 = vrot.slane %v4617_v54, 1  ;;  %v4091_v9 = vsel %vm4047_vm7, %v3891_v34, %v4090_v31  ;;  %v8013_v50 = vld [vmem:[#allocation67_spill] sm:$0xff] }
 0x28a   : > { %v2809_v4 = vadd.f32 %v8002_v39, %v2808_v25  ;;  %v4803_v12 = vsel %vm4047_vm7, %v4610_v6, %v4802_v57  ;;  %v3910_v52 = vmax.f32 %v8007_v40, %v8006_v30  ;;  %v4629_v7 = vmin.f32 %v8007_v40, %v8006_v30  ;;  %v7313_v6 = vpop.f32.mrf.mxu1  ;;  %v8014_v39 = vld [vmem:[#allocation8_spill] sm:$0xff]  ;;  %v8015_v25 = vld [vmem:[#allocation11_spill] sm:$0xff] }
 0x28b   : > { %v3325_v47 = vadd.f32 %v3324_v1, %v3070_v19  ;;  %v3900_v16 = vmax.f32 %v3898_v55, %v3899_v0  ;;  %v4619_v43 = vmin.f32 %v4617_v54, %v4618_v29  ;;  %v3072_v3 = vmul.f32 %v8009_v38, %v8009_v38  ;;  %v8017_v29 = vld [vmem:[#allocation57_spill] sm:$0xff] }
 0x28c   : > { %v2810_v22 = vadd.f32 %v8009_v38, %v2809_v4  ;;  %v3902_v44 = vmax.f32 %v3901_v35, %v8010_v26  ;;  %v4621_v33 = vmin.f32 %v4620_v20, %v8010_v26  ;;  %v3911_v36 = vmax.f32 %v3910_v52, %v8012_v32  ;;  %v8016_v35 = vld [vmem:[#allocation66_spill] sm:$0xff] }
 0x28d   : > { %v3326_v8 = vadd.f32 %v3325_v47, %v3071_v11  ;;  %v4092_v17 = vsel %vm4049_vm8, %v3900_v16, %v4091_v9  ;;  %v4804_v23 = vsel %vm4049_vm8, %v4619_v43, %v4803_v12  ;;  %v3073_v5 = vmul.f32 %v8011_v2, %v8011_v2  ;;  %v8018_v9 = vld [vmem:[#allocation15_spill] sm:$0xff]  ;;  %v8020_v16 = vld [vmem:[#allocation17_spill] sm:$0xff] }
 0x28e   : > { %v2811_v28 = vadd.f32 %v2810_v22, %v8011_v2  ;;  %4114 = vst [vmem:[%s6131_s7 + $0x30] sm:$0xff] %v4092_v17  ;;  %4826 = vst [vmem:[%s6138_s10 + $0x30] sm:$0xff] %v4804_v23  ;;  %v4630_v34 = vmin.f32 %v4629_v7, %v8012_v32  ;;  %v3074_v54 = vmul.f32 %v8013_v50, %v8013_v50  ;;  %v8019_v47 = vld [vmem:[#allocation19_spill] sm:$0xff]  ;;  %v7331_v7 = vpop.f32.mrf.mxu1  ;;  %v8024_v17 = vld [vmem:[#allocation69_spill] sm:$0xff] }
 0x28f   : > { %v3327_v31 = vadd.f32 %v3326_v8, %v3072_v3  ;;  %v3903_v11 = vmax.f32 %v3902_v44, %v8014_v39  ;;  %v4622_v46 = vmin.f32 %v4621_v33, %v8014_v39  ;;  %v3075_v19 = vmul.f32 %v8015_v25, %v8015_v25  ;;  %8021 = vst [vmem:[#allocation45_spill] sm:$0xff] %v7331_v7  ;;  %v8022_v3 = vld [vmem:[#allocation14_spill] sm:$0xff]  ;;  %v8023_v44 = vld [vmem:[#allocation68_spill] sm:$0xff] }
 0x290   : > { %v2812_v57 = vadd.f32 %v2811_v28, %v8013_v50  ;;  %v3076_v1 = vmul.f32 %v8016_v35, %v8016_v35  ;;  %v3912_v20 = vmax.f32 %v3911_v36, %v8017_v29  ;;  %v3079_v12 = vmul.f32 %v8018_v9, %v8018_v9  ;;  %v8025_v2 = vld [vmem:[#allocation70_spill] sm:$0xff] }
 0x291   : > { %v3328_v55 = vadd.f32 %v3327_v31, %v3073_v5  ;;  %v4631_v52 = vmin.f32 %v4630_v34, %v8017_v29  ;;  %v3919_v43 = vmax.f32 %v8020_v16, %v8019_v47  ;;  %v3077_v22 = vmul.f32 %v8022_v3, %v8022_v3  ;;  %v8026_v34 = vld [vmem:[#allocation71_spill] sm:$0xff]  ;;  %v7354_v29 = vpop.f32.mrf.mxu1 }
 0x292   : > { %v2813_v0 = vadd.f32 %v8015_v25, %v2812_v57  ;;  %v3080_v8 = vmul.f32 %v8023_v44, %v8023_v44  ;;  %v3078_v23 = vmul.f32 %v8024_v17, %v8024_v17  ;;  %v7342_v28 = vmul.f32 %v8025_v2, %v8025_v2  ;;  %v8027_v25 = vld [vmem:[#allocation72_spill] sm:$0xff]  ;;  %8029 = vst [vmem:[#allocation43_spill] sm:$0xff] %v7354_v29 }
 0x293   : > { %v3329_v4 = vadd.f32 %v3328_v55, %v3074_v54  ;;  %v3904_v36 = vrot.slane %v3903_v11, 4  ;;  %v4623_v5 = vrot.slane %v4622_v46, 4  ;;  %v3081_v50 = vmul.f32 %v8026_v34, %v8026_v34 }
 0x294   : > { %v2814_v38 = vadd.f32 %v8016_v35, %v2813_v0  ;;  %v3913_v57 = vrot.slane %v3912_v20, 4  ;;  %v4638_v55 = vmin.f32 %v8020_v16, %v8019_v47  ;;  %v7351_v35 = vmul.f32 %v8027_v25, %v8027_v25  ;;  %v8028_v0 = vld [vmem:[#allocation16_spill] sm:$0xff] }
 0x295   : > { %v3330_v33 = vadd.f32 %v3329_v4, %v3075_v19  ;;  %v4632_v19 = vrot.slane %v4631_v52, 4  ;;  %v3920_v4 = vmax.f32 %v3919_v43, %v8028_v0  ;;  %v7361_v30 = vmul.f32 %v7991_v53, %v7991_v53 }
 0x296   : > { %v2815_v31 = vadd.f32 %v2814_v38, %v8022_v3  ;;  %v8030_v38 = vld [vmem:[#allocation25_spill] sm:$0xff]  ;;  %v7369_v47 = vmul.f32 %v7992_v42, %v7992_v42  ;;  %v3905_v43 = vmax.f32 %v3903_v11, %v3904_v36  ;;  %v4624_v16 = vmin.f32 %v4622_v46, %v4623_v5 }
 0x297   : > { %v3331_v54 = vadd.f32 %v3330_v33, %v3076_v1  ;;  %v3082_v3 = vmul.f32 %v8030_v38, %v8030_v38  ;;  %8031 = vst [vmem:[#allocation42_spill] sm:$0xff] %v7361_v30  ;;  %v7365_v1 = vmul.f32 %v7990_v61, %v7990_v61  ;;  %v3914_v40 = vmax.f32 %v3912_v20, %v3913_v57 }
 0x298   : > { %v2816_v32 = vadd.f32 %v2815_v31, %v8024_v17  ;;  %8032 = vst [vmem:[#allocation44_spill] sm:$0xff] %v7369_v47  ;;  %v7374_v31 = vmul.f32 %v7989_v59, %v7989_v59  ;;  %v4639_v39 = vmin.f32 %v4638_v55, %v8028_v0  ;;  %v7379_v14 = vmul.f32 %v7995_v45, %v7995_v45  ;;  %v7382_v47 = vpop.f32.mrf.mxu1 }
 0x299   : > { %v3332_v33 = vadd.f32 %v3331_v54, %v3077_v22  ;;  %v4633_v22 = vmin.f32 %v4631_v52, %v4632_v19  ;;  %v8033_v54 = vld [vmem:[#allocation18_spill] sm:$0xff]  ;;  %v7391_v46 = vmul.f32 %v7996_v63, %v7996_v63  ;;  %v3928_v20 = vmax.f32 %v7213_v41, %v7238_v13 }
 0x29a   : > { %v2817_v17 = vadd.f32 %v8018_v9, %v2816_v32  ;;  %v3921_v30 = vmax.f32 %v3920_v4, %v8033_v54  ;;  %v7387_v32 = vmul.f32 %v7994_v58, %v7994_v58  ;;  %v7397_v52 = vmul.f32 %v7993_v21, %v7993_v21 }
 0x29b   : > { %v3333_v7 = vadd.f32 %v3332_v33, %v3078_v23  ;;  %v3906_v23 = vrot.slane %v3905_v43, 2  ;;  %v4625_v36 = vrot.slane %v4624_v16, 2  ;;  %v7402_v5 = vmul.f32 %v6946_v49, %v6946_v49  ;;  %v7409_v33 = vpop.f32.mrf.mxu1 }
 0x29c   : > { %v2818_v11 = vadd.f32 %v8023_v44, %v2817_v17  ;;  %v3915_v57 = vrot.slane %v3914_v40, 2  ;;  %v4640_v55 = vmin.f32 %v4639_v39, %v8033_v54  ;;  %v7407_v4 = vmul.f32 %v6960_v51, %v6960_v51 }
 0x29d   : > { %v3334_v9 = vadd.f32 %v3333_v7, %v3079_v12  ;;  %8034 = vst [vmem:[#allocation49_spill] sm:$0xff] %v7402_v5  ;;  %v4634_v12 = vrot.slane %v4633_v22, 2  ;;  %v3922_v7 = vrot.slane %v3921_v30, 4  ;;  %v3929_v39 = vmax.f32 %v3928_v20, %v7200_v37 }
 0x29e   : > { %v2819_v44 = vadd.f32 %v2818_v11, %v8026_v34  ;;  %v7414_v34 = vmul.f32 %v6972_v62, %v6972_v62  ;;  %v7418_v11 = vmul.f32 %v6983_v18, %v6983_v18  ;;  %v4626_v54 = vmin.f32 %v4624_v16, %v4625_v36 }
 0x29f   : > { %v3335_v19 = vadd.f32 %v3334_v9, %v3080_v8  ;;  %v3907_v9 = vmax.f32 %v3905_v43, %v3906_v23  ;;  %v4647_v0 = vmin.f32 %v7213_v41, %v7238_v13  ;;  %v3916_v49 = vmax.f32 %v3914_v40, %v3915_v57 }
 0x2a0   : > { %v2820_v17 = vadd.f32 %v2819_v44, %v8030_v38  ;;  %8035 = vst [vmem:[#allocation47_spill] sm:$0xff] %v7414_v34  ;;  %8036 = vst [vmem:[#allocation46_spill] sm:$0xff] %v7418_v11  ;;  %v4641_v38 = vrot.slane %v4640_v55, 4  ;;  %v3937_v44 = vmax.f32 %v7259_v56, %v7279_v27  ;;  %v7428_v62 = vmul.f32 %v8010_v26, %v8010_v26 }
 0x2a1   : > { %v3336_v8 = vadd.f32 %v3335_v19, %v3081_v50  ;;  %v4635_v11 = vmin.f32 %v4633_v22, %v4634_v12  ;;  %v3923_v20 = vmax.f32 %v3921_v30, %v3922_v7  ;;  %v7430_v50 = vpop.f32.mrf.mxu1  ;;  %v3930_v43 = vmax.f32 %v3929_v39, %v7225_v10 }
 0x2a2   : > { %v2821_v5 = vadd.f32 %v8025_v2, %v2820_v17  ;;  %v3938_v2 = vmax.f32 %v3937_v44, %v7249_v24  ;;  %v4656_v40 = vmin.f32 %v7259_v56, %v7279_v27  ;;  %v4627_v36 = vrot.slane %v4626_v54, 1 }
 0x2a3   : > { %v3337_v34 = vadd.f32 %v3336_v8, %v3082_v3  ;;  %v3908_v3 = vrot.slane %v3907_v9, 1  ;;  %v4648_v57 = vmin.f32 %v4647_v0, %v7200_v37  ;;  %v3917_v30 = vrot.slane %v3916_v49, 1  ;;  %v7450_v17 = vpop.f32.mrf.mxu1 }
 0x2a4   : > { %v2822_v16 = vadd.f32 %v8027_v25, %v2821_v5  ;;  %v4642_v19 = vmin.f32 %v4640_v55, %v4641_v38  ;;  %v3939_v12 = vmax.f32 %v3938_v2, %v7267_v48  ;;  %v7444_v5 = vmul.f32 %v8005_v60, %v8005_v60 }
 0x2a5   : > { %v3338_v23 = vadd.f32 %v3337_v34, %v7342_v28  ;;  %v7448_v7 = vmul.f32 %v8004_v15, %v8004_v15  ;;  %v4636_v28 = vrot.slane %v4635_v11, 1  ;;  %v3931_v34 = vrot.slane %v3930_v43, 4 }
 0x2a6   : > { %v2823_v22 = vadd.f32 %v2822_v16, %v7990_v61  ;;  %v3924_v61 = vrot.slane %v3923_v20, 2  ;;  %v4657_v55 = vmin.f32 %v4656_v40, %v7249_v24  ;;  %v4628_v8 = vmin.f32 %v4626_v54, %v4627_v36 }
 0x2a7   : > { %v3339_v25 = vadd.f32 %v3338_v23, %v7351_v35  ;;  %v3909_v35 = vmax.f32 %v3907_v9, %v3908_v3  ;;  %v4649_v38 = vmin.f32 %v4648_v57, %v7225_v10  ;;  %v3918_v16 = vmax.f32 %v3916_v49, %v3917_v30  ;;  %v8037_v49 = vld [vmem:[#allocation42_spill] sm:$0xff] }
 0x2a8   : > { %v2824_v0 = vadd.f32 %v2823_v22, %v7989_v59  ;;  %v4643_v2 = vrot.slane %v4642_v19, 2  ;;  %v3940_v23 = vrot.slane %v3939_v12, 4  ;;  %v4637_v56 = vmin.f32 %v4635_v11, %v4636_v28  ;;  %v7462_v22 = vpop.f32.mrf.mxu1  ;;  %v8038_v57 = vld [vmem:[#allocation38_spill] sm:$0xff] }
 0x2a9   : > { %v3340_v39 = vadd.f32 %v3339_v25, %v7365_v1  ;;  %v3946_v59 = vmax.f32 %v7313_v6, %v7354_v29  ;;  %v4665_v40 = vmin.f32 %v7313_v6, %v7354_v29  ;;  %v3925_v54 = vmax.f32 %v3923_v20, %v3924_v61  ;;  %v8040_v20 = vld [vmem:[#allocation45_spill] sm:$0xff] }
 0x2aa   : > { %v2825_v44 = vadd.f32 %v7991_v53, %v2824_v0  ;;  %v3932_v9 = vmax.f32 %v3930_v43, %v3931_v34  ;;  %v4658_v53 = vmin.f32 %v4657_v55, %v7267_v48  ;;  %v4650_v36 = vrot.slane %v4649_v38, 4 }
 0x2ab   : > { %v3341_v27 = vadd.f32 %v3340_v39, %v7374_v31  ;;  %v3947_v31 = vmax.f32 %v3946_v59, %v8038_v57  ;;  %v4666_v11 = vmin.f32 %v4665_v40, %v8038_v57  ;;  %v4093_v25 = vsel %vm4037_vm2, %v3918_v16, %v3909_v35  ;;  %v8039_v39 = vld [vmem:[#allocation44_spill] sm:$0xff] }
 0x2ac   : > { %v2826_v1 = vadd.f32 %v7992_v42, %v2825_v44  ;;  %v4644_v28 = vmin.f32 %v4642_v19, %v4643_v2  ;;  %v3941_v0 = vmax.f32 %v3939_v12, %v3940_v23  ;;  %v4805_v42 = vsel %vm4037_vm2, %v4637_v56, %v4628_v8 }
 0x2ad   : > { %v3342_v3 = vadd.f32 %v3341_v27, %v8037_v49  ;;  %v3948_v43 = vmax.f32 %v3947_v31, %v8040_v20  ;;  %v4667_v61 = vmin.f32 %v4666_v11, %v8040_v20  ;;  %v7475_v27 = vpop.f32.mrf.mxu1  ;;  %v3926_v55 = vrot.slane %v3925_v54, 1 }
 0x2ae   : > { %v2827_v30 = vadd.f32 %v2826_v1, %v7994_v58  ;;  %v3933_v44 = vrot.slane %v3932_v9, 2  ;;  %v4659_v59 = vrot.slane %v4658_v53, 4  ;;  %v4651_v35 = vmin.f32 %v4649_v38, %v4650_v36 }
 0x2af   : > { %v3343_v29 = vadd.f32 %v3342_v3, %v8039_v39  ;;  %v3949_v19 = vrot.slane %v3948_v43, 4  ;;  %v3955_v12 = vmax.f32 %v7409_v33, %v7450_v17  ;;  %v4645_v8 = vrot.slane %v4644_v28, 1  ;;  %v7486_v49 = vpop.f32.mrf.mxu1 }
 0x2b0   : > { %v2828_v34 = vadd.f32 %v2827_v30, %v7993_v21  ;;  %v3942_v16 = vrot.slane %v3941_v0, 2  ;;  %v4674_v2 = vmin.f32 %v7409_v33, %v7450_v17  ;;  %v4668_v40 = vrot.slane %v4667_v61, 4 }
 0x2b1   : > { %v3344_v58 = vadd.f32 %v3343_v29, %v7387_v32  ;;  %v3950_v21 = vmax.f32 %v3948_v43, %v3949_v19  ;;  %v3956_v1 = vmax.f32 %v3955_v12, %v7382_v47  ;;  %v3934_v32 = vmax.f32 %v3932_v9, %v3933_v44  ;;  %v8041_v12 = vld [vmem:[#allocation53_spill] sm:$0xff] }
 0x2b2   : > { %v2829_v56 = vadd.f32 %v7995_v45, %v2828_v34  ;;  %v4660_v38 = vmin.f32 %v4658_v53, %v4659_v59  ;;  %v4675_v3 = vmin.f32 %v4674_v2, %v7382_v47  ;;  %v3927_v36 = vmax.f32 %v3925_v54, %v3926_v55  ;;  %v7495_v53 = vpop.f32.mrf.mxu1 }
 0x2b3   : > { %v3345_v23 = vadd.f32 %v3344_v58, %v7397_v52  ;;  %v4652_v31 = vrot.slane %v4651_v35, 2  ;;  %v3957_v11 = vmax.f32 %v3956_v1, %v7430_v50  ;;  %v4646_v30 = vmin.f32 %v4644_v28, %v4645_v8 }
 0x2b4   : > { %v2830_v29 = vadd.f32 %v7996_v63, %v2829_v56  ;;  %v3951_v39 = vrot.slane %v3950_v21, 2  ;;  %v4676_v43 = vmin.f32 %v4675_v3, %v7430_v50  ;;  %v3943_v58 = vmax.f32 %v3941_v0, %v3942_v16 }
 0x2b5   : > { %v3346_v45 = vadd.f32 %v3345_v23, %v7379_v14  ;;  %v4669_v63 = vmin.f32 %v4667_v61, %v4668_v40  ;;  %v3958_v9 = vrot.slane %v3957_v11, 4  ;;  %v3935_v14 = vrot.slane %v3934_v32, 1  ;;  %v8042_v61 = vld [vmem:[#allocation46_spill] sm:$0xff] }
 0x2b6   : > { %v2831_v52 = vadd.f32 %v2830_v29, %v6960_v51  ;;  %v4661_v54 = vrot.slane %v4660_v38, 2  ;;  %v4677_v55 = vrot.slane %v4676_v43, 4  ;;  %v4094_v51 = vsel %vm4039_vm3, %v3927_v36, %v4093_v25  ;;  %v8043_v40 = vld [vmem:[#allocation6_spill] sm:$0xff] }
 0x2b7   : > { %v3347_v34 = vadd.f32 %v3346_v45, %v7391_v46  ;;  %v4653_v28 = vmin.f32 %v4651_v35, %v4652_v31  ;;  %v3959_v19 = vmax.f32 %v3957_v11, %v3958_v9  ;;  %v3952_v8 = vmax.f32 %v3950_v21, %v3951_v39  ;;  %v8044_v35 = vld [vmem:[#allocation49_spill] sm:$0xff] }
 0x2b8   : > { %v2832_v44 = vadd.f32 %v2831_v52, %v6983_v18  ;;  %v4678_v46 = vmin.f32 %v4676_v43, %v4677_v55  ;;  %v3964_v0 = vmax.f32 %v7475_v27, %v7495_v53  ;;  %v3944_v2 = vrot.slane %v3943_v58, 1  ;;  %v8045_v43 = vld [vmem:[#allocation47_spill] sm:$0xff] }
 0x2b9   : > { %v3348_v59 = vadd.f32 %v3347_v34, %v7407_v4  ;;  %v4670_v18 = vrot.slane %v4669_v63, 2  ;;  %v3960_v23 = vrot.slane %v3959_v19, 2  ;;  %v3936_v29 = vmax.f32 %v3934_v32, %v3935_v14 }
 0x2ba   : > { %v2833_v56 = vadd.f32 %v8041_v12, %v2832_v44  ;;  %v4662_v4 = vmin.f32 %v4660_v38, %v4661_v54  ;;  %v3965_v25 = vmax.f32 %v3964_v0, %v7462_v22  ;;  %v4806_v45 = vsel %vm4039_vm3, %v4646_v30, %v4805_v42 }
 0x2bb   : > { %v3349_v16 = vadd.f32 %v3348_v59, %v8042_v61  ;;  %v4654_v21 = vrot.slane %v4653_v28, 1  ;;  %v3961_v36 = vmax.f32 %v3959_v19, %v3960_v23  ;;  %v3953_v11 = vrot.slane %v3952_v8, 1  ;;  %v8046_v61 = vld [vmem:[#allocation8_spill] sm:$0xff]  ;;  %v8047_v23 = vld [vmem:[#allocation10_spill] sm:$0xff] }
 0x2bc   : > { %v2834_v1 = vadd.f32 %v8043_v40, %v2833_v56  ;;  %v4679_v52 = vrot.slane %v4678_v46, 2  ;;  %v3966_v39 = vmax.f32 %v3965_v25, %v7486_v49  ;;  %v3945_v9 = vmax.f32 %v3943_v58, %v3944_v2 }
 0x2bd   : > { %v3350_v3 = vadd.f32 %v3349_v16, %v8044_v35  ;;  %v4671_v44 = vmin.f32 %v4669_v63, %v4670_v18  ;;  %v4683_v32 = vmin.f32 %v7475_v27, %v7495_v53  ;;  %v4095_v14 = vsel %vm4041_vm4, %v3936_v29, %v4094_v51 }
 0x2be   : > { %v2835_v31 = vadd.f32 %v2834_v1, %v8005_v60  ;;  %v4663_v42 = vrot.slane %v4662_v4, 1  ;;  %v3967_v30 = vrot.slane %v3966_v39, 4  ;;  %v4655_v60 = vmin.f32 %v4653_v28, %v4654_v21 }
 0x2bf   : > { %v3351_v34 = vadd.f32 %v3350_v3, %v8045_v43  ;;  %v3962_v55 = vrot.slane %v3961_v36, 1  ;;  %v4684_v59 = vmin.f32 %v4683_v32, %v7462_v22  ;;  %v3954_v12 = vmax.f32 %v3952_v8, %v3953_v11  ;;  %v8049_v43 = vld [vmem:[#allocation9_spill] sm:$0xff] }
 0x2c0   : > { %v2836_v38 = vadd.f32 %v2835_v31, %v8004_v15  ;;  %v4680_v58 = vmin.f32 %v4678_v46, %v4679_v52  ;;  %v3968_v63 = vmax.f32 %v3966_v39, %v3967_v30  ;;  %v4096_v0 = vsel %vm4043_vm5, %v3945_v9, %v4095_v14  ;;  %v8050_v30 = vld [vmem:[#allocation57_spill] sm:$0xff] }
 0x2c1   : > { %v3352_v54 = vadd.f32 %v3351_v34, %v7444_v5  ;;  %v4672_v15 = vrot.slane %v4671_v44, 1  ;;  %v4685_v51 = vmin.f32 %v4684_v59, %v7486_v49  ;;  %v3100_v16 = vmul.f32 %v8046_v61, %v8046_v61 }
 0x2c2   : > { %v2837_v19 = vadd.f32 %v8010_v26, %v2836_v38  ;;  %v4664_v28 = vmin.f32 %v4662_v4, %v4663_v42  ;;  %v3969_v2 = vrot.slane %v3968_v63, 2  ;;  %v4807_v26 = vsel %vm4041_vm4, %v4655_v60, %v4806_v45  ;;  %v8048_v4 = vld [vmem:[#allocation13_spill] sm:$0xff] }
 0x2c3   : > { %v3353_v56 = vadd.f32 %v3352_v54, %v7448_v7  ;;  %v3963_v8 = vmax.f32 %v3961_v36, %v3962_v55  ;;  %v4686_v46 = vrot.slane %v4685_v51, 4  ;;  %v4097_v40 = vsel %vm4045_vm6, %v3954_v12, %v4096_v0  ;;  %v8051_v12 = vld [vmem:[#allocation17_spill] sm:$0xff] }
 0x2c4   : > { %v2838_v5 = vadd.f32 %v8046_v61, %v2837_v19  ;;  %v4681_v1 = vrot.slane %v4680_v58, 1  ;;  %v3970_v29 = vmax.f32 %v3968_v63, %v3969_v2  ;;  %v3101_v25 = vmul.f32 %v8047_v23, %v8047_v23  ;;  %v8053_v2 = vld [vmem:[#allocation16_spill] sm:$0xff] }
 0x2c5   : > { %v3354_v18 = vadd.f32 %v3353_v56, %v7428_v62  ;;  %v4673_v3 = vmin.f32 %v4671_v44, %v4672_v15  ;;  %v4687_v21 = vmin.f32 %v4685_v51, %v4686_v46  ;;  %v4808_v62 = vsel %vm4043_vm5, %v4664_v28, %v4807_v26  ;;  %v8052_v51 = vld [vmem:[#allocation19_spill] sm:$0xff]  ;;  %v8054_v46 = vld [vmem:[#allocation18_spill] sm:$0xff] }
 0x2c6   : > { %v2839_v7 = vadd.f32 %v2838_v5, %v8047_v23  ;;  %v3971_v11 = vrot.slane %v3970_v29, 1  ;;  %v3102_v36 = vmul.f32 %v8048_v4, %v8048_v4  ;;  %v4098_v52 = vsel %vm4047_vm7, %v3963_v8, %v4097_v40 }
 0x2c7   : > { %v3355_v35 = vadd.f32 %v3354_v18, %v3100_v16  ;;  %v4688_v39 = vrot.slane %v4687_v21, 2  ;;  %v4682_v9 = vmin.f32 %v4680_v58, %v4681_v1  ;;  %v3103_v44 = vmul.f32 %v8049_v43, %v8049_v43 }
 0x2c8   : > { %v2840_v31 = vadd.f32 %v2839_v7, %v8048_v4  ;;  %v3972_v32 = vmax.f32 %v3970_v29, %v3971_v11  ;;  %v4809_v14 = vsel %vm4045_vm6, %v4673_v3, %v4808_v62  ;;  %v3104_v55 = vmul.f32 %v8050_v30, %v8050_v30 }
 0x2c9   : > { %v3356_v45 = vadd.f32 %v3355_v35, %v3101_v25  ;;  %v4689_v42 = vmin.f32 %v4687_v21, %v4688_v39  ;;  %v4810_v63 = vsel %vm4047_vm7, %v4682_v9, %v4809_v14  ;;  %v3105_v56 = vmul.f32 %v8051_v12, %v8051_v12 }
 0x2ca   : > { %v2841_v34 = vadd.f32 %v8049_v43, %v2840_v31  ;;  %v4099_v60 = vsel %vm4049_vm8, %v3972_v32, %v4098_v52  ;;  %v3106_v5 = vmul.f32 %v8052_v51, %v8052_v51  ;;  %v3107_v26 = vmul.f32 %v8053_v2, %v8053_v2 }
 0x2cb   : > { %v3357_v38 = vadd.f32 %v3356_v45, %v3102_v36  ;;  %4115 = vst [vmem:[%s6131_s7 + $0x38] sm:$0xff] %v4099_v60  ;;  %v4690_v19 = vrot.slane %v4689_v42, 1  ;;  %v3108_v7 = vmul.f32 %v8054_v46, %v8054_v46  ;;  %v3109_v29 = vmul.f32 %v7213_v41, %v7213_v41 }
 0x2cc   : > { %v2842_v54 = vadd.f32 %v8050_v30, %v2841_v34  ;;  %v3110_v21 = vmul.f32 %v7238_v13, %v7238_v13  ;;  %v3111_v31 = vmul.f32 %v7200_v37, %v7200_v37  ;;  %v3112_v45 = vmul.f32 %v7225_v10, %v7225_v10  ;;  %v8056_v34 = vld [vmem:[#allocation21_spill] sm:$0xff] }
 0x2cd   : > { %v3358_v59 = vadd.f32 %v3357_v38, %v3103_v44  ;;  %v4691_v15 = vmin.f32 %v4689_v42, %v4690_v19  ;;  %v3114_v32 = vmul.f32 %v8056_v34, %v8056_v34  ;;  %v3115_v44 = vmul.f32 %v7249_v24, %v7249_v24 }
 0x2ce   : > { %v2843_v58 = vadd.f32 %v2842_v54, %v8051_v12  ;;  %v3116_v14 = vmul.f32 %v7267_v48, %v7267_v48  ;;  %v3117_v54 = vmul.f32 %v7313_v6, %v7313_v6 }
 0x2cf   : > { %v3359_v0 = vadd.f32 %v3358_v59, %v3104_v55  ;;  %v4811_v28 = vsel %vm4049_vm8, %v4691_v15, %v4810_v63  ;;  %v8057_v55 = vld [vmem:[#allocation43_spill] sm:$0xff]  ;;  %v3121_v15 = vmul.f32 %v7409_v33, %v7409_v33 }
 0x2d0   : > { %v2844_v61 = vadd.f32 %v2843_v58, %v8052_v51  ;;  %4827 = vst [vmem:[%s6138_s10 + $0x38] sm:$0xff] %v4811_v28  ;;  %v3118_v12 = vmul.f32 %v8057_v55, %v8057_v55  ;;  %v3119_v58 = vmul.f32 %v8038_v57, %v8038_v57  ;;  %v3123_v28 = vmul.f32 %v7382_v47, %v7382_v47 }
 0x2d1   : > { %v3360_v16 = vadd.f32 %v3359_v0, %v3105_v56  ;;  %v3120_v56 = vmul.f32 %v8040_v20, %v8040_v20 }
 0x2d2   : > { %v2845_v18 = vadd.f32 %v8053_v2, %v2844_v61 }
 0x2d3   : > { %v3361_v8 = vadd.f32 %v3360_v16, %v3106_v5  ;;  %v3122_v5 = vmul.f32 %v7450_v17, %v7450_v17 }
 0x2d4   : > { %v2846_v23 = vadd.f32 %v8054_v46, %v2845_v18  ;;  %v3124_v18 = vmul.f32 %v7430_v50, %v7430_v50 }
 0x2d5   : > { %v3362_v40 = vadd.f32 %v3361_v8, %v3107_v26  ;;  %v3125_v8 = vmul.f32 %v7475_v27, %v7475_v27 }
 0x2d6   : > { %v2847_v1 = vadd.f32 %v2846_v23, %v7213_v41  ;;  %v8055_v41 = vld [vmem:[#allocation20_spill] sm:$0xff] }
 0x2d7   : > { %v3363_v25 = vadd.f32 %v3362_v40, %v3108_v7  ;;  %v3113_v39 = vmul.f32 %v8055_v41, %v8055_v41  ;;  %v3127_v40 = vmul.f32 %v7462_v22, %v7462_v22 }
 0x2d8   : > { %v2848_v35 = vadd.f32 %v2847_v1, %v7238_v13 }
 0x2d9   : > { %v3364_v3 = vadd.f32 %v3363_v25, %v3109_v29  ;;  %v3128_v29 = vmul.f32 %v7486_v49, %v7486_v49 }
 0x2da   : > { %v2849_v4 = vadd.f32 %v7200_v37, %v2848_v35 }
 0x2db   : > { %v3365_v62 = vadd.f32 %v3364_v3, %v3110_v21  ;;  %v3390_v3 = vlaneseq }
 0x2dc   : > { %v2850_v11 = vadd.f32 %v7225_v10, %v2849_v4 }
 0x2dd   : > { %v3366_v36 = vadd.f32 %v3365_v62, %v3111_v31  ;;  %v3391_v62 = vshrl.u32 %v3390_v3, 7 }
 0x2de   : > { %v2851_v52 = vadd.f32 %v2850_v11, %v8055_v41 }
 0x2df   : > { %v3367_v43 = vadd.f32 %v3366_v36, %v3112_v45  ;;  %vm3392_vm9 = vcmp.eq.s32.totalorder %v3391_v62, 0 }
 0x2e0   : > { %v2852_v13 = vadd.f32 %v2851_v52, %v8056_v34 }
 0x2e1   : > { %v3368_v9 = vadd.f32 %v3367_v43, %v3113_v39 }
 0x2e2   : > { %v2853_v37 = vadd.f32 %v7249_v24, %v2852_v13 }
 0x2e3   : > { %v3369_v38 = vadd.f32 %v3368_v9, %v3114_v32 }
 0x2e4   : > { %v2854_v10 = vadd.f32 %v7267_v48, %v2853_v37 }
 0x2e5   : > { %v3370_v42 = vadd.f32 %v3369_v38, %v3115_v44 }
 0x2e6   : > { %v2855_v30 = vadd.f32 %v2854_v10, %v7313_v6 }
 0x2e7   : > { %v3371_v60 = vadd.f32 %v3370_v42, %v3116_v14 }
 0x2e8   : > { %v2856_v59 = vadd.f32 %v2855_v30, %v8057_v55 }
 0x2e9   : > { %v3372_v19 = vadd.f32 %v3371_v60, %v3117_v54 }
 0x2ea   : > { %v2857_v24 = vadd.f32 %v8038_v57, %v2856_v59 }
 0x2eb   : > { %v3373_v63 = vadd.f32 %v3372_v19, %v3118_v12 }
 0x2ec   : > { %v2858_v48 = vadd.f32 %v8040_v20, %v2857_v24 }
 0x2ed   : > { %v3374_v0 = vadd.f32 %v3373_v63, %v3119_v58 }
 0x2ee   : > { %v2859_v6 = vadd.f32 %v2858_v48, %v7409_v33 }
 0x2ef   : > { %v3375_v51 = vadd.f32 %v3374_v0, %v3120_v56 }
 0x2f0   : > { %v2860_v61 = vadd.f32 %v2859_v6, %v7450_v17 }
 0x2f1   : > { %v3376_v16 = vadd.f32 %v3375_v51, %v3121_v15 }
 0x2f2   : > { %v2861_v57 = vadd.f32 %v7382_v47, %v2860_v61  ;;  %v3126_v47 = vmul.f32 %v7495_v53, %v7495_v53 }
 0x2f3   : > { %v3377_v20 = vadd.f32 %v3376_v16, %v3122_v5 }
 0x2f4   : > { %v2862_v2 = vadd.f32 %v7430_v50, %v2861_v57 }
 0x2f5   : > { %v3378_v33 = vadd.f32 %v3377_v20, %v3123_v28 }
 0x2f6   : > { %v2863_v26 = vadd.f32 %v2862_v2, %v7475_v27 }
 0x2f7   : > { %v3379_v17 = vadd.f32 %v3378_v33, %v3124_v18 }
 0x2f8   : > { %v2864_v46 = vadd.f32 %v2863_v26, %v7495_v53 }
 0x2f9   : > { %v3380_v23 = vadd.f32 %v3379_v17, %v3125_v8 }
 0x2fa   : > { %v2865_v7 = vadd.f32 %v7462_v22, %v2864_v46 }
 0x2fb   : > { %v3381_v50 = vadd.f32 %v3380_v23, %v3126_v47 }
 0x2fc   : > { %v2866_v1 = vadd.f32 %v7486_v49, %v2865_v7 }
 0x2fd   : > { %v3382_v27 = vadd.f32 %v3381_v50, %v3127_v40 }
 0x2fe   : > { %v2867_v25 = vrot.slane %v2866_v1, 4 }
 0x2ff   : > { %v3383_v35 = vadd.f32 %v3382_v27, %v3128_v29 }
 0x300   : > { %v2868_v21 = vadd.f32 %v2867_v25, %v2866_v1 }
 0x301   : > { %v3384_v53 = vrot.slane %v3383_v35, 4 }
 0x302   : > { %v2869_v4 = vrot.slane %v2868_v21, 2 }
 0x303   : > { %v3385_v31 = vadd.f32 %v3384_v53, %v3383_v35 }
 0x304   : > { %v2870_v11 = vadd.f32 %v2869_v4, %v2868_v21 }
 0x305   : > { %v3386_v22 = vrot.slane %v3385_v31, 2 }
 0x306   : > { %v2871_v45 = vrot.slane %v2870_v11, 1 }
 0x307   : > { %v3387_v36 = vadd.f32 %v3386_v22, %v3385_v31 }
 0x308   : > { %v2872_v49 = vadd.f32 %v2871_v45, %v2870_v11 }
 0x309   : > { %v3388_v41 = vrot.slane %v3387_v36, 1 }
 0x30a   : > { %v3393_v52 = vsel %vm3392_vm9, %v2872_v49, 0.0 }
 0x30b   : > { %v3389_v39 = vadd.f32 %v3388_v41, %v3387_v36  ;;  %3394 = vst [vmem:[%s257_s14] sm:$0xff] %v3393_v52 }
 0x30d   : > { %v3395_v43 = vsel %vm3392_vm9, %v3389_v39, 0.0 }
 0x30e   : > { %3396 = vst [vmem:[%s261_s17] sm:$0xff] %v3395_v43 }
 0x30f PF: > { %s16_s18 = sadd.s32 1, %s5786_s18  }
 0x310   : > { %p13_p6 = scmp.ge.s32.totalorder %s16_s18, 6  }
 0x312   :  { %15 = sbr.rel (!%p13_p6) target bundleno = 1 (0x1), region = 94 }

</bundles_post_ra>
